<compile_context>
chip_gen: v7x
topology: tpu7x:2x2x1
jax: 0.10.0
libtpu: 0.0.40
codegen_flags: <defaults>
</compile_context>

<pallas_src>
import jax
import jax.numpy as jnp
from jax import lax
from jax.experimental import pallas as pl
from jax.experimental.pallas import tpu as pltpu

LATENT_DIM = 32
DT = 0.1
NEIGHBOR_COUPLING = 0.1


def _make_kernel(H, W, D, nc, num_steps):
    """Builds the Pallas kernel body; all shape/step parameters are static."""
    D2 = 2 * D
    HW = H * W

    def from_ahead(x, delta):
        # Value at flat lane index i is taken from flat index (i + delta) mod HW.
        # pltpu.roll follows jnp.roll semantics (out[j] = x[(j - shift) % N]);
        # shift is kept non-negative.
        return pltpu.roll(x, (-delta) % HW, axis=1)

    def kernel(s_ref, u_ref, o_ref):
        u = u_ref[...]      # (2D, 2D) transposed block-real U, resident across steps
        s = s_ref[...]      # (2D, H*W) fused [real ; imag] state, lane axis = H*W

        if nc != 0.0:
            # Lane coordinate -> w = lane % W. Computed once, hoisted out of the
            # step loop (loop-invariant), reused by every coupling step.
            col = lax.broadcasted_iota(jnp.int32, (D2, HW), 1)
            w_of = col % W
            is_w0 = w_of == 0
            is_wlast = w_of == (W - 1)

            def couple(x):
                # Running accumulation: never four shifted copies live at once.
                acc = from_ahead(x, W)                 # up:   (h+1 mod H, w)
                acc = acc + from_ahead(x, -W)          # down: (h-1 mod H, w)
                # left (h, (w+1) mod W): +1, except wrap back by W-1 at w == W-1
                acc = acc + jnp.where(is_wlast,
                                      from_ahead(x, -(W - 1)),
                                      from_ahead(x, 1))
                # right (h, (w-1) mod W): -1, except wrap fwd by W-1 at w == 0
                acc = acc + jnp.where(is_w0,
                                      from_ahead(x, W - 1),
                                      from_ahead(x, -1))
                return x + nc * acc
        else:
            couple = lambda x: x

        def step(_, x):
            x = couple(x)
            # Single (2D,2D) @ (2D,HW) block-real matmul == complex (state @ U),
            # transposed so the MXU output is lane-dense (N = H*W).
            return jnp.dot(u, x, preferred_element_type=jnp.float32)

        if num_steps == 1:
            out = step(0, s)
        else:
            # Partial unroll so the LLO scheduler can interleave XLU rolls, VPU
            # adds and MXU pushes across steps, with bounded code size.
            out = lax.fori_loop(0, num_steps, step, s, unroll=min(num_steps, 4))
        o_ref[...] = out

    return kernel


def koopman_nca_forward(state, A, dt=DT, neighbor_coupling=NEIGHBOR_COUPLING,
                        num_steps=1):
    """state: (H, W, D) complex64, A: (D, D) complex64 -> (H, W, D) complex64.

    Applies `num_steps` KoopmanNCA updates inside one pallas_call
    (num_steps=1 matches the PyTorch module's forward exactly).
    Note: neighbor_coupling / num_steps are trace-time Python constants.
    """
    H, W, D = state.shape
    D2, HW = 2 * D, H * W
    nc = float(neighbor_coupling)
    num_steps = int(num_steps)

    if D2 % 8 != 0 or HW % 128 != 0 or H < 2 or W < 2:
        raise ValueError(
            "koopman_nca_forward requires 2*latent_dim % 8 == 0, H*W % 128 == 0 "
            f"and H, W >= 2 (got H={H}, W={W}, D={D}).")

    # --- Cayley transform (tiny DxD complex linear algebra): plain JAX glue.
    G = A - jnp.conj(A).T
    I = jnp.eye(D, dtype=jnp.complex64)
    U = jnp.linalg.inv(I - 0.5 * dt * G) @ (I + 0.5 * dt * G)

    steps_in_kernel = num_steps
    if nc == 0.0 and num_steps > 1:
        # Pure-Koopman fast path: fold all steps into the (tiny) propagator.
        U = jnp.linalg.matrix_power(U, num_steps)
        steps_in_kernel = 1

    ur = jnp.real(U).astype(jnp.float32)
    ui = jnp.imag(U).astype(jnp.float32)
    # Transposed block-real form:  out_T = u_t @ state_T  ==  (state @ U)^T.
    u_t = jnp.block([[ur.T, -ui.T], [ui.T, ur.T]])             # (2D, 2D)

    # Fused, transposed state: rows = [real ; imag], lanes = flattened H*W.
    sr = jnp.real(state).astype(jnp.float32).reshape(HW, D)
    si = jnp.imag(state).astype(jnp.float32).reshape(HW, D)
    s_t = jnp.concatenate([sr, si], axis=1).T                  # (2D, H*W)
    # TODO(synk): a zero-copy complex64->f32 bitcast with a host-permuted U
    # (interleaved [re,im] feature layout) would remove this split/transpose
    # pass entirely, but gives up lane-density; under jit XLA fuses the
    # split+transpose into one small copy, so the lane-dense layout wins here.

    kernel = _make_kernel(H, W, D, nc, steps_in_kernel)

    cost = pl.CostEstimate(
        flops=int(steps_in_kernel * (2 * D2 * D2 * HW + 10 * D2 * HW)),
        transcendentals=0,
        bytes_accessed=int(4 * (2 * D2 * HW + D2 * D2)),
    )

    out_t = pl.pallas_call(
        kernel,
        out_shape=jax.ShapeDtypeStruct((D2, HW), jnp.float32),
        grid=(1,),
        in_specs=[pl.BlockSpec((D2, HW), lambda i: (0, 0)),
                  pl.BlockSpec((D2, D2), lambda i: (0, 0))],
        out_specs=pl.BlockSpec((D2, HW), lambda i: (0, 0)),
        compiler_params=pltpu.CompilerParams(
            dimension_semantics=("arbitrary",)),
        cost_estimate=cost,
    )(s_t, u_t)

    out = out_t.T.reshape(H, W, D2)
    return lax.complex(out[..., :D], out[..., D:])


def koopman_nca_reference(state, A, dt=DT, nc=NEIGHBOR_COUPLING):
    """Pure-JAX reference mirroring the PyTorch forward exactly (one step)."""
    H, W, D = state.shape
    G = A - jnp.conj(A).T
    I = jnp.eye(D, dtype=jnp.complex64)
    U = jnp.linalg.inv(I - 0.5 * dt * G) @ (I + 0.5 * dt * G)
    if nc != 0:
        up = jnp.roll(state, -1, axis=0)
        down = jnp.roll(state, 1, axis=0)
        left = jnp.roll(state, -1, axis=1)
        right = jnp.roll(state, 1, axis=1)
        state = state + nc * (up + down + left + right)
    return (state.reshape(-1, D) @ U).reshape(H, W, D)


if __name__ == "__main__":
    H, W, D = 16, 16, LATENT_DIM
    key = jax.random.PRNGKey(0)
    k1, k2, k3, k4 = jax.random.split(key, 4)

    # Deterministic params: module uses A = 0.01 * eye(D) (complex); add a small
    # deterministic complex perturbation so U != I and the block-real matmul
    # path is exercised non-trivially.
    A = (0.01 * jnp.eye(D, dtype=jnp.complex64)
         + 0.01 * lax.complex(jax.random.normal(k3, (D, D), jnp.float32),
                              jax.random.normal(k4, (D, D), jnp.float32)))
    state = lax.complex(jax.random.normal(k1, (H, W, D), jnp.float32),
                        jax.random.normal(k2, (H, W, D), jnp.float32))

    fwd = jax.jit(koopman_nca_forward,
                  static_argnames=("dt", "neighbor_coupling", "num_steps"))

    # Single step: matches the PyTorch module's forward.
    out = jax.block_until_ready(fwd(state, A))
    ref = koopman_nca_reference(state, A)
    assert out.shape == (H, W, D) and out.dtype == jnp.complex64
    err = float(jnp.max(jnp.abs(out - ref)))
    assert err < 1e-3, f"single-step mismatch: max abs err = {err}"

    # Fused multi-step path (state + U stay resident in VMEM across steps).
    n_steps = 5
    out_n = jax.block_until_ready(fwd(state, A, num_steps=n_steps))
    ref_n = state
    for _ in range(n_steps):
        ref_n = koopman_nca_reference(ref_n, A)
    err_n = float(jnp.max(jnp.abs(out_n - ref_n)))
    assert err_n < 5e-3, f"multi-step mismatch: max abs err = {err_n}"

    print("KERNEL_OK")
</pallas_src>

<mosaic_0001>
module attributes {stable_mosaic.version = 11 : i64} {
  func.func @kernel(%arg0: i32, %arg1: memref<64x256xf32, #tpu.memory_space<vmem>>, %arg2: memref<64x64xf32, #tpu.memory_space<vmem>>, %arg3: memref<64x256xf32, #tpu.memory_space<vmem>>) attributes {dimension_semantics = [#tpu.dimension_semantics<arbitrary>], iteration_bounds = array<i64: 1>, scalar_prefetch = 0 : i64, scratch_operands = 0 : i64, tpu.core_type = #tpu.core_type<tc>, window_params = [{pipeline_mode = #tpu.pipeline_mode<synchronous>, transform_indices = @transform_0, window_bounds = array<i64: 64, 256>}, {pipeline_mode = #tpu.pipeline_mode<synchronous>, transform_indices = @transform_1, window_bounds = array<i64: 64, 64>}, {pipeline_mode = #tpu.pipeline_mode<synchronous>, transform_indices = @transform_2, window_bounds = array<i64: 64, 256>}]} {
    %c0 = arith.constant 0 : index
    %c0_0 = arith.constant 0 : index
    %0 = vector.load %arg2[%c0, %c0_0] : memref<64x64xf32, #tpu.memory_space<vmem>>, vector<64x64xf32>
    %c0_1 = arith.constant 0 : index
    %c0_2 = arith.constant 0 : index
    %1 = vector.load %arg1[%c0_1, %c0_2] : memref<64x256xf32, #tpu.memory_space<vmem>>, vector<64x256xf32>
    %2 = tpu.iota {dimensions = array<i32: 1>} : vector<64x256xi32>
    %c16_i32 = arith.constant 16 : i32
    %c0_i32 = arith.constant 0 : i32
    %3 = arith.cmpi eq, %c16_i32, %c0_i32 : i32
    %c1_i32 = arith.constant 1 : i32
    %4 = arith.select %3, %c1_i32, %c16_i32 : i32
    %5 = vector.broadcast %4 : i32 to vector<64x256xi32>
    %6 = arith.remsi %2, %5 : vector<64x256xi32>
    %c0_i32_3 = arith.constant 0 : i32
    %7 = vector.broadcast %c0_i32_3 : i32 to vector<64x256xi32>
    %8 = arith.cmpi ne, %6, %7 : vector<64x256xi32>
    %c0_i32_4 = arith.constant 0 : i32
    %9 = vector.broadcast %c0_i32_4 : i32 to vector<64x256xi32>
    %10 = arith.cmpi slt, %6, %9 : vector<64x256xi32>
    %c0_i32_5 = arith.constant 0 : i32
    %11 = arith.cmpi slt, %4, %c0_i32_5 : i32
    %12 = vector.broadcast %11 : i1 to vector<64x256xi1>
    %13 = vector.broadcast %12 : vector<64x256xi1> to vector<64x256xi1>
    %14 = arith.xori %10, %13 : vector<64x256xi1>
    %15 = arith.andi %14, %8 : vector<64x256xi1>
    %16 = vector.broadcast %4 : i32 to vector<64x256xi32>
    %17 = arith.addi %6, %16 : vector<64x256xi32>
    %18 = arith.select %15, %17, %6 : vector<64x256xi1>, vector<64x256xi32>
    %c0_i32_6 = arith.constant 0 : i32
    %19 = vector.broadcast %c0_i32_6 : i32 to vector<64x256xi32>
    %20 = arith.cmpi eq, %18, %19 : vector<64x256xi32>
    %c15_i32 = arith.constant 15 : i32
    %21 = vector.broadcast %c15_i32 : i32 to vector<64x256xi32>
    %22 = arith.cmpi eq, %18, %21 : vector<64x256xi32>
    %c240_i32 = arith.constant 240 : i32
    %23 = tpu.dynamic_rotate %1 by %c240_i32 dim 1 : vector<64x256xf32>, i32 -> vector<64x256xf32>
    %c16_i32_7 = arith.constant 16 : i32
    %24 = tpu.dynamic_rotate %1 by %c16_i32_7 dim 1 : vector<64x256xf32>, i32 -> vector<64x256xf32>
    %25 = arith.addf %23, %24 : vector<64x256xf32>
    %c15_i32_8 = arith.constant 15 : i32
    %26 = tpu.dynamic_rotate %1 by %c15_i32_8 dim 1 : vector<64x256xf32>, i32 -> vector<64x256xf32>
    %c255_i32 = arith.constant 255 : i32
    %27 = tpu.dynamic_rotate %1 by %c255_i32 dim 1 : vector<64x256xf32>, i32 -> vector<64x256xf32>
    %28 = arith.select %22, %26, %27 : vector<64x256xi1>, vector<64x256xf32>
    %29 = arith.addf %25, %28 : vector<64x256xf32>
    %c241_i32 = arith.constant 241 : i32
    %30 = tpu.dynamic_rotate %1 by %c241_i32 dim 1 : vector<64x256xf32>, i32 -> vector<64x256xf32>
    %c1_i32_9 = arith.constant 1 : i32
    %31 = tpu.dynamic_rotate %1 by %c1_i32_9 dim 1 : vector<64x256xf32>, i32 -> vector<64x256xf32>
    %32 = arith.select %20, %30, %31 : vector<64x256xi1>, vector<64x256xf32>
    %33 = arith.addf %29, %32 : vector<64x256xf32>
    %cst = arith.constant 1.000000e-01 : f32
    %34 = vector.broadcast %cst : f32 to vector<64x256xf32>
    %35 = arith.mulf %34, %33 : vector<64x256xf32>
    %36 = arith.addf %1, %35 : vector<64x256xf32>
    %cst_10 = arith.constant dense<0.000000e+00> : vector<64x256xf32>
    %37 = tpu.matmul %0, %36, %cst_10 {dimension_numbers = #tpu.dot_dimension_numbers<[1], [0], [0], [1], [0, 0, 1, 1], [], []>} : vector<64x64xf32>, vector<64x256xf32>, vector<64x256xf32> -> vector<64x256xf32>
    %c0_11 = arith.constant 0 : index
    %c0_12 = arith.constant 0 : index
    %38 = vector.load %arg3[%c0_11, %c0_12] : memref<64x256xf32, #tpu.memory_space<vmem>>, vector<64x256xf32>
    tpu.vector_store %arg3[%c0_11, %c0_12], %37 {strides = array<i32>} : memref<64x256xf32, #tpu.memory_space<vmem>>, vector<64x256xf32>,
    return
  }
  func.func @transform_0(%arg0: i32) -> (i32, i32) {
    %c0_i32 = arith.constant 0 : i32
    %c0_i32_0 = arith.constant 0 : i32
    %c0_i32_1 = arith.constant 0 : i32
    return %c0_i32, %c0_i32_0 : i32, i32
  }
  func.func @transform_1(%arg0: i32) -> (i32, i32) {
    %c0_i32 = arith.constant 0 : i32
    %c0_i32_0 = arith.constant 0 : i32
    %c0_i32_1 = arith.constant 0 : i32
    return %c0_i32, %c0_i32_0 : i32, i32
  }
  func.func @transform_2(%arg0: i32) -> (i32, i32) {
    %c0_i32 = arith.constant 0 : i32
    %c0_i32_0 = arith.constant 0 : i32
    %c0_i32_1 = arith.constant 0 : i32
    return %c0_i32, %c0_i32_0 : i32, i32
  }
}

</mosaic_0001>

<bundles_post_ra>
// kernel: custom-call.3
= control target key start
LH: loop header
LB: loop body
LE: loop exit
PB: predicated region body
PF: predicated region fallthrough
CT: control target
= control target key end

     0   :  { %s61_s0 = inlined_call_operand.vmem [shape: c64[32,32], index: 0, kind: input, shape index: {}]   ;;  %s62_s1 = inlined_call_operand.vmem [shape: f32[32,32], index: 1, kind: output, shape index: {}]  }
   0x1   :  { %v20_v0 = vld [vmem:[%s61_s0 + $0x20] sm:$0xff]  ;;  %v21_v1 = vld [vmem:[%s61_s0 + $0x28] sm:$0xff]  ;;  %v23_v2 = vld [vmem:[%s61_s0 + $0x30] sm:$0xff] }
   0x2   :  { %4 = vst [vmem:[%s62_s1] sm:$0xff] %v20_v0  ;;  %22 = vst [vmem:[%s62_s1 + $0x8] sm:$0xff] %v21_v1  ;;  %v25_v3 = vld [vmem:[%s61_s0 + $0x38] sm:$0xff] }
   0x3   :  { %24 = vst [vmem:[%s62_s1 + $0x10] sm:$0xff] %v23_v2  ;;  %26 = vst [vmem:[%s62_s1 + $0x18] sm:$0xff] %v25_v3 }

// kernel: custom-call.2
= control target key start
LH: loop header
LB: loop body
LE: loop exit
PB: predicated region body
PF: predicated region fallthrough
CT: control target
= control target key end

     0   :  { %s56_s0 = inlined_call_operand.vmem [shape: c64[32,32], index: 0, kind: input, shape index: {}]   ;;  %s57_s1 = inlined_call_operand.vmem [shape: f32[32,32], index: 1, kind: output, shape index: {}]  }
   0x1   :  { %v2_v0 = vld [vmem:[%s56_s0] sm:$0xff]  ;;  %v16_v1 = vld [vmem:[%s56_s0 + $0x8] sm:$0xff]  ;;  %v18_v2 = vld [vmem:[%s56_s0 + $0x10] sm:$0xff] }
   0x2   :  { %3 = vst [vmem:[%s57_s1] sm:$0xff] %v2_v0  ;;  %17 = vst [vmem:[%s57_s1 + $0x8] sm:$0xff] %v16_v1  ;;  %v20_v3 = vld [vmem:[%s56_s0 + $0x18] sm:$0xff] }
   0x3   :  { %19 = vst [vmem:[%s57_s1 + $0x10] sm:$0xff] %v18_v2  ;;  %21 = vst [vmem:[%s57_s1 + $0x18] sm:$0xff] %v20_v3 }

// kernel: custom-call.11
= control target key start
LH: loop header
LB: loop body
LE: loop exit
PB: predicated region body
PF: predicated region fallthrough
CT: control target
= control target key end

     0   :  { %7 = vsyncpa [#allocation6], 0  ;;  %s1888_s0 = inlined_call_operand.vmem [shape: f32[32,32], index: 0, kind: input, shape index: {}]   ;;  %s1889_s1 = inlined_call_operand.vmem [shape: f32[32,32], index: 1, kind: input, shape index: {}]   ;;  %s1890_s2 = inlined_call_operand.vmem [shape: f32[32,32], index: 2, kind: output, shape index: {0}]   ;;  %s1891_s3 = inlined_call_operand.vmem [shape: f32[32,32], index: 3, kind: output, shape index: {1}]   ;;  %s1892_s4 = inlined_call_operand.hbm [shape: s32[32], index: 4, kind: output, shape index: {2}]   ;;  %s1893_s5 = inlined_call_operand.vmem [shape: s32[32], index: 5, kind: output, shape index: {3}]  }
   0x1   :  { %s21_s20 = scalar_lea.vmem %s1888_s0, 24 }
   0x2   :  { %p910_p0 = scmp.gt.s32.totalorder %s1888_s0, %s21_s20 }
   0x3   :  { %s1430_s23 = smov (!%p910_p0), [#allocation0]   ;;  %s1434_s26 = smov (!%p910_p0), %s1888_s0  }
   0x4   :  { %911 = sbr.rel (%p910_p0) target bundleno = 21 (0x15), region = 237 }
   0xb LB: > { %v55_v0 = vld [vmem:[%s1436_s26] sm:$0xff]  ;;  %s57_s26 = scalar_lea.vmem %s1436_s26, 8   ;;  %s1436_s26 = sphi %s1434_s26, %s57_s26   ;;  %s1432_s23 = sphi %s1430_s23, %s58_s23  }
   0xc   : > { %56 = vst [vmem:[%s1432_s23] sm:$0xff] %v55_v0  ;;  %s58_s23 = scalar_lea.vmem %s1432_s23, 8   ;;  %p52_p1 = scmp.gt.s32.totalorder %s57_s26, %s21_s20 }
   0xe   :  { %54 = sbr.rel (!%p52_p1) target bundleno = 11 (0xb), region = 243 }
  0x15 PF:  { %s83_s29 = scalar_lea.vmem %s1889_s1, 24 }
  0x16   :  { %p930_p2 = scmp.gt.s32.totalorder %s1889_s1, %s83_s29 }
  0x17   :  { %s1438_s0 = smov (!%p930_p2), [#allocation1]   ;;  %s1442_s9 = smov (!%p930_p2), %s1889_s1  }
  0x18   :  { %931 = sbr.rel (%p930_p2) target bundleno = 41 (0x29), region = 259 }
  0x1f LB: > { %v117_v1 = vld [vmem:[%s1444_s9] sm:$0xff]  ;;  %s119_s9 = scalar_lea.vmem %s1444_s9, 8   ;;  %s1444_s9 = sphi %s1442_s9, %s119_s9   ;;  %s1440_s0 = sphi %s1438_s0, %s120_s0  }
  0x20   : > { %118 = vst [vmem:[%s1440_s0] sm:$0xff] %v117_v1  ;;  %s120_s0 = scalar_lea.vmem %s1440_s0, 8   ;;  %p114_p3 = scmp.gt.s32.totalorder %s119_s9, %s83_s29 }
  0x22   :  { %116 = sbr.rel (!%p114_p3) target bundleno = 31 (0x1f), region = 265 }
  0x29 PF:  { %v132_v2 = vld [vmem:[#allocation0] sm:$0xff]  ;;  %v136_v3 = vld [vmem:[#allocation0 + $0x8] sm:$0xff]  ;;  %v140_v4 = vld [vmem:[#allocation0 + $0x10] sm:$0xff]  ;;  %v161_v5 = vlaneseq  ;;  %v1470_v9 = vmov 0   ;;  %s1446_s1 = smov 0  }
  0x2a   :  { %133 = vst [vmem:[#allocation2] sm:$0xff] %v132_v2  ;;  %137 = vst [vmem:[#allocation2 + $0x8] sm:$0xff] %v136_v3  ;;  %v144_v6 = vld [vmem:[#allocation0 + $0x18] sm:$0xff]  ;;  %v146_v7 = vld [vmem:[#allocation1] sm:$0xff] }
  0x2b   :  { %141 = vst [vmem:[#allocation2 + $0x10] sm:$0xff] %v140_v4  ;;  %v150_v8 = vld [vmem:[#allocation1 + $0x8] sm:$0xff]  ;;  %160 = vst [vmem:[#allocation4] sm:$0x1] %v1470_v9  ;;  %v154_v10 = vld [vmem:[#allocation1 + $0x10] sm:$0xff]  ;;  %v1521_v12 = vshrl.u32 %v161_v5, 7 }
  0x2c   :  { %145 = vst [vmem:[#allocation2 + $0x18] sm:$0xff] %v144_v6  ;;  %147 = vst [vmem:[#allocation3] sm:$0xff] %v146_v7  ;;  %v158_v11 = vld [vmem:[#allocation1 + $0x18] sm:$0xff] }
  0x2d   :  { %151 = vst [vmem:[#allocation3 + $0x8] sm:$0xff] %v150_v8  ;;  %155 = vst [vmem:[#allocation3 + $0x10] sm:$0xff] %v154_v10 }
  0x2e   :  { %159 = vst [vmem:[#allocation3 + $0x18] sm:$0xff] %v158_v11 }
  0x2f LB: > { %s1010_s10 = sshll.u32 %s1448_s1, 3  ;;  %s169_s1 = sadd.s32 1, %s1448_s1   ;;  %s1448_s1 = sphi %s1446_s1, %s169_s1  }
  0x30   : > { %v173_v13 = vstv %s1010_s10  ;;  %s171_s11 = scalar_lea.vmem [#allocation9], %s1010_s10  ;;  %p166_p4 = scmp.ge.s32.totalorder %s169_s1, 4  }
  0x31   : > { %v174_v14 = vadd.s32 %v173_v13, %v1521_v12  ;;  %s1524_s12 = smov (%p166_p4), 0  }
  0x32   :  { %168 = sbr.rel (!%p166_p4) target bundleno = 47 (0x2f), region = 276 }
  0x33   : > { %175 = vst [vmem:[%s171_s11] sm:$0xff] %v174_v14 }
  0x39 LB: > { %v186_v15 = vld [vmem:[#allocation2] sm:$0xff]  ;;  %v202_v17 = vld [vmem:[#allocation2 + $0x8] sm:$0xff]  ;;  %v218_v21 = vld [vmem:[#allocation2 + $0x10] sm:$0xff]  ;;  %v1530_v22 = vstv %s1452_s12  ;;  %v1533_v25 = vadd.s32 8, %v1521_v12  ;;  %v1538_v33 = vadd.s32 16, %v1521_v12  ;;  %v1545_v39 = vadd.s32 24, %v1521_v12  ;;  %s1452_s12 = sphi %s1524_s12, %s181_s12  }
  0x3a   : > { %v187_v16 = vld [vmem:[#allocation3] sm:$0xff]  ;;  %v188_v18 = vand.u32 2147483647, %v186_v15  ;;  %v203_v20 = vld [vmem:[#allocation3 + $0x8] sm:$0xff]  ;;  %v204_v23 = vand.u32 2147483647, %v202_v17  ;;  %vm193_vm0 = vcmp.ge.s32.totalorder %v1521_v12, %v1530_v22 }
  0x3b   : > { %v189_v19 = vand.u32 2147483647, %v187_v16  ;;  %v205_v24 = vand.u32 2147483647, %v203_v20  ;;  %v219_v26 = vld [vmem:[#allocation3 + $0x10] sm:$0xff]  ;;  %v234_v29 = vld [vmem:[#allocation2 + $0x18] sm:$0xff]  ;;  %vm209_vm3 = vcmp.ge.s32.totalorder %v1533_v25, %v1530_v22  ;;  %vm225_vm6 = vcmp.ge.s32.totalorder %v1538_v33, %v1530_v22 }
  0x3c   : > { %v220_v28 = vand.u32 2147483647, %v218_v21  ;;  %v235_v30 = vld [vmem:[#allocation3 + $0x18] sm:$0xff]  ;;  %v221_v32 = vand.u32 2147483647, %v219_v26  ;;  %vm241_vm9 = vcmp.ge.s32.totalorder %v1545_v39, %v1530_v22  ;;  %s283_s13 = ssub.s32 128, %s1452_s12 }
  0x3d   : > { %v190_v27 = vadd.f32 %v189_v19, %v188_v18  ;;  %v206_v31 = vadd.f32 %v205_v24, %v204_v23  ;;  %v236_v34 = vand.u32 2147483647, %v234_v29  ;;  %v237_v35 = vand.u32 2147483647, %v235_v30  ;;  %v292_v15 = vld [vmem:[#allocation4] ss:$0 sm:$0xff] }
  0x3e   : > { %v222_v38 = vadd.f32 %v221_v32, %v220_v28  ;;  %v1556_v13 = vand.u32 127, %v161_v5  ;;  %s295_s14 = scalar_lea.vmem [#allocation2], %s1452_s12  ;;  %s296_s15 = scalar_lea.vmem [#allocation3], %s1452_s12 }
  0x3f   : > { %vm1012_vm1 = vcmp.gt.f32.partialorder %v190_v27, -inf  ;;  %v238_v42 = vadd.f32 %v237_v35, %v236_v34  ;;  %v299_v16 = vld [vmem:[%s295_s14] ss:$0 sm:$0xff]  ;;  %s307_s17 = scalar_lea.vmem [#allocation9], %s1452_s12  ;;  %s181_s12 = sadd.s32 1, %s1452_s12  }
  0x40   : > { %vm197_vm2 = vmand %vm193_vm0, %vm1012_vm1  ;;  %v300_v17 = vld [vmem:[%s296_s15] ss:$0 sm:$0xff]  ;;  %p178_p5 = scmp.ge.s32.totalorder %s181_s12, 32  }
  0x41   : > { %v198_v36 = vsel %vm197_vm2, %v1521_v12, %v1530_v22  ;;  %v199_v37 = vsel %vm197_vm2, %v190_v27, -inf  ;;  %v309_v19 = vld [vmem:[%s307_s17] ss:$0 sm:$0xff]  ;;  %s1454_s23 = smov (%p178_p5), %s1890_s2   ;;  %s1458_s24 = smov (%p178_p5), [#allocation2]  }
  0x42   : > { %vm212_vm4 = vcmp.lt.f32.partialorder %v199_v37, %v206_v31 }
  0x43   : > { %vm213_vm5 = vmand %vm209_vm3, %vm212_vm4  ;;  %vm1560_vm3 = vcmp.eq.s32.totalorder %v1556_v13, %v1530_v22 }
  0x44   : > { %v214_v40 = vsel %vm213_vm5, %v1533_v25, %v198_v36  ;;  %v215_v41 = vsel %vm213_vm5, %v206_v31, %v199_v37 }
  0x45   : > { %vm228_vm7 = vcmp.lt.f32.partialorder %v215_v41, %v222_v38 }
  0x46   : > { %vm229_vm8 = vmand %vm225_vm6, %vm228_vm7  ;;  %vm332_vm7 = vcmp.gt.s32.totalorder %v1521_v12, %v1530_v22 }
  0x47   : > { %v230_v43 = vsel %vm229_vm8, %v1538_v33, %v214_v40  ;;  %v231_v44 = vsel %vm229_vm8, %v222_v38, %v215_v41  ;;  %vm402_vm8 = vcmp.gt.s32.totalorder %v1533_v25, %v1530_v22 }
  0x48   : > { %vm244_vm10 = vcmp.lt.f32.partialorder %v231_v44, %v238_v42 }
  0x49   : > { %vm245_vm11 = vmand %vm241_vm9, %vm244_vm10  ;;  %vm472_vm10 = vcmp.gt.s32.totalorder %v1538_v33, %v1530_v22 }
  0x4a   : > { %v246_v45 = vsel %vm245_vm11, %v1545_v39, %v230_v43  ;;  %v247_v46 = vsel %vm245_vm11, %v238_v42, %v231_v44 }
  0x4b   : > { %v248_v47 = vrot.slane %v247_v46, 1  ;;  %v249_v48 = vrot.slane %v246_v45, 1 }
  0x4d   : > { %vm250_vm12 = vcmp.ge.f32.partialorder %v248_v47, %v247_v46  ;;  %v253_v49 = vrot.slane %v248_v47, 1  ;;  %v254_v50 = vrot.slane %v249_v48, 1 }
  0x4e   : > { %v251_v51 = vsel %vm250_vm12, %v248_v47, %v247_v46  ;;  %v252_v52 = vsel %vm250_vm12, %v249_v48, %v246_v45 }
  0x4f   : > { %vm255_vm13 = vcmp.ge.f32.partialorder %v253_v49, %v251_v51  ;;  %v258_v53 = vrot.slane %v253_v49, 1  ;;  %v259_v54 = vrot.slane %v254_v50, 1 }
  0x50   : > { %v256_v55 = vsel %vm255_vm13, %v253_v49, %v251_v51  ;;  %v257_v56 = vsel %vm255_vm13, %v254_v50, %v252_v52  ;;  %vm542_vm13 = vcmp.gt.s32.totalorder %v1545_v39, %v1530_v22 }
  0x51   : > { %vm260_vm14 = vcmp.ge.f32.partialorder %v258_v53, %v256_v55  ;;  %v263_v57 = vrot.slane %v258_v53, 1  ;;  %v264_v58 = vrot.slane %v259_v54, 1 }
  0x52   : > { %v261_v59 = vsel %vm260_vm14, %v258_v53, %v256_v55  ;;  %v262_v60 = vsel %vm260_vm14, %v259_v54, %v257_v56 }
  0x53   : > { %vm265_vm15 = vcmp.ge.f32.partialorder %v263_v57, %v261_v59  ;;  %v268_v61 = vrot.slane %v263_v57, 1  ;;  %v269_v62 = vrot.slane %v264_v58, 1 }
  0x54   : > { %v266_v63 = vsel %vm265_vm15, %v263_v57, %v261_v59  ;;  %v267_v0 = vsel %vm265_vm15, %v264_v58, %v262_v60 }
  0x55   : > { %vm270_vm0 = vcmp.ge.f32.partialorder %v268_v61, %v266_v63  ;;  %v273_v1 = vrot.slane %v268_v61, 1  ;;  %v274_v2 = vrot.slane %v269_v62, 1 }
  0x56   : > { %v271_v3 = vsel %vm270_vm0, %v268_v61, %v266_v63  ;;  %v272_v4 = vsel %vm270_vm0, %v269_v62, %v267_v0 }
  0x57   : > { %vm275_vm1 = vcmp.ge.f32.partialorder %v273_v1, %v271_v3  ;;  %v278_v6 = vrot.slane %v273_v1, 1  ;;  %v279_v7 = vrot.slane %v274_v2, 1 }
  0x58   : > { %v276_v8 = vsel %vm275_vm1, %v273_v1, %v271_v3  ;;  %v277_v9 = vsel %vm275_vm1, %v274_v2, %v272_v4 }
  0x59   : > { %vm280_vm2 = vcmp.ge.f32.partialorder %v278_v6, %v276_v8 }
  0x5a   : > { %v282_v10 = vsel %vm280_vm2, %v279_v7, %v277_v9 }
  0x5b   : > { %284 = vrot.lane.b32.xlu0 %v282_v10, %s283_s13 }
  0xcd   : > { %v285_v11 = vpop.permute.xlu0 %284 }
  0xce   : > { %1024 = vpush %v285_v11 }
  0xff   : > { %s1025_s16 = spop %1024 }
 0x100   : > { %v291_v18 = vstv %s1025_s16  ;;  %s297_s18 = scalar_lea.vmem [#allocation2], %s1025_s16  ;;  %s298_s19 = scalar_lea.vmem [#allocation3], %s1025_s16 }
 0x101   : > { %v293_v20 = vsel %vm1560_vm3, %v291_v18, %v292_v15  ;;  %v1569_v21 = vld [vmem:[%s297_s18] ss:$0 sm:$0xff]  ;;  %s308_s20 = scalar_lea.vmem [#allocation9], %s1025_s16 }
 0x102   : > { %v1571_v23 = vld [vmem:[%s298_s19] ss:$0 sm:$0xff]  ;;  %294 = vst [vmem:[#allocation4] sm:$0x1] %v293_v20  ;;  %303 = vst [vmem:[%s297_s18] sm:$0x1] %v299_v16  ;;  %vm313_vm4 = vcmp.ne.f32.partialorder %v1569_v21, 0.0 }
 0x103   : > { %304 = vst [vmem:[%s298_s19] sm:$0x1] %v300_v17  ;;  %v310_v24 = vld [vmem:[%s308_s20] ss:$0 sm:$0xff]  ;;  %vm314_vm5 = vcmp.ne.f32.partialorder %v1571_v23, 0.0  ;;  %305 = vst [vmem:[%s295_s14] sm:$0x1] %v1569_v21 }
 0x104   : > { %306 = vst [vmem:[%s296_s15] sm:$0x1] %v1571_v23  ;;  %311 = vst [vmem:[%s308_s20] sm:$0x1] %v309_v19 }
 0x105   : > { %vm315_vm6 = vmor %vm313_vm4, %vm314_vm5  ;;  %312 = vst [vmem:[%s307_s17] sm:$0x1] %v310_v24 }
 0x106   : > { %vm316_vm9 = vmand %vm1560_vm3, %vm315_vm6 }
 0x107   : > { %v317_v26 = vsel %vm316_vm9, %v1569_v21, 1.0  ;;  %v318_v27 = vsel %vm316_vm9, %v1571_v23, 0.0 }
 0x108   : > { %v1590_v28 = vsel %vm332_vm7, %v317_v26, 1.0  ;;  %v1595_v29 = vsel %vm332_vm7, %v318_v27, 0.0  ;;  %v1600_v30 = vsel %vm402_vm8, %v317_v26, 1.0  ;;  %v1605_v31 = vsel %vm402_vm8, %v318_v27, 0.0 }
 0x109   : > { %v337_v32 = vand.u32 2147483647, %v1590_v28  ;;  %v338_v34 = vand.u32 2147483647, %v1595_v29  ;;  %v407_v35 = vand.u32 2147483647, %v1600_v30 }
 0x10a   : > { %v408_v36 = vand.u32 2147483647, %v1605_v31  ;;  %v1618_v38 = vsel %vm472_vm10, %v317_v26, 1.0  ;;  %v1631_v42 = vsel %vm472_vm10, %v318_v27, 0.0  ;;  %v1648_v47 = vsel %vm542_vm13, %v317_v26, 1.0  ;;  %v1681_v1 = vld [vmem:[#allocation2] sm:$0xff] }
 0x10b   : > { %vm1611_vm11 = vcmp.lt.f32.partialorder %v337_v32, %v338_v34  ;;  %v477_v44 = vand.u32 2147483647, %v1618_v38  ;;  %v478_v45 = vand.u32 2147483647, %v1631_v42  ;;  %v1657_v49 = vsel %vm542_vm13, %v318_v27, 0.0  ;;  %v329_v58 = vld [vmem:[#allocation3] sm:$0xff] }
 0x10c   : > { %v341_v40 = vsel %vm1611_vm11, %v1595_v29, %v1590_v28  ;;  %vm1624_vm12 = vcmp.lt.f32.partialorder %v407_v35, %v408_v36  ;;  %v547_v50 = vand.u32 2147483647, %v1648_v47  ;;  %v548_v51 = vand.u32 2147483647, %v1657_v49  ;;  %v1688_v10 = vld [vmem:[#allocation2 + $0x8] sm:$0xff] }
 0x10d   : > { %1270 = vrcp.f32 %v341_v40  ;;  %v411_v43 = vsel %vm1624_vm12, %v1605_v31, %v1600_v30  ;;  %vm1641_vm14 = vcmp.lt.f32.partialorder %v477_v44, %v478_v45  ;;  %v340_v53 = vsel %vm1611_vm11, %v1590_v28, %v1595_v29  ;;  %v1704_v35 = vld [vmem:[#allocation3 + $0x8] sm:$0xff] }
 0x10e   : > { %1272 = vrcp.f32 %v411_v43  ;;  %v481_v48 = vsel %vm1641_vm14, %v1631_v42, %v1618_v38  ;;  %vm1665_vm15 = vcmp.lt.f32.partialorder %v547_v50, %v548_v51  ;;  %v410_v61 = vsel %vm1624_vm12, %v1600_v30, %v1605_v31 }
 0x10f   : > { %1274 = vrcp.f32 %v481_v48  ;;  %v551_v57 = vsel %vm1665_vm15, %v1657_v49, %v1648_v47  ;;  %v367_v2 = vand.u32 2147483648, %v329_v58  ;;  %vm362_vm0 = vcmp.eq.f32.partialorder %v1590_v28, 0.0 }
 0x110   : > { %1276 = vrcp.f32 %v551_v57  ;;  %vm363_vm1 = vcmp.eq.f32.partialorder %v1595_v29, 0.0  ;;  %v365_v16 = vand.u32 2147483648, %v1681_v1  ;;  %v480_v17 = vsel %vm1641_vm14, %v1618_v38, %v1631_v42 }
 0x111   : > { %v368_v18 = vor.u32 inf, %v367_v2  ;;  %v435_v20 = vand.u32 2147483648, %v1688_v10  ;;  %vm432_vm2 = vcmp.eq.f32.partialorder %v1600_v30, 0.0  ;;  %vm433_vm4 = vcmp.eq.f32.partialorder %v1605_v31, 0.0 }
 0x112   : > { %vm371_vm5 = vcmp.eq.f32.partialorder %v329_v58, 0.0  ;;  %v366_v44 = vor.u32 inf, %v365_v16  ;;  %vm369_vm6 = vcmp.eq.f32.partialorder %v1681_v1, 0.0  ;;  %vm439_vm9 = vcmp.eq.f32.partialorder %v1688_v10, 0.0 }
 0x117   : > { %v1271_v52 = vpop.eup %1270 }
 0x118   : > { %v343_v54 = vmul.f32 %v1271_v52, %v340_v53  ;;  %v1273_v56 = vpop.eup %1272  ;;  %v550_v52 = vsel %vm1665_vm15, %v1648_v47, %v1657_v49  ;;  %v372_v53 = vsel %vm371_vm5, nan, %v368_v18  ;;  %vm364_vm5 = vmand %vm362_vm0, %vm363_vm1  ;;  %v370_v18 = vsel %vm369_vm6, nan, %v366_v44 }
 0x119   : > { %v413_v62 = vmul.f32 %v1273_v56, %v410_v61  ;;  %v1275_v6 = vpop.eup %1274  ;;  %v437_v56 = vand.u32 2147483648, %v1704_v35  ;;  %vm1788_vm0 = vmand %vm432_vm2, %vm433_vm4  ;;  %vm503_vm1 = vcmp.eq.f32.partialorder %v1631_v42, 0.0 }
 0x11a   : > { %v344_v59 = vmul.f32 %v343_v54, %v1590_v28  ;;  %v346_v60 = vmul.f32 %v343_v54, %v1595_v29  ;;  %v348_v7 = vmul.f32 %v343_v54, %v1681_v1  ;;  %v350_v8 = vmul.f32 %v343_v54, %v329_v58  ;;  %v1277_v48 = vpop.eup %1276  ;;  %vm1832_vm6 = vmand %vm472_vm10, %vm1560_vm3 }
 0x11b   : > { %v414_v3 = vmul.f32 %v413_v62, %v1600_v30  ;;  %v416_v4 = vmul.f32 %v413_v62, %v1605_v31  ;;  %v483_v24 = vmul.f32 %v1275_v6, %v480_v17  ;;  %v418_v36 = vmul.f32 %v413_v62, %v1688_v10 }
 0x11c   : > { %v345_v63 = vadd.f32 %v344_v59, %v1595_v29  ;;  %v347_v0 = vadd.f32 %v346_v60, %v1590_v28  ;;  %v357_v26 = vsub.f32 %v350_v8, %v1681_v1  ;;  %v359_v27 = vsub.f32 %v329_v58, %v348_v7 }
 0x11d   : > { %v415_v11 = vadd.f32 %v414_v3, %v1605_v31  ;;  %v417_v15 = vadd.f32 %v416_v4, %v1600_v30  ;;  %v349_v32 = vadd.f32 %v348_v7, %v329_v58  ;;  %v351_v34 = vadd.f32 %v350_v8, %v1681_v1 }
 0x11e   : > { %v353_v9 = vsel %vm1611_vm11, %v345_v63, %v347_v0  ;;  %v484_v40 = vmul.f32 %v483_v24, %v1618_v38  ;;  %v486_v43 = vmul.f32 %v483_v24, %v1631_v42  ;;  %v420_v45 = vmul.f32 %v413_v62, %v1704_v35  ;;  %v1729_v63 = vld [vmem:[#allocation2 + $0x10] sm:$0xff] }
 0x11f   : > { %1278 = vrcp.f32 %v353_v9  ;;  %v423_v19 = vsel %vm1624_vm12, %v415_v11, %v417_v15  ;;  %v436_v54 = vor.u32 inf, %v435_v20  ;;  %v553_v57 = vmul.f32 %v1277_v48, %v550_v52  ;;  %v1731_v0 = vld [vmem:[#allocation3 + $0x10] sm:$0xff]  ;;  %v539_v52 = vld [vmem:[#allocation3 + $0x18] sm:$0xff] }
 0x120   : > { %1280 = vrcp.f32 %v423_v19  ;;  %v485_v50 = vadd.f32 %v484_v40, %v1631_v42  ;;  %v487_v51 = vadd.f32 %v486_v43, %v1618_v38  ;;  %v360_v58 = vsel %vm1611_vm11, %v357_v26, %v359_v27 }
 0x121   : > { %v352_v59 = vsel %vm1611_vm11, %v349_v32, %v351_v34  ;;  %v419_v60 = vadd.f32 %v418_v36, %v1704_v35  ;;  %v421_v62 = vadd.f32 %v420_v45, %v1688_v10  ;;  %v554_v2 = vmul.f32 %v553_v57, %v1648_v47  ;;  %vm1744_vm11 = vmand %vm332_vm7, %vm1560_vm3 }
 0x122   : > { %v493_v61 = vsel %vm1641_vm14, %v485_v50, %v487_v51  ;;  %v556_v3 = vmul.f32 %v553_v57, %v1657_v49  ;;  %v427_v37 = vsub.f32 %v420_v45, %v1688_v10  ;;  %v429_v6 = vsub.f32 %v1704_v35, %v418_v36  ;;  %vm1778_vm7 = vmand %vm402_vm8, %vm1560_vm3  ;;  %v538_v51 = vld [vmem:[#allocation2 + $0x18] sm:$0xff] }
 0x123   : > { %1282 = vrcp.f32 %v493_v61  ;;  %v488_v7 = vmul.f32 %v483_v24, %v1729_v63  ;;  %v490_v8 = vmul.f32 %v483_v24, %v1731_v0  ;;  %v555_v16 = vadd.f32 %v554_v2, %v1657_v49 }
 0x124   : > { %v557_v17 = vadd.f32 %v556_v3, %v1648_v47  ;;  %v440_v19 = vsel %vm439_vm9, nan, %v436_v54  ;;  %v438_v20 = vor.u32 inf, %v437_v56  ;;  %v505_v24 = vand.u32 2147483648, %v1729_v63 }
 0x125   : > { %v422_v29 = vsel %vm1624_vm12, %v419_v60, %v421_v62  ;;  %v430_v40 = vsel %vm1624_vm12, %v427_v37, %v429_v6  ;;  %v489_v25 = vadd.f32 %v488_v7, %v1731_v0  ;;  %v491_v45 = vadd.f32 %v490_v8, %v1729_v63 }
 0x126   : > { %v563_v28 = vsel %vm1665_vm15, %v555_v16, %v557_v17  ;;  %vm441_vm8 = vcmp.eq.f32.partialorder %v1704_v35, 0.0  ;;  %v506_v31 = vor.u32 inf, %v505_v24  ;;  %v497_v30 = vsub.f32 %v490_v8, %v1729_v63 }
 0x127   : > { %1284 = vrcp.f32 %v563_v28  ;;  %v442_v48 = vsel %vm441_vm8, nan, %v438_v20  ;;  %v507_v50 = vand.u32 2147483648, %v1731_v0  ;;  %v499_v54 = vsub.f32 %v1731_v0, %v488_v7 }
 0x128   : > { %v558_v56 = vmul.f32 %v553_v57, %v538_v51  ;;  %v492_v60 = vsel %vm1641_vm14, %v489_v25, %v491_v45  ;;  %vm502_vm12 = vcmp.eq.f32.partialorder %v1618_v38, 0.0  ;;  %vm509_vm2 = vcmp.eq.f32.partialorder %v1729_v63, 0.0 }
 0x129   : > { %v1279_v4 = vpop.eup %1278  ;;  %v510_v62 = vsel %vm509_vm2, nan, %v506_v31  ;;  %v508_v2 = vor.u32 inf, %v507_v50  ;;  %v575_v3 = vand.u32 2147483648, %v538_v51  ;;  %vm1817_vm4 = vmand %vm502_vm12, %vm503_vm1  ;;  %v500_v37 = vsel %vm1641_vm14, %v497_v30, %v499_v54 }
 0x12a   : > { %v361_v9 = vmul.f32 %v1279_v4, %v360_v58  ;;  %v355_v15 = vmul.f32 %v1279_v4, %v352_v59  ;;  %v1281_v26 = vpop.eup %1280  ;;  %v560_v58 = vmul.f32 %v553_v57, %v539_v52  ;;  %v559_v38 = vadd.f32 %v558_v56, %v539_v52 }
 0x12b   : > { %v425_v34 = vmul.f32 %v1281_v26, %v422_v29  ;;  %v431_v44 = vmul.f32 %v1281_v26, %v430_v40  ;;  %vm511_vm9 = vcmp.eq.f32.partialorder %v1731_v0, 0.0  ;;  %v577_v11 = vand.u32 2147483648, %v539_v52 }
 0x12c   : > { %v1759_v27 = vsel %vm364_vm5, %v372_v53, %v361_v9  ;;  %v1761_v32 = vsel %vm364_vm5, %v370_v18, %v355_v15  ;;  %v561_v6 = vadd.f32 %v560_v58, %v538_v51  ;;  %v512_v8 = vsel %vm511_vm9, nan, %v508_v2 }
 0x12d   : > { %v378_v1 = vsel %vm1744_vm11, %v1759_v27, 0.0  ;;  %v377_v10 = vsel %vm1744_vm11, %v1761_v32, 0.0  ;;  %v1796_v41 = vsel %vm1788_vm0, %v440_v19, %v425_v34  ;;  %v1283_v59 = vpop.eup %1282  ;;  %v1807_v35 = vsel %vm1788_vm0, %v442_v48, %v431_v44 }
 0x12e   : > { %381 = vadd.xlane.f32.xlu1 %v378_v1  ;;  %379 = vadd.xlane.f32.xlu0 %v377_v10  ;;  %v447_v53 = vsel %vm1778_vm7, %v1796_v41, 0.0  ;;  %v495_v61 = vmul.f32 %v1283_v59, %v492_v60  ;;  %v448_v57 = vsel %vm1778_vm7, %v1807_v35, 0.0  ;;  %v501_v7 = vmul.f32 %v1283_v59, %v500_v37  ;;  %vm586_vm7 = vmand %vm542_vm13, %vm1560_vm3 }
 0x12f   : > { %v576_v9 = vor.u32 inf, %v575_v3  ;;  %v562_v16 = vsel %vm1665_vm15, %v559_v38, %v561_v6  ;;  %v567_v17 = vsub.f32 %v560_v58, %v538_v51  ;;  %v569_v33 = vsub.f32 %v539_v52, %v558_v56 }
 0x130   : > { %v1825_v42 = vsel %vm1817_vm4, %v510_v62, %v495_v61  ;;  %v514_v18 = vsel %vm1817_vm4, %v512_v8, %v501_v7  ;;  %vm572_vm10 = vcmp.eq.f32.partialorder %v1648_v47, 0.0  ;;  %vm573_vm14 = vcmp.eq.f32.partialorder %v1657_v49, 0.0  ;;  %v608_v8 = vld [vmem:[#allocation9 + $0x8] sm:$0xff] (%p178_p5) }
 0x131   : > { %v1285_v46 = vpop.eup %1284  ;;  %v517_v15 = vsel %vm1832_vm6, %v1825_v42, 0.0  ;;  %vm579_vm11 = vcmp.eq.f32.partialorder %v538_v51, 0.0  ;;  %v518_v0 = vsel %vm1832_vm6, %v514_v18, 0.0  ;;  %vm574_vm5 = vmand %vm572_vm10, %vm573_vm14  ;;  %v570_v24 = vsel %vm1665_vm15, %v567_v17, %v569_v33 }
 0x132   : > { %449 = vadd.xlane.f32.xlu1 %v447_v53  ;;  %v565_v19 = vmul.f32 %v1285_v46, %v562_v16  ;;  %v580_v20 = vsel %vm579_vm11, nan, %v576_v9  ;;  %v578_v26 = vor.u32 inf, %v577_v11  ;;  %v571_v47 = vmul.f32 %v1285_v46, %v570_v24  ;;  %v610_v9 = vld [vmem:[#allocation9 + $0x10] sm:$0xff] (%p178_p5)  ;;  %v661_v11 = vld [vmem:[#allocation4] sm:$0x1] (%p178_p5) }
 0x133   : > { %vm581_vm0 = vcmp.eq.f32.partialorder %v539_v52, 0.0  ;;  %vm322_vm15 = vcmp.gt.s32.totalorder %v1556_v13, %v1530_v22  ;;  %663 = vst [vmem:[#allocation5] sm:$0x1] (%p178_p5), %v661_v11 }
 0x134   : > { %v583_v29 = vsel %vm574_vm5, %v580_v20, %v565_v19  ;;  %v582_v28 = vsel %vm581_vm0, nan, %v578_v26  ;;  %v323_v55 = vsel %vm322_vm15, %v1569_v21, 0.0  ;;  %v324_v34 = vsel %vm322_vm15, %v1571_v23, 0.0 }
 0x135   : > { %v587_v49 = vsel %vm586_vm7, %v583_v29, 0.0  ;;  %v584_v1 = vsel %vm574_vm5, %v582_v28, %v571_v47 }
 0x136   : > { %451 = vadd.xlane.f32.xlu1 %v448_v57  ;;  %v588_v10 = vsel %vm586_vm7, %v584_v1, 0.0 }
 0x13a   : > { %519 = vadd.xlane.f32.xlu1 %v517_v15  ;;  %v612_v15 = vld [vmem:[#allocation9 + $0x18] sm:$0xff] (%p178_p5) }
 0x13e   : > { %521 = vadd.xlane.f32.xlu1 %v518_v0 }
 0x142   : > { %589 = vadd.xlane.f32.xlu1 %v587_v49 }
 0x146   : > { %591 = vadd.xlane.f32.xlu1 %v588_v10 }
 0x1bb   : > { %v382_v14 = vpop.xlane.xlu1 %381  ;;  %v380_v36 = vpop.xlane.xlu0 %379 }
 0x1bc   : > { %v386_v40 = vmul.f32 %v382_v14, %v324_v34  ;;  %v389_v39 = vmul.f32 %v382_v14, %v323_v55  ;;  %v385_v43 = vmul.f32 %v380_v36, %v323_v55  ;;  %v388_v44 = vmul.f32 %v380_v36, %v324_v34 }
 0x1be   : > { %v387_v25 = vsub.f32 %v385_v43, %v386_v40  ;;  %v390_v45 = vadd.f32 %v389_v39, %v388_v44 }
 0x1bf   : > { %v450_v48 = vpop.xlane.xlu1 %449 }
 0x1c0   : > { %v392_v31 = vsub.f32 %v1761_v32, %v387_v25  ;;  %v393_v30 = vsub.f32 %v1759_v27, %v390_v45  ;;  %v455_v13 = vmul.f32 %v450_v48, %v323_v55  ;;  %v458_v21 = vmul.f32 %v450_v48, %v324_v34 }
 0x1c2   : > { %394 = vst [vmem:[#allocation2] sm:$0xff] %v392_v31  ;;  %395 = vst [vmem:[#allocation3] sm:$0xff] %v393_v30 }
 0x1c3   : > { %v452_v22 = vpop.xlane.xlu1 %451 }
 0x1c4   : > { %v456_v50 = vmul.f32 %v452_v22, %v324_v34  ;;  %v459_v23 = vmul.f32 %v452_v22, %v323_v55 }
 0x1c6   : > { %v457_v51 = vsub.f32 %v455_v13, %v456_v50  ;;  %v460_v52 = vadd.f32 %v459_v23, %v458_v21 }
 0x1c7   : > { %v520_v53 = vpop.xlane.xlu1 %519 }
 0x1c8   : > { %v462_v54 = vsub.f32 %v1796_v41, %v457_v51  ;;  %v463_v56 = vsub.f32 %v1807_v35, %v460_v52  ;;  %v525_v32 = vmul.f32 %v520_v53, %v323_v55  ;;  %v528_v59 = vmul.f32 %v520_v53, %v324_v34 }
 0x1ca   : > { %464 = vst [vmem:[#allocation2 + $0x8] sm:$0xff] %v462_v54  ;;  %465 = vst [vmem:[#allocation3 + $0x8] sm:$0xff] %v463_v56 }
 0x1cb   : > { %v522_v58 = vpop.xlane.xlu1 %521 }
 0x1cc   : > { %v526_v27 = vmul.f32 %v522_v58, %v324_v34  ;;  %v529_v60 = vmul.f32 %v522_v58, %v323_v55 }
 0x1ce   : > { %v527_v61 = vsub.f32 %v525_v32, %v526_v27  ;;  %v530_v62 = vadd.f32 %v529_v60, %v528_v59 }
 0x1cf   : > { %v590_v2 = vpop.xlane.xlu1 %589 }
 0x1d0   : > { %v532_v3 = vsub.f32 %v1825_v42, %v527_v61  ;;  %v533_v57 = vsub.f32 %v514_v18, %v530_v62  ;;  %v595_v37 = vmul.f32 %v590_v2, %v323_v55  ;;  %v598_v41 = vmul.f32 %v590_v2, %v324_v34  ;;  %v606_v42 = vld [vmem:[#allocation9] sm:$0xff] (%p178_p5) }
 0x1d1   :  { %625 = vxpose.xlu0.b32.start [1/4] (short) (narrow) (%p178_p5), %v606_v42, 8 }
 0x1d2   : > { %534 = vst [vmem:[#allocation2 + $0x10] sm:$0xff] %v532_v3  ;;  %535 = vst [vmem:[#allocation3 + $0x10] sm:$0xff] %v533_v57 }
 0x1d3   : > { %v592_v4 = vpop.xlane.xlu1 %591 }
 0x1d4   : > { %v596_v38 = vmul.f32 %v592_v4, %v324_v34  ;;  %v599_v35 = vmul.f32 %v592_v4, %v323_v55 }
 0x1d5   :  { %626 = vxpose.xlu0.b32.cont [2/4] (short) (narrow) (%p178_p5), %v608_v8, 8 }
 0x1d6   : > { %v597_v6 = vsub.f32 %v595_v37, %v596_v38  ;;  %v600_v63 = vadd.f32 %v599_v35, %v598_v41 }
 0x1d7   :  { %180 = sbr.rel (!%p178_p5) target bundleno = 57 (0x39), region = 287 }
 0x1d8   : > { %v602_v7 = vsub.f32 %v583_v29, %v597_v6  ;;  %v603_v46 = vsub.f32 %v584_v1, %v600_v63 }
 0x1d9   :  { %627 = vxpose.xlu0.b32.cont [3/4] (short) (narrow) (%p178_p5), %v610_v9, 8 }
 0x1da   : > { %604 = vst [vmem:[#allocation2 + $0x18] sm:$0xff] %v602_v7  ;;  %605 = vst [vmem:[#allocation3 + $0x18] sm:$0xff] %v603_v46 }
 0x1dd   :  { %628 = vxpose.xlu0.b32.end [4/4] (short) (narrow) (%p178_p5), %v612_v15, 8 }
 0x251   :  { %v641_v16 = vpop.trf.xlu0 }
 0x252   :  { %657 = vst [vmem:[#allocation7] sm:$0x1] %v641_v16 }
 0x259   :  { %v667_v17 = vld [vmem:[#allocation7] sm:$0x1] }
 0x25a   :  { %669 = vst [vmem:[#allocation8] sm:$0x1] %v667_v17 }
 0x25b LB: > { %v717_v5 = vld [vmem:[%s1460_s24] sm:$0xff]  ;;  %s719_s24 = scalar_lea.vmem %s1460_s24, 8   ;;  %s1460_s24 = sphi %s1458_s24, %s719_s24   ;;  %s1456_s23 = sphi %s1454_s23, %s720_s23  }
 0x25c   : > { %718 = vst [vmem:[%s1456_s23] sm:$0xff] %v717_v5  ;;  %s720_s23 = scalar_lea.vmem %s1456_s23, 8   ;;  %p714_p6 = scmp.gt.s32.totalorder %s719_s24, [#allocation2 + $0x18] }
 0x25d   :  { %s1462_s27 = smov (%p714_p6), %s1891_s3   ;;  %s1466_s28 = smov (%p714_p6), [#allocation3]  }
 0x25e   :  { %716 = sbr.rel (!%p714_p6) target bundleno = 603 (0x25b), region = 309 }
 0x265 LB: > { %v779_v12 = vld [vmem:[%s1468_s28] sm:$0xff]  ;;  %s781_s28 = scalar_lea.vmem %s1468_s28, 8   ;;  %s1468_s28 = sphi %s1466_s28, %s781_s28   ;;  %s1464_s27 = sphi %s1462_s27, %s782_s27  }
 0x266   : > { %780 = vst [vmem:[%s1464_s27] sm:$0xff] %v779_v12  ;;  %s782_s27 = scalar_lea.vmem %s1464_s27, 8   ;;  %p776_p7 = scmp.gt.s32.totalorder %s781_s28, [#allocation3 + $0x18] }
 0x267   :  { %v865_v33 = vld [vmem:[#allocation8] sm:$0x1] (%p776_p7)  ;;  %s1471_s2 = smov (%p776_p7), [#allocation5]  }
 0x268   :  { %778 = sbr.rel (!%p776_p7) target bundleno = 613 (0x265), region = 331  ;;  %s799_s29 = sshll.u32 (%p776_p7), %s1471_s2, 4  ;;  %866 = vst [vmem:[%s1893_s5] sm:$0x1] (%p776_p7), %v865_v33  ;;  %s800_s29 = int_to_ptr.vmem [resolvable:$true] %s799_s29 }
 0x269   :  { %s1286_s3 = scalar_lea.vmem (%p776_p7), %s800_s29, 16  ;;  %s1290_s0 = scalar_lea.vmem (%p776_p7), %s800_s29, 32 }
 0x26a   :  { %p1287_p8 = scmp.ne.s32.totalorder (%p776_p7), %s800_s29, %s1286_s3  ;;  %p1291_p9 = scmp.lt.s32.totalorder (%p776_p7), %s800_s29, %s800_s29 }
 0x26b   :  { %p1292_p10 = scmp.lt.s32.totalorder (%p776_p7), %s1290_s0, %s1286_s3 }
 0x26d   :  { %p1293_p11 = por (%p776_p7), %p1292_p10, %p1291_p9 }
 0x26f   :  { %p1294_p12 = pnand %p1293_p11, %p1287_p8 }
 0x271   :  { %1297 = shalt.err (!%p1294_p12)
}
 0x272   :  { %s1298_s9 = scalar_lea.hbm %s1892_s4, 16 }
 0x273   :  { %p1299_p13 = scmp.ne.s32.totalorder %s1892_s4, %s1298_s9  ;;  %p1302_p0 = scmp.lt.u32.totalorder %s1298_s9, %s1892_s4 }
 0x275   :  { %p1304_p1 = pnand %p1302_p0, %p1299_p13 }
 0x277   :  { %1307 = shalt.err (!%p1304_p1)
}
 0x278   :  { %802 = dma.vmem_to_hbm [thread:$0]  %s800_s29, 16, %s1892_s4, [#allocation6]  }
 0x279   :  { %1428 = dma.done.wait [#allocation6], 16  }
 0x27a   :  { %1429 = vsyncadd [#allocation6], 4294967280 }
 0x27b   :  { %872 = vsyncpa [#allocation6], 1 }

// kernel: custom-call.12
= control target key start
LH: loop header
LB: loop body
LE: loop exit
PB: predicated region body
PF: predicated region fallthrough
CT: control target
= control target key end

     0   :  { %v93_v0 = vlaneseq  ;;  %v2158_v44 = vmov -1.0   ;;  %s2922_s0 = inlined_call_operand.vmem [shape: f32[1,32,32], index: 0, kind: input, shape index: {}]   ;;  %s2923_s1 = inlined_call_operand.vmem [shape: f32[1,32,32], index: 1, kind: input, shape index: {}]   ;;  %s2924_s2 = inlined_call_operand.vmem [shape: f32[1,32,32], index: 2, kind: output, shape index: {0}]   ;;  %s2925_s3 = inlined_call_operand.vmem [shape: f32[1,32,32], index: 3, kind: output, shape index: {1}]  }
   0x1   :  { %v44_v3 = vld [vmem:[%s2922_s0 + $0x18] sm:$0xff] }
   0x2   :  { %v2180_v1 = vand.u32 127, %v93_v0  ;;  %v2182_v2 = vshrl.u32 %v93_v0, 7  ;;  %v88_v5 = vld [vmem:[%s2923_s1 + $0x18] sm:$0xff] }
   0x4   :  { %vm95_vm0 = vcmp.lt.s32.totalorder %v2180_v1, 32  ;;  %v287_v4 = vadd.s32 24, %v2182_v2  ;;  %vm373_vm10 = vcmp.eq.s32.totalorder %v2180_v1, 31  ;;  %vm384_vm12 = vcmp.eq.s32.totalorder %v2180_v1, 30 }
   0x5   :  { %v374_v45 = vsel %vm373_vm10, 1.0, %v2158_v44  ;;  %vm408_vm13 = vcmp.eq.s32.totalorder %v2180_v1, 29  ;;  %vm432_vm14 = vcmp.eq.s32.totalorder %v2180_v1, 28  ;;  %vm456_vm15 = vcmp.eq.s32.totalorder %v2180_v1, 27 }
   0x6   :  { %vm288_vm1 = vcmp.eq.s32.totalorder %v287_v4, %v2180_v1  ;;  %vm297_vm2 = vcmp.le.s32.totalorder %v287_v4, %v2180_v1  ;;  %vm370_vm11 = vcmp.eq.s32.totalorder %v2180_v1, %v287_v4 }
   0x7   :  { %v291_v6 = vsel %vm288_vm1, %v44_v3, 0.0  ;;  %vm298_vm3 = vmand %vm297_vm2, %vm95_vm0  ;;  %v292_v9 = vsel %vm288_vm1, %v88_v5, 0.0  ;;  %v375_v46 = vsel %vm370_vm11, %v374_v45, 0.0  ;;  %vm480_vm1 = vcmp.eq.s32.totalorder %v2180_v1, 26 }
   0x8   :  { %v299_v7 = vsel %vm298_vm3, %v44_v3, 0.0  ;;  %293 = vadd.xlane.f32.xlu0 %v291_v6  ;;  %v300_v8 = vsel %vm298_vm3, %v88_v5, 0.0  ;;  %vm504_vm3 = vcmp.eq.s32.totalorder %v2180_v1, 25 }
   0x9   :  { %v331_v32 = vand.u32 2147483648, %v299_v7  ;;  %v333_v33 = vand.u32 2147483648, %v300_v8  ;;  %vm335_vm5 = vcmp.eq.f32.partialorder %v299_v7, 0.0  ;;  %vm337_vm6 = vcmp.eq.f32.partialorder %v300_v8, 0.0 }
   0xb   :  { %v332_v34 = vor.u32 inf, %v331_v32  ;;  %v334_v35 = vor.u32 inf, %v333_v33 }
   0xc   :  { %295 = vadd.xlane.f32.xlu0 %v292_v9 }
   0xd   :  { %v336_v37 = vsel %vm335_vm5, nan, %v332_v34  ;;  %v338_v38 = vsel %vm337_vm6, nan, %v334_v35 }
  0x95   :  { %v2196_v10 = vpop.xlane.xlu0 %293 }
  0x96   :  { %v303_v12 = vand.u32 2147483647, %v2196_v10  ;;  %vm328_vm8 = vcmp.eq.f32.partialorder %v2196_v10, 0.0 }
  0x99   :  { %v2198_v11 = vpop.xlane.xlu0 %295 }
  0x9a   :  { %v304_v13 = vand.u32 2147483647, %v2198_v11  ;;  %vm329_vm7 = vcmp.eq.f32.partialorder %v2198_v11, 0.0 }
  0x9b   :  { %vm2236_vm9 = vmand %vm328_vm8, %vm329_vm7 }
  0x9c   :  { %vm2202_vm4 = vcmp.lt.f32.partialorder %v303_v12, %v304_v13 }
  0x9d   :  { %v307_v15 = vsel %vm2202_vm4, %v2198_v11, %v2196_v10  ;;  %v306_v17 = vsel %vm2202_vm4, %v2196_v10, %v2198_v11 }
  0x9e   :  { %2142 = vrcp.f32 %v307_v15 }
  0xa8   :  { %v2143_v16 = vpop.eup %2142 }
  0xa9   :  { %v2214_v18 = vmul.f32 %v2143_v16, %v306_v17 }
  0xab   :  { %v310_v19 = vmul.f32 %v2214_v18, %v2196_v10  ;;  %v312_v20 = vmul.f32 %v2214_v18, %v2198_v11  ;;  %v314_v21 = vmul.f32 %v2214_v18, %v299_v7  ;;  %v316_v22 = vmul.f32 %v2214_v18, %v300_v8 }
  0xad   :  { %v311_v23 = vadd.f32 %v310_v19, %v2198_v11  ;;  %v313_v24 = vadd.f32 %v312_v20, %v2196_v10  ;;  %v315_v25 = vadd.f32 %v314_v21, %v300_v8  ;;  %v317_v26 = vadd.f32 %v316_v22, %v299_v7 }
  0xae   :  { %v323_v27 = vsub.f32 %v316_v22, %v299_v7  ;;  %v325_v28 = vsub.f32 %v300_v8, %v314_v21 }
  0xaf   :  { %v318_v29 = vsel %vm2202_vm4, %v315_v25, %v317_v26  ;;  %v319_v30 = vsel %vm2202_vm4, %v311_v23, %v313_v24 }
  0xb0   :  { %2144 = vrcp.f32 %v319_v30  ;;  %v326_v31 = vsel %vm2202_vm4, %v323_v27, %v325_v28 }
  0xba   :  { %v2231_v36 = vpop.eup %2144 }
  0xbb   :  { %v321_v39 = vmul.f32 %v2231_v36, %v318_v29  ;;  %v327_v40 = vmul.f32 %v2231_v36, %v326_v31 }
  0xbd   :  { %v339_v42 = vsel %vm2236_vm9, %v336_v37, %v321_v39  ;;  %v340_v43 = vsel %vm2236_vm9, %v338_v38, %v327_v40 }
  0xbe   :  { %342 = vst [vmem:[#allocation4 + $0x18] sm:$0xff] %v339_v42  ;;  %343 = vst [vmem:[#allocation5 + $0x18] sm:$0xff] %v340_v43 }
  0xc5   :  { %v378_v47 = vld [vmem:[#allocation4 + $0x1e] ss:$0 sm:$0xff]  ;;  %v402_v58 = vld [vmem:[#allocation4 + $0x1d] ss:$0 sm:$0xff]  ;;  %v426_v9 = vld [vmem:[#allocation4 + $0x1c] ss:$0 sm:$0xff] }
  0xc6   :  { %v379_v48 = vld [vmem:[#allocation5 + $0x1e] ss:$0 sm:$0xff]  ;;  %v380_v49 = vxor.u32 2147483648, %v378_v47  ;;  %v403_v59 = vld [vmem:[#allocation5 + $0x1d] ss:$0 sm:$0xff]  ;;  %v404_v62 = vxor.u32 2147483648, %v402_v58 }
  0xc7   :  { %v381_v50 = vxor.u32 2147483648, %v379_v48  ;;  %v405_v63 = vxor.u32 2147483648, %v403_v59  ;;  %v427_v12 = vld [vmem:[#allocation5 + $0x1c] ss:$0 sm:$0xff]  ;;  %v428_v16 = vxor.u32 2147483648, %v426_v9 }
  0xc8   :  { %v387_v51 = vmul.f32 %v380_v49, %v375_v46  ;;  %v390_v54 = vmul.f32 0.0, %v380_v49  ;;  %v429_v17 = vxor.u32 2147483648, %v427_v12  ;;  %v450_v27 = vld [vmem:[#allocation4 + $0x1b] ss:$0 sm:$0xff]  ;;  %v474_v43 = vld [vmem:[#allocation4 + $0x1a] ss:$0 sm:$0xff] }
  0xc9   :  { %v388_v52 = vmul.f32 0.0, %v381_v50  ;;  %v391_v55 = vmul.f32 %v381_v50, %v375_v46  ;;  %v451_v28 = vld [vmem:[#allocation5 + $0x1b] ss:$0 sm:$0xff]  ;;  %v452_v31 = vxor.u32 2147483648, %v450_v27  ;;  %v475_v44 = vld [vmem:[#allocation5 + $0x1a] ss:$0 sm:$0xff] }
  0xca   :  { %v453_v32 = vxor.u32 2147483648, %v451_v28  ;;  %v476_v47 = vxor.u32 2147483648, %v474_v43  ;;  %v477_v48 = vxor.u32 2147483648, %v475_v44  ;;  %v499_v58 = vld [vmem:[#allocation5 + $0x19] ss:$0 sm:$0xff]  ;;  %v86_v12 = vld [vmem:[%s2923_s1 + $0x10] sm:$0xff] }
  0xcb   :  { %v389_v53 = vsub.f32 %v387_v51, %v388_v52  ;;  %v392_v56 = vadd.f32 %v391_v55, %v390_v54 }
  0xcd   :  { %394 = vadd.xlane.f32.xlu1 %v389_v53 }
  0xd1   :  { %396 = vadd.xlane.f32.xlu1 %v392_v56 }
 0x15a   :  { %v395_v57 = vpop.xlane.xlu1 %394 }
 0x15b   :  { %v398_v60 = vsel %vm384_vm12, %v395_v57, %v375_v46  ;;  %v498_v57 = vld [vmem:[#allocation4 + $0x19] ss:$0 sm:$0xff] }
 0x15c   :  { %v415_v4 = vmul.f32 %v405_v63, %v398_v60  ;;  %v411_v5 = vmul.f32 %v404_v62, %v398_v60 }
 0x15e   :  { %v397_v61 = vpop.xlane.xlu1 %396 }
 0x15f   :  { %v399_v0 = vsel %vm384_vm12, %v397_v61, 0.0  ;;  %v500_v61 = vxor.u32 2147483648, %v498_v57 }
 0x160   :  { %v414_v3 = vmul.f32 %v404_v62, %v399_v0  ;;  %v412_v6 = vmul.f32 %v405_v63, %v399_v0  ;;  %v501_v62 = vxor.u32 2147483648, %v499_v58  ;;  %v2252_v63 = vadd.s32 16, %v2182_v2 }
 0x162   :  { %v416_v7 = vadd.f32 %v415_v4, %v414_v3  ;;  %v413_v8 = vsub.f32 %v411_v5, %v412_v6  ;;  %vm225_vm2 = vcmp.eq.s32.totalorder %v2252_v63, %v2180_v1  ;;  %vm234_vm6 = vcmp.le.s32.totalorder %v2252_v63, %v2180_v1 }
 0x163   :  { %vm235_vm7 = vmand %vm234_vm6, %vm95_vm0  ;;  %vm669_vm6 = vcmp.eq.s32.totalorder %v2180_v1, 20 }
 0x164   :  { %420 = vadd.xlane.f32.xlu1 %v416_v7  ;;  %418 = vadd.xlane.f32.xlu0 %v413_v8 }
 0x1f1   :  { %v421_v13 = vpop.xlane.xlu1 %420  ;;  %v419_v15 = vpop.xlane.xlu0 %418 }
 0x1f2   :  { %v423_v19 = vsel %vm408_vm13, %v421_v13, %v399_v0  ;;  %v422_v20 = vsel %vm408_vm13, %v419_v15, %v398_v60  ;;  %v42_v13 = vld [vmem:[%s2922_s0 + $0x10] sm:$0xff]  ;;  %v229_v15 = vsel %vm225_vm2, %v86_v12, 0.0 }
 0x1f3   :  { %v438_v21 = vmul.f32 %v428_v16, %v423_v19  ;;  %v439_v22 = vmul.f32 %v429_v17, %v422_v20  ;;  %v435_v23 = vmul.f32 %v428_v16, %v422_v20  ;;  %v436_v24 = vmul.f32 %v429_v17, %v423_v19  ;;  %v522_v17 = vld [vmem:[#allocation4 + $0x18] ss:$0 sm:$0xff] }
 0x1f4   :  { %v228_v16 = vsel %vm225_vm2, %v42_v13, 0.0  ;;  %v236_v43 = vsel %vm235_vm7, %v42_v13, 0.0  ;;  %vm591_vm2 = vcmp.eq.s32.totalorder %v2180_v1, 22 }
 0x1f5   :  { %v440_v25 = vadd.f32 %v439_v22, %v438_v21  ;;  %v437_v26 = vsub.f32 %v435_v23, %v436_v24  ;;  %v524_v22 = vxor.u32 2147483648, %v522_v17  ;;  %vm272_vm10 = vcmp.eq.f32.partialorder %v236_v43, 0.0 }
 0x1f7   :  { %444 = vadd.xlane.f32.xlu1 %v440_v25  ;;  %442 = vadd.xlane.f32.xlu0 %v437_v26 }
 0x284   :  { %v445_v29 = vpop.xlane.xlu1 %444  ;;  %v443_v30 = vpop.xlane.xlu0 %442 }
 0x285   :  { %v447_v33 = vsel %vm432_vm14, %v445_v29, %v423_v19  ;;  %v446_v34 = vsel %vm432_vm14, %v443_v30, %v422_v20  ;;  %v523_v19 = vld [vmem:[#allocation5 + $0x18] ss:$0 sm:$0xff]  ;;  %vm363_vm14 = vcmp.eq.s32.totalorder %v2180_v1, %v2252_v63 }
 0x286   :  { %v462_v35 = vmul.f32 %v452_v31, %v447_v33  ;;  %v463_v37 = vmul.f32 %v453_v32, %v446_v34  ;;  %v459_v38 = vmul.f32 %v452_v31, %v446_v34  ;;  %v460_v39 = vmul.f32 %v453_v32, %v447_v33 }
 0x287   :  { %v525_v23 = vxor.u32 2147483648, %v523_v19 }
 0x288   :  { %v464_v40 = vadd.f32 %v463_v37, %v462_v35  ;;  %v461_v42 = vsub.f32 %v459_v38, %v460_v39 }
 0x28a   :  { %468 = vadd.xlane.f32.xlu1 %v464_v40  ;;  %466 = vadd.xlane.f32.xlu0 %v461_v42  ;;  %v237_v42 = vsel %vm235_vm7, %v86_v12, 0.0  ;;  %vm708_vm7 = vcmp.eq.s32.totalorder %v2180_v1, 19 }
 0x28b   :  { %v270_v58 = vand.u32 2147483648, %v237_v42  ;;  %vm274_vm8 = vcmp.eq.f32.partialorder %v237_v42, 0.0 }
 0x317   :  { %v469_v45 = vpop.xlane.xlu1 %468  ;;  %v467_v46 = vpop.xlane.xlu0 %466 }
 0x318   :  { %v471_v49 = vsel %vm456_vm15, %v469_v45, %v447_v33  ;;  %v470_v50 = vsel %vm456_vm15, %v467_v46, %v446_v34  ;;  %vm528_vm15 = vcmp.eq.s32.totalorder %v2180_v1, 24 }
 0x319   :  { %v486_v51 = vmul.f32 %v476_v47, %v471_v49  ;;  %v487_v52 = vmul.f32 %v477_v48, %v470_v50  ;;  %v483_v53 = vmul.f32 %v476_v47, %v470_v50  ;;  %v484_v54 = vmul.f32 %v477_v48, %v471_v49 }
 0x31b   :  { %v488_v55 = vadd.f32 %v487_v52, %v486_v51  ;;  %v485_v56 = vsub.f32 %v483_v53, %v484_v54 }
 0x31d   :  { %492 = vadd.xlane.f32.xlu1 %v488_v55  ;;  %490 = vadd.xlane.f32.xlu0 %v485_v56 }
 0x3aa   :  { %v493_v59 = vpop.xlane.xlu1 %492  ;;  %v491_v60 = vpop.xlane.xlu0 %490 }
 0x3ab   :  { %v495_v0 = vsel %vm480_vm1, %v493_v59, %v471_v49  ;;  %v494_v3 = vsel %vm480_vm1, %v491_v60, %v470_v50  ;;  %v268_v59 = vand.u32 2147483648, %v236_v43  ;;  %v271_v60 = vor.u32 inf, %v270_v58 }
 0x3ac   :  { %v510_v4 = vmul.f32 %v500_v61, %v495_v0  ;;  %v511_v5 = vmul.f32 %v501_v62, %v494_v3  ;;  %v507_v6 = vmul.f32 %v500_v61, %v494_v3  ;;  %v508_v7 = vmul.f32 %v501_v62, %v495_v0 }
 0x3ad   :  { %v269_v61 = vor.u32 inf, %v268_v59  ;;  %vm552_vm1 = vcmp.eq.s32.totalorder %v2180_v1, 23 }
 0x3ae   :  { %v512_v8 = vadd.f32 %v511_v5, %v510_v4  ;;  %v509_v9 = vsub.f32 %v507_v6, %v508_v7 }
 0x3b0   :  { %516 = vadd.xlane.f32.xlu1 %v512_v8  ;;  %514 = vadd.xlane.f32.xlu0 %v509_v9  ;;  %v2159_v9 = vmov 0.0  }
 0x3b1   :  { %v364_v12 = vsel %vm363_vm14, -1.0, %v2159_v9 }
 0x3b4   :  { %232 = vadd.xlane.f32.xlu1 %v229_v15  ;;  %230 = vadd.xlane.f32.xlu0 %v228_v16 }
 0x43d   :  { %v517_v20 = vpop.xlane.xlu1 %516  ;;  %v515_v21 = vpop.xlane.xlu0 %514 }
 0x43e   :  { %v2263_v24 = vsel %vm504_vm3, %v517_v20, %v495_v0  ;;  %v2265_v25 = vsel %vm504_vm3, %v515_v21, %v494_v3  ;;  %v275_v0 = vsel %vm274_vm8, nan, %v271_v60  ;;  %v273_v3 = vsel %vm272_vm10, nan, %v269_v61 }
 0x43f   :  { %v534_v26 = vmul.f32 %v524_v22, %v2263_v24  ;;  %v535_v27 = vmul.f32 %v525_v23, %v2265_v25  ;;  %v531_v28 = vmul.f32 %v524_v22, %v2265_v25  ;;  %v532_v29 = vmul.f32 %v525_v23, %v2263_v24 }
 0x440   :  { %vm630_vm3 = vcmp.eq.s32.totalorder %v2180_v1, 21  ;;  %vm747_vm8 = vcmp.eq.s32.totalorder %v2180_v1, 18 }
 0x441   :  { %v2271_v30 = vpop.xlane.xlu1 %232  ;;  %v2273_v31 = vpop.xlane.xlu0 %230  ;;  %v536_v32 = vadd.f32 %v535_v27, %v534_v26  ;;  %v533_v33 = vsub.f32 %v531_v28, %v532_v29 }
 0x442   :  { %v241_v34 = vand.u32 2147483647, %v2271_v30  ;;  %v240_v35 = vand.u32 2147483647, %v2273_v31  ;;  %vm266_vm11 = vcmp.eq.f32.partialorder %v2271_v30, 0.0  ;;  %vm265_vm12 = vcmp.eq.f32.partialorder %v2273_v31, 0.0 }
 0x443   :  { %540 = vadd.xlane.f32.xlu1 %v536_v32  ;;  %538 = vadd.xlane.f32.xlu0 %v533_v33  ;;  %vm2313_vm13 = vmand %vm265_vm12, %vm266_vm11  ;;  %vm786_vm11 = vcmp.eq.s32.totalorder %v2180_v1, 17 }
 0x444   :  { %vm2277_vm5 = vcmp.lt.f32.partialorder %v240_v35, %v241_v34 }
 0x445   :  { %v244_v38 = vsel %vm2277_vm5, %v2271_v30, %v2273_v31  ;;  %v243_v39 = vsel %vm2277_vm5, %v2273_v31, %v2271_v30 }
 0x446   :  { %2146 = vrcp.f32 %v244_v38 }
 0x450   :  { %v2147_v40 = vpop.eup %2146 }
 0x451   :  { %v2293_v44 = vmul.f32 %v2147_v40, %v243_v39 }
 0x453   :  { %v247_v45 = vmul.f32 %v2293_v44, %v2273_v31  ;;  %v249_v46 = vmul.f32 %v2293_v44, %v2271_v30  ;;  %v251_v47 = vmul.f32 %v2293_v44, %v236_v43  ;;  %v253_v48 = vmul.f32 %v2293_v44, %v237_v42 }
 0x455   :  { %v248_v49 = vadd.f32 %v247_v45, %v2271_v30  ;;  %v250_v50 = vadd.f32 %v249_v46, %v2273_v31  ;;  %v252_v51 = vadd.f32 %v251_v47, %v237_v42  ;;  %v254_v52 = vadd.f32 %v253_v48, %v236_v43 }
 0x456   :  { %v260_v53 = vsub.f32 %v253_v48, %v236_v43  ;;  %v262_v54 = vsub.f32 %v237_v42, %v251_v47 }
 0x457   :  { %v255_v55 = vsel %vm2277_vm5, %v252_v51, %v254_v52  ;;  %v256_v56 = vsel %vm2277_vm5, %v248_v49, %v250_v50 }
 0x458   :  { %2148 = vrcp.f32 %v256_v56  ;;  %v263_v57 = vsel %vm2277_vm5, %v260_v53, %v262_v54 }
 0x462   :  { %v2311_v62 = vpop.eup %2148 }
 0x463   :  { %v258_v5 = vmul.f32 %v2311_v62, %v255_v55  ;;  %v264_v6 = vmul.f32 %v2311_v62, %v263_v57 }
 0x465   :  { %v276_v7 = vsel %vm2313_vm13, %v273_v3, %v258_v5  ;;  %v277_v8 = vsel %vm2313_vm13, %v275_v0, %v264_v6 }
 0x466   :  { %279 = vst [vmem:[#allocation4 + $0x10] sm:$0xff] %v276_v7  ;;  %280 = vst [vmem:[#allocation5 + $0x10] sm:$0xff] %v277_v8 }
 0x46d   :  { %v546_v13 = vld [vmem:[#allocation4 + $0x17] ss:$0 sm:$0xff]  ;;  %v585_v40 = vld [vmem:[#allocation4 + $0x16] ss:$0 sm:$0xff]  ;;  %v624_v5 = vld [vmem:[#allocation4 + $0x15] ss:$0 sm:$0xff] }
 0x46e   :  { %v547_v15 = vld [vmem:[#allocation5 + $0x17] ss:$0 sm:$0xff]  ;;  %v548_v16 = vxor.u32 2147483648, %v546_v13  ;;  %v586_v42 = vld [vmem:[#allocation5 + $0x16] ss:$0 sm:$0xff]  ;;  %v587_v46 = vxor.u32 2147483648, %v585_v40 }
 0x46f   :  { %v549_v17 = vxor.u32 2147483648, %v547_v15  ;;  %v588_v47 = vxor.u32 2147483648, %v586_v42  ;;  %v625_v6 = vld [vmem:[#allocation5 + $0x15] ss:$0 sm:$0xff]  ;;  %v664_v40 = vld [vmem:[#allocation5 + $0x14] ss:$0 sm:$0xff] }
 0x470   :  { %v558_v19 = vmul.f32 0.0, %v548_v16  ;;  %v555_v21 = vmul.f32 %v548_v16, %v364_v12  ;;  %v627_v13 = vxor.u32 2147483648, %v625_v6 }
 0x471   :  { %v559_v20 = vmul.f32 %v549_v17, %v364_v12  ;;  %v556_v22 = vmul.f32 0.0, %v549_v17 }
 0x473   :  { %v560_v23 = vadd.f32 %v559_v20, %v558_v19  ;;  %v557_v26 = vsub.f32 %v555_v21, %v556_v22 }
 0x475   :  { %564 = vadd.xlane.f32.xlu1 %v560_v23  ;;  %562 = vadd.xlane.f32.xlu0 %v557_v26 }
 0x4d0   :  { %v541_v27 = vpop.xlane.xlu1 %540  ;;  %v539_v28 = vpop.xlane.xlu0 %538 }
 0x4d1   :  { %v543_v63 = vsel %vm528_vm15, %v541_v27, %v2263_v24  ;;  %v542_v29 = vsel %vm528_vm15, %v539_v28, %v2265_v25 }
 0x4d2   :  { %v573_v32 = vmul.f32 %v548_v16, %v543_v63  ;;  %v574_v33 = vmul.f32 %v549_v17, %v542_v29  ;;  %v570_v34 = vmul.f32 %v548_v16, %v542_v29  ;;  %v571_v35 = vmul.f32 %v549_v17, %v543_v63 }
 0x4d4   :  { %v575_v38 = vadd.f32 %v574_v33, %v573_v32  ;;  %v572_v39 = vsub.f32 %v570_v34, %v571_v35 }
 0x4d6   :  { %579 = vadd.xlane.f32.xlu1 %v575_v38  ;;  %577 = vadd.xlane.f32.xlu0 %v572_v39  ;;  %v663_v39 = vld [vmem:[#allocation4 + $0x14] ss:$0 sm:$0xff] }
 0x502   :  { %v565_v43 = vpop.xlane.xlu1 %564  ;;  %v563_v45 = vpop.xlane.xlu0 %562 }
 0x503   :  { %v567_v24 = vsel %vm552_vm1, %v565_v43, 0.0  ;;  %v566_v25 = vsel %vm552_vm1, %v563_v45, %v364_v12  ;;  %v626_v12 = vxor.u32 2147483648, %v624_v5  ;;  %v665_v45 = vxor.u32 2147483648, %v663_v39  ;;  %v703_v5 = vld [vmem:[#allocation5 + $0x13] ss:$0 sm:$0xff] }
 0x504   :  { %v597_v48 = vmul.f32 %v587_v46, %v567_v24  ;;  %v598_v49 = vmul.f32 %v588_v47, %v566_v25  ;;  %v594_v50 = vmul.f32 %v587_v46, %v566_v25  ;;  %v595_v51 = vmul.f32 %v588_v47, %v567_v24  ;;  %v742_v39 = vld [vmem:[#allocation5 + $0x12] ss:$0 sm:$0xff] }
 0x506   :  { %v599_v52 = vadd.f32 %v598_v49, %v597_v48  ;;  %v596_v53 = vsub.f32 %v594_v50, %v595_v51 }
 0x508   :  { %603 = vadd.xlane.f32.xlu1 %v599_v52  ;;  %601 = vadd.xlane.f32.xlu0 %v596_v53 }
 0x563   :  { %v580_v54 = vpop.xlane.xlu1 %579  ;;  %v578_v55 = vpop.xlane.xlu0 %577 }
 0x564   :  { %v582_v56 = vsel %vm552_vm1, %v580_v54, %v543_v63  ;;  %v581_v57 = vsel %vm552_vm1, %v578_v55, %v542_v29 }
 0x565   :  { %v612_v58 = vmul.f32 %v587_v46, %v582_v56  ;;  %v613_v59 = vmul.f32 %v588_v47, %v581_v57  ;;  %v609_v60 = vmul.f32 %v587_v46, %v581_v57  ;;  %v610_v61 = vmul.f32 %v588_v47, %v582_v56 }
 0x566   :  { %v666_v46 = vxor.u32 2147483648, %v664_v40 }
 0x567   :  { %v614_v0 = vadd.f32 %v613_v59, %v612_v58  ;;  %v611_v3 = vsub.f32 %v609_v60, %v610_v61 }
 0x569   :  { %618 = vadd.xlane.f32.xlu1 %v614_v0  ;;  %616 = vadd.xlane.f32.xlu0 %v611_v3  ;;  %v702_v3 = vld [vmem:[#allocation4 + $0x13] ss:$0 sm:$0xff] }
 0x595   :  { %v604_v7 = vpop.xlane.xlu1 %603  ;;  %v602_v8 = vpop.xlane.xlu0 %601 }
 0x596   :  { %v606_v15 = vsel %vm591_vm2, %v604_v7, %v567_v24  ;;  %v605_v16 = vsel %vm591_vm2, %v602_v8, %v566_v25  ;;  %v704_v8 = vxor.u32 2147483648, %v702_v3  ;;  %v781_v3 = vld [vmem:[#allocation5 + $0x11] ss:$0 sm:$0xff] }
 0x597   :  { %v636_v17 = vmul.f32 %v626_v12, %v606_v15  ;;  %v637_v19 = vmul.f32 %v627_v13, %v605_v16  ;;  %v633_v20 = vmul.f32 %v626_v12, %v605_v16  ;;  %v634_v21 = vmul.f32 %v627_v13, %v606_v15 }
 0x599   :  { %v638_v22 = vadd.f32 %v637_v19, %v636_v17  ;;  %v635_v23 = vsub.f32 %v633_v20, %v634_v21 }
 0x59b   :  { %642 = vadd.xlane.f32.xlu1 %v638_v22  ;;  %640 = vadd.xlane.f32.xlu0 %v635_v23 }
 0x5f6   :  { %v619_v26 = vpop.xlane.xlu1 %618  ;;  %v617_v27 = vpop.xlane.xlu0 %616 }
 0x5f7   :  { %v621_v28 = vsel %vm591_vm2, %v619_v26, %v582_v56  ;;  %v620_v63 = vsel %vm591_vm2, %v617_v27, %v581_v57 }
 0x5f8   :  { %v651_v29 = vmul.f32 %v626_v12, %v621_v28  ;;  %v652_v32 = vmul.f32 %v627_v13, %v620_v63  ;;  %v648_v33 = vmul.f32 %v626_v12, %v620_v63  ;;  %v649_v34 = vmul.f32 %v627_v13, %v621_v28 }
 0x5f9   :  { %v705_v12 = vxor.u32 2147483648, %v703_v5 }
 0x5fa   :  { %v653_v35 = vadd.f32 %v652_v32, %v651_v29  ;;  %v650_v38 = vsub.f32 %v648_v33, %v649_v34 }
 0x5fc   :  { %657 = vadd.xlane.f32.xlu1 %v653_v35  ;;  %655 = vadd.xlane.f32.xlu0 %v650_v38  ;;  %v741_v38 = vld [vmem:[#allocation4 + $0x12] ss:$0 sm:$0xff] }
 0x628   :  { %v643_v42 = vpop.xlane.xlu1 %642  ;;  %v641_v43 = vpop.xlane.xlu0 %640 }
 0x629   :  { %v645_v47 = vsel %vm630_vm3, %v643_v42, %v606_v15  ;;  %v644_v24 = vsel %vm630_vm3, %v641_v43, %v605_v16  ;;  %v743_v43 = vxor.u32 2147483648, %v741_v38  ;;  %v84_v38 = vld [vmem:[%s2923_s1 + $0x8] sm:$0xff] }
 0x62a   :  { %v675_v25 = vmul.f32 %v665_v45, %v645_v47  ;;  %v676_v48 = vmul.f32 %v666_v46, %v644_v24  ;;  %v672_v49 = vmul.f32 %v665_v45, %v644_v24  ;;  %v673_v50 = vmul.f32 %v666_v46, %v645_v47 }
 0x62c   :  { %v677_v51 = vadd.f32 %v676_v48, %v675_v25  ;;  %v674_v52 = vsub.f32 %v672_v49, %v673_v50 }
 0x62e   :  { %681 = vadd.xlane.f32.xlu1 %v677_v51  ;;  %679 = vadd.xlane.f32.xlu0 %v674_v52 }
 0x689   :  { %v658_v53 = vpop.xlane.xlu1 %657  ;;  %v656_v54 = vpop.xlane.xlu0 %655 }
 0x68a   :  { %v660_v55 = vsel %vm630_vm3, %v658_v53, %v621_v28  ;;  %v659_v56 = vsel %vm630_vm3, %v656_v54, %v620_v63 }
 0x68b   :  { %v690_v57 = vmul.f32 %v665_v45, %v660_v55  ;;  %v691_v58 = vmul.f32 %v666_v46, %v659_v56  ;;  %v687_v59 = vmul.f32 %v665_v45, %v659_v56  ;;  %v688_v60 = vmul.f32 %v666_v46, %v660_v55 }
 0x68c   :  { %v744_v45 = vxor.u32 2147483648, %v742_v39  ;;  %v40_v39 = vld [vmem:[%s2922_s0 + $0x8] sm:$0xff] }
 0x68d   :  { %v692_v61 = vadd.f32 %v691_v58, %v690_v57  ;;  %v689_v0 = vsub.f32 %v687_v59, %v688_v60 }
 0x68f   :  { %696 = vadd.xlane.f32.xlu1 %v692_v61  ;;  %694 = vadd.xlane.f32.xlu0 %v689_v0  ;;  %v780_v0 = vld [vmem:[#allocation4 + $0x11] ss:$0 sm:$0xff] }
 0x6bb   :  { %v682_v6 = vpop.xlane.xlu1 %681  ;;  %v680_v7 = vpop.xlane.xlu0 %679 }
 0x6bc   :  { %v684_v13 = vsel %vm669_vm6, %v682_v6, %v645_v47  ;;  %v683_v15 = vsel %vm669_vm6, %v680_v7, %v644_v24  ;;  %v782_v7 = vxor.u32 2147483648, %v780_v0 }
 0x6bd   :  { %v714_v16 = vmul.f32 %v704_v8, %v684_v13  ;;  %v715_v17 = vmul.f32 %v705_v12, %v683_v15  ;;  %v711_v19 = vmul.f32 %v704_v8, %v683_v15  ;;  %v712_v20 = vmul.f32 %v705_v12, %v684_v13 }
 0x6bf   :  { %v716_v21 = vadd.f32 %v715_v17, %v714_v16  ;;  %v713_v22 = vsub.f32 %v711_v19, %v712_v20 }
 0x6c1   :  { %720 = vadd.xlane.f32.xlu1 %v716_v21  ;;  %718 = vadd.xlane.f32.xlu0 %v713_v22 }
 0x71c   :  { %v697_v23 = vpop.xlane.xlu1 %696  ;;  %v695_v26 = vpop.xlane.xlu0 %694 }
 0x71d   :  { %v699_v27 = vsel %vm669_vm6, %v697_v23, %v660_v55  ;;  %v698_v28 = vsel %vm669_vm6, %v695_v26, %v659_v56  ;;  %v2380_v26 = vadd.s32 8, %v2182_v2 }
 0x71e   :  { %v729_v63 = vmul.f32 %v704_v8, %v699_v27  ;;  %v730_v29 = vmul.f32 %v705_v12, %v698_v28  ;;  %v726_v32 = vmul.f32 %v704_v8, %v698_v28  ;;  %v727_v33 = vmul.f32 %v705_v12, %v699_v27 }
 0x71f   :  { %v783_v8 = vxor.u32 2147483648, %v781_v3  ;;  %vm162_vm10 = vcmp.eq.s32.totalorder %v2380_v26, %v2180_v1  ;;  %vm171_vm14 = vcmp.le.s32.totalorder %v2380_v26, %v2180_v1 }
 0x720   :  { %v731_v34 = vadd.f32 %v730_v29, %v729_v63  ;;  %v728_v35 = vsub.f32 %v726_v32, %v727_v33  ;;  %vm172_vm15 = vmand %vm171_vm14, %vm95_vm0  ;;  %vm918_vm14 = vcmp.eq.s32.totalorder %v2180_v1, 14 }
 0x722   :  { %735 = vadd.xlane.f32.xlu1 %v731_v34  ;;  %733 = vadd.xlane.f32.xlu0 %v728_v35 }
 0x74e   :  { %v721_v40 = vpop.xlane.xlu1 %720  ;;  %v719_v42 = vpop.xlane.xlu0 %718 }
 0x74f   :  { %v723_v46 = vsel %vm708_vm7, %v721_v40, %v684_v13  ;;  %v722_v47 = vsel %vm708_vm7, %v719_v42, %v683_v15  ;;  %v166_v40 = vsel %vm162_vm10, %v84_v38, 0.0  ;;  %v165_v42 = vsel %vm162_vm10, %v40_v39, 0.0 }
 0x750   :  { %v753_v24 = vmul.f32 %v743_v43, %v723_v46  ;;  %v754_v25 = vmul.f32 %v744_v45, %v722_v47  ;;  %v750_v48 = vmul.f32 %v743_v43, %v722_v47  ;;  %v751_v49 = vmul.f32 %v744_v45, %v723_v46 }
 0x751   :  { %vm825_vm10 = vcmp.eq.s32.totalorder %v2180_v1, 16 }
 0x752   :  { %v755_v50 = vadd.f32 %v754_v25, %v753_v24  ;;  %v752_v51 = vsub.f32 %v750_v48, %v751_v49 }
 0x754   :  { %759 = vadd.xlane.f32.xlu1 %v755_v50  ;;  %757 = vadd.xlane.f32.xlu0 %v752_v51 }
 0x7af   :  { %v736_v52 = vpop.xlane.xlu1 %735  ;;  %v734_v53 = vpop.xlane.xlu0 %733 }
 0x7b0   :  { %v738_v54 = vsel %vm708_vm7, %v736_v52, %v699_v27  ;;  %v737_v55 = vsel %vm708_vm7, %v734_v53, %v698_v28 }
 0x7b1   :  { %v768_v56 = vmul.f32 %v743_v43, %v738_v54  ;;  %v769_v57 = vmul.f32 %v744_v45, %v737_v55  ;;  %v765_v58 = vmul.f32 %v743_v43, %v737_v55  ;;  %v766_v59 = vmul.f32 %v744_v45, %v738_v54  ;;  %v819_v43 = vld [vmem:[#allocation4 + $0x10] ss:$0 sm:$0xff] }
 0x7b2   :  { %v820_v45 = vld [vmem:[#allocation5 + $0x10] ss:$0 sm:$0xff]  ;;  %v821_v24 = vxor.u32 2147483648, %v819_v43 }
 0x7b3   :  { %v770_v60 = vadd.f32 %v769_v57, %v768_v56  ;;  %v767_v61 = vsub.f32 %v765_v58, %v766_v59  ;;  %v822_v25 = vxor.u32 2147483648, %v820_v45 }
 0x7b5   :  { %774 = vadd.xlane.f32.xlu1 %v770_v60  ;;  %772 = vadd.xlane.f32.xlu0 %v767_v61 }
 0x7e1   :  { %v760_v5 = vpop.xlane.xlu1 %759  ;;  %v758_v6 = vpop.xlane.xlu0 %757 }
 0x7e2   :  { %v762_v12 = vsel %vm747_vm8, %v760_v5, %v723_v46  ;;  %v761_v13 = vsel %vm747_vm8, %v758_v6, %v722_v47 }
 0x7e3   :  { %v792_v15 = vmul.f32 %v782_v7, %v762_v12  ;;  %v793_v16 = vmul.f32 %v783_v8, %v761_v13  ;;  %v789_v17 = vmul.f32 %v782_v7, %v761_v13  ;;  %v790_v19 = vmul.f32 %v783_v8, %v762_v12 }
 0x7e5   :  { %v794_v20 = vadd.f32 %v793_v16, %v792_v15  ;;  %v791_v21 = vsub.f32 %v789_v17, %v790_v19 }
 0x7e7   :  { %798 = vadd.xlane.f32.xlu1 %v794_v20  ;;  %796 = vadd.xlane.f32.xlu0 %v791_v21  ;;  %v174_v20 = vsel %vm172_vm15, %v84_v38, 0.0  ;;  %v173_v21 = vsel %vm172_vm15, %v40_v39, 0.0  ;;  %vm972_vm15 = vcmp.eq.s32.totalorder %v2180_v1, 13 }
 0x7e8   :  { %v207_v43 = vand.u32 2147483648, %v174_v20  ;;  %v205_v45 = vand.u32 2147483648, %v173_v21  ;;  %vm211_vm1 = vcmp.eq.f32.partialorder %v174_v20, 0.0  ;;  %vm209_vm2 = vcmp.eq.f32.partialorder %v173_v21, 0.0 }
 0x842   :  { %v775_v22 = vpop.xlane.xlu1 %774  ;;  %v773_v23 = vpop.xlane.xlu0 %772 }
 0x843   :  { %v777_v27 = vsel %vm747_vm8, %v775_v22, %v738_v54  ;;  %v776_v28 = vsel %vm747_vm8, %v773_v23, %v737_v55  ;;  %vm356_vm8 = vcmp.eq.s32.totalorder %v2180_v1, %v2380_v26 }
 0x844   :  { %v807_v63 = vmul.f32 %v782_v7, %v777_v27  ;;  %v808_v29 = vmul.f32 %v783_v8, %v776_v28  ;;  %v804_v32 = vmul.f32 %v782_v7, %v776_v28  ;;  %v805_v33 = vmul.f32 %v783_v8, %v777_v27 }
 0x846   :  { %v809_v34 = vadd.f32 %v808_v29, %v807_v63  ;;  %v806_v35 = vsub.f32 %v804_v32, %v805_v33 }
 0x848   :  { %813 = vadd.xlane.f32.xlu1 %v809_v34  ;;  %811 = vadd.xlane.f32.xlu0 %v806_v35 }
 0x84c   :  { %169 = vadd.xlane.f32.xlu1 %v166_v40  ;;  %167 = vadd.xlane.f32.xlu0 %v165_v42 }
 0x874   :  { %v799_v46 = vpop.xlane.xlu1 %798  ;;  %v797_v47 = vpop.xlane.xlu0 %796 }
 0x875   :  { %v2397_v48 = vsel %vm786_vm11, %v799_v46, %v762_v12  ;;  %v2401_v49 = vsel %vm786_vm11, %v797_v47, %v761_v13  ;;  %v208_v46 = vor.u32 inf, %v207_v43  ;;  %v206_v47 = vor.u32 inf, %v205_v45 }
 0x876   :  { %v831_v50 = vmul.f32 %v821_v24, %v2397_v48  ;;  %v832_v51 = vmul.f32 %v822_v25, %v2401_v49  ;;  %v828_v52 = vmul.f32 %v821_v24, %v2401_v49  ;;  %v829_v53 = vmul.f32 %v822_v25, %v2397_v48 }
 0x878   :  { %v833_v54 = vadd.f32 %v832_v51, %v831_v50  ;;  %v830_v55 = vsub.f32 %v828_v52, %v829_v53  ;;  %v210_v50 = vsel %vm209_vm2, nan, %v206_v47  ;;  %vm1080_vm2 = vcmp.eq.s32.totalorder %v2180_v1, 11 }
 0x87a   :  { %837 = vadd.xlane.f32.xlu1 %v833_v54  ;;  %835 = vadd.xlane.f32.xlu0 %v830_v55 }
 0x8d5   :  { %v814_v56 = vpop.xlane.xlu1 %813  ;;  %v812_v57 = vpop.xlane.xlu0 %811 }
 0x8d6   :  { %v2409_v58 = vsel %vm786_vm11, %v814_v56, %v777_v27  ;;  %v2413_v59 = vsel %vm786_vm11, %v812_v57, %v776_v28  ;;  %v357_v56 = vsel %vm356_vm8, -1.0, %v2159_v9  ;;  %vm864_vm11 = vcmp.eq.s32.totalorder %v2180_v1, 15 }
 0x8d7   :  { %v846_v60 = vmul.f32 %v821_v24, %v2409_v58  ;;  %v847_v61 = vmul.f32 %v822_v25, %v2413_v59  ;;  %v843_v0 = vmul.f32 %v821_v24, %v2413_v59  ;;  %v844_v3 = vmul.f32 %v822_v25, %v2409_v58 }
 0x8d8   :  { %v212_v25 = vsel %vm211_vm1, nan, %v208_v46  ;;  %vm1026_vm1 = vcmp.eq.s32.totalorder %v2180_v1, 12  ;;  %vm1188_vm8 = vcmp.eq.s32.totalorder %v2180_v1, 9 }
 0x8d9   :  { %v2419_v5 = vpop.xlane.xlu1 %169  ;;  %v2421_v6 = vpop.xlane.xlu0 %167  ;;  %v848_v7 = vadd.f32 %v847_v61, %v846_v60  ;;  %v845_v8 = vsub.f32 %v843_v0, %v844_v3 }
 0x8da   :  { %v178_v12 = vand.u32 2147483647, %v2419_v5  ;;  %v177_v13 = vand.u32 2147483647, %v2421_v6  ;;  %vm203_vm3 = vcmp.eq.f32.partialorder %v2419_v5, 0.0  ;;  %vm202_vm6 = vcmp.eq.f32.partialorder %v2421_v6, 0.0 }
 0x8db   :  { %852 = vadd.xlane.f32.xlu1 %v848_v7  ;;  %850 = vadd.xlane.f32.xlu0 %v845_v8  ;;  %vm2461_vm7 = vmand %vm202_vm6, %vm203_vm3  ;;  %vm1134_vm3 = vcmp.eq.s32.totalorder %v2180_v1, 10  ;;  %vm99_vm6 = vcmp.eq.s32.totalorder %v2182_v2, %v2180_v1 }
 0x8dc   :  { %vm2425_vm12 = vcmp.lt.f32.partialorder %v177_v13, %v178_v12 }
 0x8dd   :  { %v181_v16 = vsel %vm2425_vm12, %v2419_v5, %v2421_v6  ;;  %v180_v17 = vsel %vm2425_vm12, %v2421_v6, %v2419_v5 }
 0x8de   :  { %2150 = vrcp.f32 %v181_v16 }
 0x8e8   :  { %v2151_v19 = vpop.eup %2150 }
 0x8e9   :  { %v2441_v22 = vmul.f32 %v2151_v19, %v180_v17 }
 0x8eb   :  { %v184_v23 = vmul.f32 %v2441_v22, %v2421_v6  ;;  %v186_v27 = vmul.f32 %v2441_v22, %v2419_v5  ;;  %v188_v28 = vmul.f32 %v2441_v22, %v173_v21  ;;  %v190_v63 = vmul.f32 %v2441_v22, %v174_v20 }
 0x8ed   :  { %v185_v29 = vadd.f32 %v184_v23, %v2419_v5  ;;  %v187_v32 = vadd.f32 %v186_v27, %v2421_v6  ;;  %v189_v33 = vadd.f32 %v188_v28, %v174_v20  ;;  %v191_v34 = vadd.f32 %v190_v63, %v173_v21 }
 0x8ee   :  { %v197_v35 = vsub.f32 %v190_v63, %v173_v21  ;;  %v199_v38 = vsub.f32 %v174_v20, %v188_v28 }
 0x8ef   :  { %v192_v39 = vsel %vm2425_vm12, %v189_v33, %v191_v34  ;;  %v193_v40 = vsel %vm2425_vm12, %v185_v29, %v187_v32 }
 0x8f0   :  { %2152 = vrcp.f32 %v193_v40  ;;  %v200_v42 = vsel %vm2425_vm12, %v197_v35, %v199_v38 }
 0x8fa   :  { %v2459_v24 = vpop.eup %2152 }
 0x8fb   :  { %v195_v52 = vmul.f32 %v2459_v24, %v192_v39  ;;  %v201_v53 = vmul.f32 %v2459_v24, %v200_v42 }
 0x8fd   :  { %v213_v54 = vsel %vm2461_vm7, %v210_v50, %v195_v52  ;;  %v214_v55 = vsel %vm2461_vm7, %v212_v25, %v201_v53 }
 0x8fe   :  { %216 = vst [vmem:[#allocation4 + $0x8] sm:$0xff] %v213_v54  ;;  %217 = vst [vmem:[#allocation5 + $0x8] sm:$0xff] %v214_v55 }
 0x905   :  { %v858_v57 = vld [vmem:[#allocation4 + $0xf] ss:$0 sm:$0xff]  ;;  %v912_v43 = vld [vmem:[#allocation4 + $0xe] ss:$0 sm:$0xff] }
 0x906   :  { %v859_v60 = vld [vmem:[#allocation5 + $0xf] ss:$0 sm:$0xff]  ;;  %v860_v3 = vxor.u32 2147483648, %v858_v57  ;;  %v913_v45 = vld [vmem:[#allocation5 + $0xe] ss:$0 sm:$0xff]  ;;  %v914_v25 = vxor.u32 2147483648, %v912_v43 }
 0x907   :  { %v838_v61 = vpop.xlane.xlu1 %837  ;;  %v836_v0 = vpop.xlane.xlu0 %835  ;;  %v861_v7 = vxor.u32 2147483648, %v859_v60 }
 0x908   :  { %v840_v8 = vsel %vm825_vm10, %v838_v61, %v2397_v48  ;;  %v839_v12 = vsel %vm825_vm10, %v836_v0, %v2401_v49  ;;  %v870_v13 = vmul.f32 0.0, %v860_v3  ;;  %v867_v16 = vmul.f32 %v860_v3, %v357_v56 }
 0x909   :  { %v871_v26 = vmul.f32 %v861_v7, %v357_v56  ;;  %v868_v17 = vmul.f32 0.0, %v861_v7  ;;  %v885_v19 = vmul.f32 %v860_v3, %v840_v8  ;;  %v886_v20 = vmul.f32 %v861_v7, %v839_v12 }
 0x90a   :  { %v882_v27 = vmul.f32 %v860_v3, %v839_v12  ;;  %v883_v28 = vmul.f32 %v861_v7, %v840_v8 }
 0x90b   :  { %v872_v21 = vadd.f32 %v871_v26, %v870_v13  ;;  %v869_v23 = vsub.f32 %v867_v16, %v868_v17  ;;  %v887_v63 = vadd.f32 %v886_v20, %v885_v19 }
 0x90c   :  { %v884_v29 = vsub.f32 %v882_v27, %v883_v28 }
 0x90d   :  { %876 = vadd.xlane.f32.xlu1 %v872_v21  ;;  %874 = vadd.xlane.f32.xlu0 %v869_v23 }
 0x911   :  { %891 = vadd.xlane.f32.xlu1 %v887_v63  ;;  %889 = vadd.xlane.f32.xlu0 %v884_v29 }
 0x968   :  { %v853_v48 = vpop.xlane.xlu1 %852  ;;  %v851_v32 = vpop.xlane.xlu0 %850 }
 0x969   :  { %v855_v49 = vsel %vm825_vm10, %v853_v48, %v2409_v58  ;;  %v854_v33 = vsel %vm825_vm10, %v851_v32, %v2413_v59  ;;  %v915_v58 = vxor.u32 2147483648, %v913_v45  ;;  %v966_v32 = vld [vmem:[#allocation4 + $0xd] ss:$0 sm:$0xff] }
 0x96a   :  { %v900_v34 = vmul.f32 %v860_v3, %v855_v49  ;;  %v901_v35 = vmul.f32 %v861_v7, %v854_v33  ;;  %v897_v38 = vmul.f32 %v860_v3, %v854_v33  ;;  %v898_v39 = vmul.f32 %v861_v7, %v855_v49 }
 0x96c   :  { %v902_v40 = vadd.f32 %v901_v35, %v900_v34  ;;  %v899_v42 = vsub.f32 %v897_v38, %v898_v39  ;;  %v967_v34 = vld [vmem:[#allocation5 + $0xd] ss:$0 sm:$0xff]  ;;  %v968_v39 = vxor.u32 2147483648, %v966_v32 }
 0x96e   :  { %906 = vadd.xlane.f32.xlu1 %v902_v40  ;;  %904 = vadd.xlane.f32.xlu0 %v899_v42  ;;  %v969_v40 = vxor.u32 2147483648, %v967_v34 }
 0x99a   :  { %v877_v46 = vpop.xlane.xlu1 %876  ;;  %v875_v47 = vpop.xlane.xlu0 %874 }
 0x99b   :  { %v879_v50 = vsel %vm864_vm11, %v877_v46, 0.0  ;;  %v878_v59 = vsel %vm864_vm11, %v875_v47, %v357_v56 }
 0x99c   :  { %v924_v52 = vmul.f32 %v914_v25, %v879_v50  ;;  %v925_v53 = vmul.f32 %v915_v58, %v878_v59  ;;  %v921_v54 = vmul.f32 %v914_v25, %v878_v59  ;;  %v922_v55 = vmul.f32 %v915_v58, %v879_v50 }
 0x99e   :  { %v892_v57 = vpop.xlane.xlu1 %891  ;;  %v890_v60 = vpop.xlane.xlu0 %889  ;;  %v926_v61 = vadd.f32 %v925_v53, %v924_v52  ;;  %v923_v0 = vsub.f32 %v921_v54, %v922_v55 }
 0x99f   :  { %v894_v3 = vsel %vm864_vm11, %v892_v57, %v840_v8  ;;  %v893_v7 = vsel %vm864_vm11, %v890_v60, %v839_v12 }
 0x9a0   :  { %930 = vadd.xlane.f32.xlu1 %v926_v61  ;;  %928 = vadd.xlane.f32.xlu0 %v923_v0  ;;  %v939_v13 = vmul.f32 %v914_v25, %v894_v3  ;;  %v940_v26 = vmul.f32 %v915_v58, %v893_v7  ;;  %v936_v16 = vmul.f32 %v914_v25, %v893_v7 }
 0x9a1   :  { %v937_v56 = vmul.f32 %v915_v58, %v894_v3 }
 0x9a2   :  { %v941_v17 = vadd.f32 %v940_v26, %v939_v13 }
 0x9a3   :  { %v938_v19 = vsub.f32 %v936_v16, %v937_v56 }
 0x9a4   :  { %945 = vadd.xlane.f32.xlu1 %v941_v17 }
 0x9a5   :  { %943 = vadd.xlane.f32.xlu0 %v938_v19 }
 0x9fb   :  { %v907_v20 = vpop.xlane.xlu1 %906  ;;  %v905_v21 = vpop.xlane.xlu0 %904 }
 0x9fc   :  { %v909_v23 = vsel %vm864_vm11, %v907_v20, %v855_v49  ;;  %v908_v8 = vsel %vm864_vm11, %v905_v21, %v854_v33  ;;  %v1020_v21 = vld [vmem:[#allocation4 + $0xc] ss:$0 sm:$0xff] }
 0x9fd   :  { %v954_v27 = vmul.f32 %v914_v25, %v909_v23  ;;  %v955_v12 = vmul.f32 %v915_v58, %v908_v8  ;;  %v951_v28 = vmul.f32 %v914_v25, %v908_v8  ;;  %v952_v63 = vmul.f32 %v915_v58, %v909_v23 }
 0x9ff   :  { %v956_v29 = vadd.f32 %v955_v12, %v954_v27  ;;  %v953_v48 = vsub.f32 %v951_v28, %v952_v63  ;;  %v1021_v27 = vld [vmem:[#allocation5 + $0xc] ss:$0 sm:$0xff]  ;;  %v1022_v63 = vxor.u32 2147483648, %v1020_v21 }
 0xa01   :  { %960 = vadd.xlane.f32.xlu1 %v956_v29  ;;  %958 = vadd.xlane.f32.xlu0 %v953_v48  ;;  %v1023_v29 = vxor.u32 2147483648, %v1021_v27 }
 0xa2d   :  { %v931_v35 = vpop.xlane.xlu1 %930  ;;  %v929_v38 = vpop.xlane.xlu0 %928 }
 0xa2e   :  { %v933_v49 = vsel %vm918_vm14, %v931_v35, %v879_v50  ;;  %v932_v33 = vsel %vm918_vm14, %v929_v38, %v878_v59 }
 0xa2f   :  { %v978_v42 = vmul.f32 %v968_v39, %v933_v49  ;;  %v979_v43 = vmul.f32 %v969_v40, %v932_v33  ;;  %v975_v45 = vmul.f32 %v968_v39, %v932_v33  ;;  %v976_v46 = vmul.f32 %v969_v40, %v933_v49 }
 0xa31   :  { %v946_v47 = vpop.xlane.xlu1 %945  ;;  %v980_v25 = vadd.f32 %v979_v43, %v978_v42  ;;  %v977_v58 = vsub.f32 %v975_v45, %v976_v46 }
 0xa32   :  { %v948_v52 = vsel %vm918_vm14, %v946_v47, %v894_v3  ;;  %v944_v53 = vpop.xlane.xlu0 %943 }
 0xa33   :  { %v947_v54 = vsel %vm918_vm14, %v944_v53, %v893_v7  ;;  %984 = vadd.xlane.f32.xlu1 %v980_v25  ;;  %982 = vadd.xlane.f32.xlu0 %v977_v58  ;;  %v993_v50 = vmul.f32 %v968_v39, %v948_v52  ;;  %v991_v55 = vmul.f32 %v969_v40, %v948_v52 }
 0xa34   :  { %v994_v57 = vmul.f32 %v969_v40, %v947_v54  ;;  %v990_v59 = vmul.f32 %v968_v39, %v947_v54 }
 0xa36   :  { %v995_v60 = vadd.f32 %v994_v57, %v993_v50  ;;  %v992_v61 = vsub.f32 %v990_v59, %v991_v55 }
 0xa38   :  { %999 = vadd.xlane.f32.xlu1 %v995_v60  ;;  %997 = vadd.xlane.f32.xlu0 %v992_v61 }
 0xa8e   :  { %v961_v0 = vpop.xlane.xlu1 %960  ;;  %v959_v13 = vpop.xlane.xlu0 %958 }
 0xa8f   :  { %v963_v26 = vsel %vm918_vm14, %v961_v0, %v909_v23  ;;  %v962_v3 = vsel %vm918_vm14, %v959_v13, %v908_v8  ;;  %v1074_v13 = vld [vmem:[#allocation4 + $0xb] ss:$0 sm:$0xff] }
 0xa90   :  { %v1008_v16 = vmul.f32 %v968_v39, %v963_v26  ;;  %v1009_v7 = vmul.f32 %v969_v40, %v962_v3  ;;  %v1005_v56 = vmul.f32 %v968_v39, %v962_v3  ;;  %v1006_v17 = vmul.f32 %v969_v40, %v963_v26 }
 0xa92   :  { %v1010_v19 = vadd.f32 %v1009_v7, %v1008_v16  ;;  %v1007_v20 = vsub.f32 %v1005_v56, %v1006_v17  ;;  %v1075_v16 = vld [vmem:[#allocation5 + $0xb] ss:$0 sm:$0xff]  ;;  %v1076_v17 = vxor.u32 2147483648, %v1074_v13 }
 0xa94   :  { %1014 = vadd.xlane.f32.xlu1 %v1010_v19  ;;  %1012 = vadd.xlane.f32.xlu0 %v1007_v20  ;;  %v1077_v19 = vxor.u32 2147483648, %v1075_v16 }
 0xac0   :  { %v985_v12 = vpop.xlane.xlu1 %984  ;;  %v983_v28 = vpop.xlane.xlu0 %982 }
 0xac1   :  { %v987_v23 = vsel %vm972_vm15, %v985_v12, %v933_v49  ;;  %v986_v8 = vsel %vm972_vm15, %v983_v28, %v932_v33 }
 0xac2   :  { %v1032_v48 = vmul.f32 %v1022_v63, %v987_v23  ;;  %v1033_v32 = vmul.f32 %v1023_v29, %v986_v8  ;;  %v1029_v34 = vmul.f32 %v1022_v63, %v986_v8  ;;  %v1030_v35 = vmul.f32 %v1023_v29, %v987_v23 }
 0xac4   :  { %v1034_v38 = vadd.f32 %v1033_v32, %v1032_v48  ;;  %v1031_v39 = vsub.f32 %v1029_v34, %v1030_v35 }
 0xac5   :  { %v1000_v40 = vpop.xlane.xlu1 %999  ;;  %v998_v42 = vpop.xlane.xlu0 %997 }
 0xac6   :  { %v1002_v43 = vsel %vm972_vm15, %v1000_v40, %v948_v52  ;;  %v1001_v45 = vsel %vm972_vm15, %v998_v42, %v947_v54  ;;  %1038 = vadd.xlane.f32.xlu1 %v1034_v38  ;;  %1036 = vadd.xlane.f32.xlu0 %v1031_v39 }
 0xac7   :  { %v1047_v49 = vmul.f32 %v1022_v63, %v1002_v43  ;;  %v1048_v46 = vmul.f32 %v1023_v29, %v1001_v45  ;;  %v1044_v47 = vmul.f32 %v1022_v63, %v1001_v45  ;;  %v1045_v33 = vmul.f32 %v1023_v29, %v1002_v43 }
 0xac9   :  { %v1049_v25 = vadd.f32 %v1048_v46, %v1047_v49  ;;  %v1046_v58 = vsub.f32 %v1044_v47, %v1045_v33 }
 0xacb   :  { %1053 = vadd.xlane.f32.xlu1 %v1049_v25  ;;  %1051 = vadd.xlane.f32.xlu0 %v1046_v58 }
 0xb21   :  { %v1015_v53 = vpop.xlane.xlu1 %1014  ;;  %v1013_v50 = vpop.xlane.xlu0 %1012 }
 0xb22   :  { %v1017_v55 = vsel %vm972_vm15, %v1015_v53, %v963_v26  ;;  %v1016_v52 = vsel %vm972_vm15, %v1013_v50, %v962_v3  ;;  %v1128_v50 = vld [vmem:[#allocation4 + $0xa] ss:$0 sm:$0xff] }
 0xb23   :  { %v1062_v57 = vmul.f32 %v1022_v63, %v1017_v55  ;;  %v1063_v54 = vmul.f32 %v1023_v29, %v1016_v52  ;;  %v1059_v59 = vmul.f32 %v1022_v63, %v1016_v52  ;;  %v1060_v60 = vmul.f32 %v1023_v29, %v1017_v55 }
 0xb25   :  { %v1064_v61 = vadd.f32 %v1063_v54, %v1062_v57  ;;  %v1061_v0 = vsub.f32 %v1059_v59, %v1060_v60  ;;  %v1129_v57 = vld [vmem:[#allocation5 + $0xa] ss:$0 sm:$0xff]  ;;  %v1130_v60 = vxor.u32 2147483648, %v1128_v50 }
 0xb27   :  { %1068 = vadd.xlane.f32.xlu1 %v1064_v61  ;;  %1066 = vadd.xlane.f32.xlu0 %v1061_v0  ;;  %v1131_v61 = vxor.u32 2147483648, %v1129_v57 }
 0xb53   :  { %v1039_v7 = vpop.xlane.xlu1 %1038  ;;  %v1037_v56 = vpop.xlane.xlu0 %1036 }
 0xb54   :  { %v1041_v26 = vsel %vm1026_vm1, %v1039_v7, %v987_v23  ;;  %v1040_v3 = vsel %vm1026_vm1, %v1037_v56, %v986_v8 }
 0xb55   :  { %v1086_v20 = vmul.f32 %v1076_v17, %v1041_v26  ;;  %v1087_v21 = vmul.f32 %v1077_v19, %v1040_v3  ;;  %v1083_v27 = vmul.f32 %v1076_v17, %v1040_v3  ;;  %v1084_v12 = vmul.f32 %v1077_v19, %v1041_v26 }
 0xb57   :  { %v1088_v28 = vadd.f32 %v1087_v21, %v1086_v20  ;;  %v1085_v63 = vsub.f32 %v1083_v27, %v1084_v12 }
 0xb58   :  { %v1054_v29 = vpop.xlane.xlu1 %1053  ;;  %v1052_v48 = vpop.xlane.xlu0 %1051 }
 0xb59   :  { %v1056_v32 = vsel %vm1026_vm1, %v1054_v29, %v1002_v43  ;;  %v1055_v34 = vsel %vm1026_vm1, %v1052_v48, %v1001_v45  ;;  %1092 = vadd.xlane.f32.xlu1 %v1088_v28  ;;  %1090 = vadd.xlane.f32.xlu0 %v1085_v63 }
 0xb5a   :  { %v1101_v23 = vmul.f32 %v1076_v17, %v1056_v32  ;;  %v1102_v35 = vmul.f32 %v1077_v19, %v1055_v34  ;;  %v1098_v38 = vmul.f32 %v1076_v17, %v1055_v34  ;;  %v1099_v8 = vmul.f32 %v1077_v19, %v1056_v32 }
 0xb5c   :  { %v1103_v39 = vadd.f32 %v1102_v35, %v1101_v23  ;;  %v1100_v40 = vsub.f32 %v1098_v38, %v1099_v8 }
 0xb5e   :  { %1107 = vadd.xlane.f32.xlu1 %v1103_v39  ;;  %1105 = vadd.xlane.f32.xlu0 %v1100_v40 }
 0xbb4   :  { %v1069_v42 = vpop.xlane.xlu1 %1068  ;;  %v1067_v49 = vpop.xlane.xlu0 %1066 }
 0xbb5   :  { %v1071_v46 = vsel %vm1026_vm1, %v1069_v42, %v1017_v55  ;;  %v1070_v43 = vsel %vm1026_vm1, %v1067_v49, %v1016_v52  ;;  %v1182_v49 = vld [vmem:[#allocation4 + $0x9] ss:$0 sm:$0xff]  ;;  %vm108_vm1 = vcmp.le.s32.totalorder %v2182_v2, %v2180_v1 }
 0xbb6   :  { %v1116_v47 = vmul.f32 %v1076_v17, %v1071_v46  ;;  %v1117_v45 = vmul.f32 %v1077_v19, %v1070_v43  ;;  %v1113_v33 = vmul.f32 %v1076_v17, %v1070_v43  ;;  %v1114_v25 = vmul.f32 %v1077_v19, %v1071_v46 }
 0xbb8   :  { %v1118_v58 = vadd.f32 %v1117_v45, %v1116_v47  ;;  %v1115_v53 = vsub.f32 %v1113_v33, %v1114_v25  ;;  %v1183_v47 = vld [vmem:[#allocation5 + $0x9] ss:$0 sm:$0xff]  ;;  %v1184_v25 = vxor.u32 2147483648, %v1182_v49 }
 0xbba   :  { %1122 = vadd.xlane.f32.xlu1 %v1118_v58  ;;  %1120 = vadd.xlane.f32.xlu0 %v1115_v53  ;;  %v1185_v58 = vxor.u32 2147483648, %v1183_v47 }
 0xbe6   :  { %v1093_v54 = vpop.xlane.xlu1 %1092  ;;  %v1091_v59 = vpop.xlane.xlu0 %1090 }
 0xbe7   :  { %v1095_v55 = vsel %vm1080_vm2, %v1093_v54, %v1041_v26  ;;  %v1094_v52 = vsel %vm1080_vm2, %v1091_v59, %v1040_v3 }
 0xbe8   :  { %v1140_v0 = vmul.f32 %v1130_v60, %v1095_v55  ;;  %v1141_v13 = vmul.f32 %v1131_v61, %v1094_v52  ;;  %v1137_v16 = vmul.f32 %v1130_v60, %v1094_v52  ;;  %v1138_v7 = vmul.f32 %v1131_v61, %v1095_v55 }
 0xbea   :  { %v1142_v56 = vadd.f32 %v1141_v13, %v1140_v0  ;;  %v1139_v17 = vsub.f32 %v1137_v16, %v1138_v7 }
 0xbeb   :  { %v1108_v19 = vpop.xlane.xlu1 %1107  ;;  %v1106_v20 = vpop.xlane.xlu0 %1105 }
 0xbec   :  { %v1110_v21 = vsel %vm1080_vm2, %v1108_v19, %v1056_v32  ;;  %v1109_v27 = vsel %vm1080_vm2, %v1106_v20, %v1055_v34  ;;  %1146 = vadd.xlane.f32.xlu1 %v1142_v56  ;;  %1144 = vadd.xlane.f32.xlu0 %v1139_v17 }
 0xbed   :  { %v1155_v26 = vmul.f32 %v1130_v60, %v1110_v21  ;;  %v1156_v12 = vmul.f32 %v1131_v61, %v1109_v27  ;;  %v1152_v28 = vmul.f32 %v1130_v60, %v1109_v27  ;;  %v1153_v3 = vmul.f32 %v1131_v61, %v1110_v21 }
 0xbef   :  { %v1157_v63 = vadd.f32 %v1156_v12, %v1155_v26  ;;  %v1154_v29 = vsub.f32 %v1152_v28, %v1153_v3 }
 0xbf1   :  { %1161 = vadd.xlane.f32.xlu1 %v1157_v63  ;;  %1159 = vadd.xlane.f32.xlu0 %v1154_v29 }
 0xc47   :  { %v1123_v48 = vpop.xlane.xlu1 %1122  ;;  %v1121_v23 = vpop.xlane.xlu0 %1120 }
 0xc48   :  { %v1125_v35 = vsel %vm1080_vm2, %v1123_v48, %v1071_v46  ;;  %v1124_v32 = vsel %vm1080_vm2, %v1121_v23, %v1070_v43  ;;  %v2568_v23 = vld [vmem:[%s2923_s1] sm:$0xff]  ;;  %vm109_vm2 = vmand %vm108_vm1, %vm95_vm0  ;;  %vm1242_vm1 = vcmp.eq.s32.totalorder %v2180_v1, 8 }
 0xc49   :  { %v1170_v38 = vmul.f32 %v1130_v60, %v1125_v35  ;;  %v1171_v34 = vmul.f32 %v1131_v61, %v1124_v32  ;;  %v1167_v8 = vmul.f32 %v1130_v60, %v1124_v32  ;;  %v1168_v39 = vmul.f32 %v1131_v61, %v1125_v35 }
 0xc4b   :  { %v1172_v40 = vadd.f32 %v1171_v34, %v1170_v38  ;;  %v1169_v42 = vsub.f32 %v1167_v8, %v1168_v39  ;;  %v1236_v34 = vld [vmem:[#allocation4 + $0x8] ss:$0 sm:$0xff] }
 0xc4c   :  { %v1237_v8 = vld [vmem:[#allocation5 + $0x8] ss:$0 sm:$0xff] }
 0xc4d   :  { %1176 = vadd.xlane.f32.xlu1 %v1172_v40  ;;  %1174 = vadd.xlane.f32.xlu0 %v1169_v42  ;;  %v1238_v42 = vxor.u32 2147483648, %v1236_v34  ;;  %v1239_v49 = vxor.u32 2147483648, %v1237_v8 }
 0xc79   :  { %v1147_v45 = vpop.xlane.xlu1 %1146  ;;  %v1145_v33 = vpop.xlane.xlu0 %1144 }
 0xc7a   :  { %v1149_v46 = vsel %vm1134_vm3, %v1147_v45, %v1095_v55  ;;  %v1148_v43 = vsel %vm1134_vm3, %v1145_v33, %v1094_v52 }
 0xc7b   :  { %v1194_v53 = vmul.f32 %v1184_v25, %v1149_v46  ;;  %v1195_v50 = vmul.f32 %v1185_v58, %v1148_v43  ;;  %v1191_v57 = vmul.f32 %v1184_v25, %v1148_v43  ;;  %v1192_v54 = vmul.f32 %v1185_v58, %v1149_v46 }
 0xc7d   :  { %v1196_v59 = vadd.f32 %v1195_v50, %v1194_v53  ;;  %v1193_v60 = vsub.f32 %v1191_v57, %v1192_v54 }
 0xc7e   :  { %v1162_v61 = vpop.xlane.xlu1 %1161  ;;  %v1160_v0 = vpop.xlane.xlu0 %1159 }
 0xc7f   :  { %v1164_v13 = vsel %vm1134_vm3, %v1162_v61, %v1110_v21  ;;  %v1163_v16 = vsel %vm1134_vm3, %v1160_v0, %v1109_v27  ;;  %1200 = vadd.xlane.f32.xlu1 %v1196_v59  ;;  %1198 = vadd.xlane.f32.xlu0 %v1193_v60 }
 0xc80   :  { %v1209_v55 = vmul.f32 %v1184_v25, %v1164_v13  ;;  %v1210_v7 = vmul.f32 %v1185_v58, %v1163_v16  ;;  %v1206_v56 = vmul.f32 %v1184_v25, %v1163_v16  ;;  %v1207_v52 = vmul.f32 %v1185_v58, %v1164_v13 }
 0xc82   :  { %v1211_v17 = vadd.f32 %v1210_v7, %v1209_v55  ;;  %v1208_v19 = vsub.f32 %v1206_v56, %v1207_v52 }
 0xc84   :  { %1215 = vadd.xlane.f32.xlu1 %v1211_v17  ;;  %1213 = vadd.xlane.f32.xlu0 %v1208_v19 }
 0xcda   :  { %v1177_v20 = vpop.xlane.xlu1 %1176  ;;  %v1175_v26 = vpop.xlane.xlu0 %1174 }
 0xcdb   :  { %v1179_v12 = vsel %vm1134_vm3, %v1177_v20, %v1125_v35  ;;  %v1178_v21 = vsel %vm1134_vm3, %v1175_v26, %v1124_v32  ;;  %v2575_v35 = vld [vmem:[%s2922_s0] sm:$0xff]  ;;  %v103_v32 = vsel %vm99_vm6, %v2568_v23, 0.0 }
 0xcdc   :  { %v1224_v28 = vmul.f32 %v1184_v25, %v1179_v12  ;;  %v1225_v27 = vmul.f32 %v1185_v58, %v1178_v21  ;;  %v1221_v3 = vmul.f32 %v1184_v25, %v1178_v21  ;;  %v1222_v63 = vmul.f32 %v1185_v58, %v1179_v12 }
 0xcdd   :  { %v102_v38 = vsel %vm99_vm6, %v2575_v35, 0.0 }
 0xcde   :  { %v1226_v29 = vadd.f32 %v1225_v27, %v1224_v28  ;;  %v1223_v48 = vsub.f32 %v1221_v3, %v1222_v63 }
 0xce0   :  { %1230 = vadd.xlane.f32.xlu1 %v1226_v29  ;;  %1228 = vadd.xlane.f32.xlu0 %v1223_v48 }
 0xce4   :  { %106 = vadd.xlane.f32.xlu1 %v103_v32  ;;  %104 = vadd.xlane.f32.xlu0 %v102_v38 }
 0xd0c   :  { %v1201_v39 = vpop.xlane.xlu1 %1200  ;;  %v1199_v40 = vpop.xlane.xlu0 %1198 }
 0xd0d   :  { %v2582_v47 = vsel %vm1188_vm8, %v1201_v39, %v1149_v46  ;;  %v2586_v45 = vsel %vm1188_vm8, %v1199_v40, %v1148_v43  ;;  %v111_v39 = vsel %vm109_vm2, %v2568_v23, 0.0  ;;  %v110_v40 = vsel %vm109_vm2, %v2575_v35, 0.0 }
 0xd0e   :  { %v1248_v33 = vmul.f32 %v1238_v42, %v2582_v47  ;;  %v1249_v25 = vmul.f32 %v1239_v49, %v2586_v45  ;;  %v1245_v58 = vmul.f32 %v1238_v42, %v2586_v45  ;;  %v1246_v53 = vmul.f32 %v1239_v49, %v2582_v47 }
 0xd0f   :  { %vm148_vm0 = vcmp.eq.f32.partialorder %v111_v39, 0.0  ;;  %vm146_vm3 = vcmp.eq.f32.partialorder %v110_v40, 0.0  ;;  %vm1296_vm2 = vcmp.eq.s32.totalorder %v2180_v1, 7 }
 0xd10   :  { %v1250_v50 = vadd.f32 %v1249_v25, %v1248_v33  ;;  %v1247_v57 = vsub.f32 %v1245_v58, %v1246_v53 }
 0xd11   :  { %v1216_v54 = vpop.xlane.xlu1 %1215  ;;  %v1214_v59 = vpop.xlane.xlu0 %1213 }
 0xd12   :  { %v2594_v46 = vsel %vm1188_vm8, %v1216_v54, %v1164_v13  ;;  %v2598_v43 = vsel %vm1188_vm8, %v1214_v59, %v1163_v16  ;;  %1254 = vadd.xlane.f32.xlu1 %v1250_v50  ;;  %1252 = vadd.xlane.f32.xlu0 %v1247_v57 }
 0xd13   :  { %v1261_v60 = vmul.f32 %v1239_v49, %v2594_v46  ;;  %v1263_v61 = vmul.f32 %v1238_v42, %v2594_v46  ;;  %v1260_v0 = vmul.f32 %v1238_v42, %v2598_v43  ;;  %v1264_v55 = vmul.f32 %v1239_v49, %v2598_v43 }
 0xd15   :  { %v1265_v7 = vadd.f32 %v1264_v55, %v1263_v61  ;;  %v1262_v56 = vsub.f32 %v1260_v0, %v1261_v60  ;;  %v144_v0 = vand.u32 2147483648, %v111_v39  ;;  %v142_v55 = vand.u32 2147483648, %v110_v40 }
 0xd17   :  { %1269 = vadd.xlane.f32.xlu1 %v1265_v7  ;;  %1267 = vadd.xlane.f32.xlu0 %v1262_v56  ;;  %v145_v7 = vor.u32 inf, %v144_v0  ;;  %v143_v56 = vor.u32 inf, %v142_v55 }
 0xd6d   :  { %v1231_v13 = vpop.xlane.xlu1 %1230  ;;  %v1229_v52 = vpop.xlane.xlu0 %1228 }
 0xd6e   :  { %v2606_v16 = vsel %vm1188_vm8, %v1231_v13, %v1179_v12  ;;  %v2610_v17 = vsel %vm1188_vm8, %v1229_v52, %v1178_v21  ;;  %v149_v52 = vsel %vm148_vm0, nan, %v145_v7  ;;  %vm1365_vm0 = vcmp.eq.s32.totalorder %v2180_v1, 6 }
 0xd6f   :  { %v1276_v19 = vmul.f32 %v1239_v49, %v2606_v16  ;;  %v1278_v20 = vmul.f32 %v1238_v42, %v2606_v16  ;;  %v1275_v26 = vmul.f32 %v1238_v42, %v2610_v17  ;;  %v1279_v28 = vmul.f32 %v1239_v49, %v2610_v17 }
 0xd71   :  { %v107_v27 = vpop.xlane.xlu1 %106  ;;  %v105_v3 = vpop.xlane.xlu0 %104  ;;  %v1280_v63 = vadd.f32 %v1279_v28, %v1278_v20  ;;  %v1277_v29 = vsub.f32 %v1275_v26, %v1276_v19  ;;  %v147_v19 = vsel %vm146_vm3, nan, %v143_v56  ;;  %vm1434_vm3 = vcmp.eq.s32.totalorder %v2180_v1, 5 }
 0xd72   :  { %v115_v48 = vand.u32 2147483647, %v107_v27  ;;  %v114_v32 = vand.u32 2147483647, %v105_v3  ;;  %vm1879_vm10 = vweird.f32 %v105_v3  ;;  %vm1880_vm11 = vweird.f32 %v107_v27 }
 0xd73   :  { %1284 = vadd.xlane.f32.xlu1 %v1280_v63  ;;  %1282 = vadd.xlane.f32.xlu0 %v1277_v29  ;;  %vm2620_vm15 = vmor %vm1879_vm10, %vm1880_vm11  ;;  %vm140_vm6 = vcmp.eq.f32.partialorder %v107_v27, 0.0  ;;  %vm139_vm8 = vcmp.eq.f32.partialorder %v105_v3, 0.0  ;;  %vm349_vm11 = vcmp.eq.s32.totalorder %v2180_v1, %v2182_v2 }
 0xd74   :  { %vm2616_vm14 = vcmp.lt.f32.partialorder %v114_v32, %v115_v48  ;;  %vm2648_vm10 = vmand %vm139_vm8, %vm140_vm6  ;;  %vm1503_vm6 = vcmp.eq.s32.totalorder %v2180_v1, 4  ;;  %vm1572_vm8 = vcmp.eq.s32.totalorder %v2180_v1, 3 }
 0xd75   :  { %v118_v38 = vsel %vm2616_vm14, %v107_v27, %v105_v3  ;;  %v117_v34 = vsel %vm2616_vm14, %v105_v3, %v107_v27 }
 0xd76   :  { %2154 = vrcp.f32 %v118_v38 }
 0xd80   :  { %v2155_v8 = vpop.eup %2154 }
 0xd81   :  { %v2634_v42 = vmul.f32 %v2155_v8, %v117_v34  ;;  %v350_v8 = vsel %vm349_vm11, -1.0, %v2159_v9  ;;  %vm1641_vm11 = vcmp.eq.s32.totalorder %v2180_v1, 2 }
 0xd83   :  { %v121_v49 = vmul.f32 %v2634_v42, %v105_v3  ;;  %v123_v33 = vmul.f32 %v2634_v42, %v107_v27  ;;  %v125_v25 = vmul.f32 %v2634_v42, %v110_v40  ;;  %v127_v58 = vmul.f32 %v2634_v42, %v111_v39 }
 0xd85   :  { %v122_v53 = vadd.f32 %v121_v49, %v107_v27  ;;  %v124_v50 = vadd.f32 %v123_v33, %v105_v3  ;;  %v126_v57 = vadd.f32 %v125_v25, %v111_v39  ;;  %v128_v54 = vadd.f32 %v127_v58, %v110_v40 }
 0xd86   :  { %v134_v59 = vsub.f32 %v127_v58, %v110_v40  ;;  %v136_v60 = vsub.f32 %v111_v39, %v125_v25 }
 0xd87   :  { %v129_v23 = vsel %vm2616_vm14, %v126_v57, %v128_v54  ;;  %v130_v35 = vsel %vm2616_vm14, %v122_v53, %v124_v50 }
 0xd88   :  { %2156 = vrcp.f32 %v130_v35  ;;  %v137_v61 = vsel %vm2616_vm14, %v134_v59, %v136_v60 }
 0xd92   :  { %v2646_v13 = vpop.eup %2156 }
 0xd93   :  { %v132_v26 = vmul.f32 %v2646_v13, %v129_v23  ;;  %v138_v28 = vmul.f32 %v2646_v13, %v137_v61 }
 0xd95   :  { %v150_v63 = vsel %vm2648_vm10, %v147_v19, %v132_v26  ;;  %v151_v29 = vsel %vm2648_vm10, %v149_v52, %v138_v28 }
 0xd96   :  { %153 = vst [vmem:[#allocation4] sm:$0xff] %v150_v63  ;;  %154 = vst [vmem:[#allocation5] sm:$0xff] %v151_v29 }
 0xd9d   :  { %v1290_v27 = vld [vmem:[#allocation4 + $0x7] ss:$0 sm:$0xff] }
 0xd9e   :  { %v1291_v3 = vld [vmem:[#allocation5 + $0x7] ss:$0 sm:$0xff]  ;;  %v1292_v32 = vxor.u32 2147483648, %v1290_v27 }
 0xd9f   :  { %v1255_v48 = vpop.xlane.xlu1 %1254  ;;  %v1293_v38 = vxor.u32 2147483648, %v1291_v3  ;;  %v1253_v34 = vpop.xlane.xlu0 %1252 }
 0xda0   :  { %v1257_v39 = vsel %vm1242_vm1, %v1255_v48, %v2582_v47  ;;  %v1256_v40 = vsel %vm1242_vm1, %v1253_v34, %v2586_v45  ;;  %v1302_v49 = vmul.f32 0.0, %v1292_v32  ;;  %v1299_v33 = vmul.f32 %v1292_v32, %v350_v8  ;;  %v1359_v34 = vld [vmem:[#allocation4 + $0x6] ss:$0 sm:$0xff] }
 0xda1   :  { %v1303_v2 = vmul.f32 %v1293_v38, %v350_v8  ;;  %v1300_v25 = vmul.f32 0.0, %v1293_v38  ;;  %v1317_v58 = vmul.f32 %v1292_v32, %v1257_v39  ;;  %v1318_v53 = vmul.f32 %v1293_v38, %v1256_v40 }
 0xda2   :  { %v1315_v60 = vmul.f32 %v1293_v38, %v1257_v39  ;;  %v1314_v9 = vmul.f32 %v1292_v32, %v1256_v40 }
 0xda3   :  { %v1304_v54 = vadd.f32 %v1303_v2, %v1302_v49  ;;  %v1301_v59 = vsub.f32 %v1299_v33, %v1300_v25  ;;  %v1319_v61 = vadd.f32 %v1318_v53, %v1317_v58  ;;  %v1360_v49 = vld [vmem:[#allocation5 + $0x6] ss:$0 sm:$0xff]  ;;  %v1361_v2 = vxor.u32 2147483648, %v1359_v34 }
 0xda4   :  { %v1270_v50 = vpop.xlane.xlu1 %1269  ;;  %v1268_v57 = vpop.xlane.xlu0 %1267  ;;  %v1316_v7 = vsub.f32 %v1314_v9, %v1315_v60  ;;  %v1362_v33 = vxor.u32 2147483648, %v1360_v49 }
 0xda5   :  { %v1272_v47 = vsel %vm1242_vm1, %v1270_v50, %v2594_v46  ;;  %v1271_v45 = vsel %vm1242_vm1, %v1268_v57, %v2598_v43  ;;  %1308 = vadd.xlane.f32.xlu1 %v1304_v54  ;;  %1306 = vadd.xlane.f32.xlu0 %v1301_v59 }
 0xda6   :  { %v1332_v23 = vmul.f32 %v1292_v32, %v1272_v47  ;;  %v1333_v35 = vmul.f32 %v1293_v38, %v1271_v45  ;;  %v1330_v0 = vmul.f32 %v1293_v38, %v1272_v47  ;;  %v1329_v55 = vmul.f32 %v1292_v32, %v1271_v45 }
 0xda8   :  { %v1334_v56 = vadd.f32 %v1333_v35, %v1332_v23  ;;  %v1331_v52 = vsub.f32 %v1329_v55, %v1330_v0 }
 0xda9   :  { %1323 = vadd.xlane.f32.xlu1 %v1319_v61  ;;  %1321 = vadd.xlane.f32.xlu0 %v1316_v7 }
 0xdad   :  { %1338 = vadd.xlane.f32.xlu1 %v1334_v56  ;;  %1336 = vadd.xlane.f32.xlu0 %v1331_v52 }
 0xe00   :  { %v1285_v19 = vpop.xlane.xlu1 %1284  ;;  %v1283_v46 = vpop.xlane.xlu0 %1282 }
 0xe01   :  { %v1287_v43 = vsel %vm1242_vm1, %v1285_v19, %v2606_v16  ;;  %v1286_v26 = vsel %vm1242_vm1, %v1283_v46, %v2610_v17  ;;  %vm1710_vm1 = vcmp.eq.s32.totalorder %v2180_v1, 1 }
 0xe02   :  { %v1345_v28 = vmul.f32 %v1293_v38, %v1287_v43  ;;  %v1347_v63 = vmul.f32 %v1292_v32, %v1287_v43  ;;  %v1344_v29 = vmul.f32 %v1292_v32, %v1286_v26  ;;  %v1348_v27 = vmul.f32 %v1293_v38, %v1286_v26 }
 0xe04   :  { %v1349_v3 = vadd.f32 %v1348_v27, %v1347_v63  ;;  %v1346_v48 = vsub.f32 %v1344_v29, %v1345_v28 }
 0xe06   :  { %1353 = vadd.xlane.f32.xlu1 %v1349_v3  ;;  %1351 = vadd.xlane.f32.xlu0 %v1346_v48 }
 0xe32   :  { %v1309_v25 = vpop.xlane.xlu1 %1308  ;;  %v1307_v58 = vpop.xlane.xlu0 %1306 }
 0xe33   :  { %v1311_v16 = vsel %vm1296_vm2, %v1309_v25, 0.0  ;;  %v1310_v32 = vsel %vm1296_vm2, %v1307_v58, %v350_v8 }
 0xe34   :  { %v1369_v17 = vmul.f32 %v1362_v33, %v1311_v16  ;;  %v1371_v53 = vmul.f32 %v1361_v2, %v1311_v16  ;;  %v1368_v38 = vmul.f32 %v1361_v2, %v1310_v32  ;;  %v1372_v50 = vmul.f32 %v1362_v33, %v1310_v32 }
 0xe36   :  { %v1324_v57 = vpop.xlane.xlu1 %1323  ;;  %v1322_v59 = vpop.xlane.xlu0 %1321  ;;  %v1373_v60 = vadd.f32 %v1372_v50, %v1371_v53  ;;  %v1370_v9 = vsub.f32 %v1368_v38, %v1369_v17  ;;  %v1428_v38 = vld [vmem:[#allocation4 + $0x5] ss:$0 sm:$0xff] }
 0xe37   :  { %v1326_v54 = vsel %vm1296_vm2, %v1324_v57, %v1257_v39  ;;  %v1325_v61 = vsel %vm1296_vm2, %v1322_v59, %v1256_v40  ;;  %v1429_v50 = vld [vmem:[#allocation5 + $0x5] ss:$0 sm:$0xff]  ;;  %v1430_v57 = vxor.u32 2147483648, %v1428_v38 }
 0xe38   :  { %v1384_v23 = vmul.f32 %v1362_v33, %v1326_v54  ;;  %v1386_v35 = vmul.f32 %v1361_v2, %v1326_v54  ;;  %v1383_v0 = vmul.f32 %v1361_v2, %v1325_v61  ;;  %v1387_v55 = vmul.f32 %v1362_v33, %v1325_v61  ;;  %1377 = vadd.xlane.f32.xlu1 %v1373_v60 }
 0xe39   :  { %1375 = vadd.xlane.f32.xlu0 %v1370_v9  ;;  %v1431_v59 = vxor.u32 2147483648, %v1429_v50 }
 0xe3a   :  { %v1339_v7 = vpop.xlane.xlu1 %1338  ;;  %v1337_v56 = vpop.xlane.xlu0 %1336  ;;  %v1388_v52 = vadd.f32 %v1387_v55, %v1386_v35  ;;  %v1385_v19 = vsub.f32 %v1383_v0, %v1384_v23 }
 0xe3b   :  { %v1341_v8 = vsel %vm1296_vm2, %v1339_v7, %v1272_v47  ;;  %v1340_v28 = vsel %vm1296_vm2, %v1337_v56, %v1271_v45 }
 0xe3c   :  { %v1399_v39 = vmul.f32 %v1362_v33, %v1341_v8  ;;  %v1401_v46 = vmul.f32 %v1361_v2, %v1341_v8  ;;  %v1398_v63 = vmul.f32 %v1361_v2, %v1340_v28  ;;  %v1402_v29 = vmul.f32 %v1362_v33, %v1340_v28  ;;  %1392 = vadd.xlane.f32.xlu1 %v1388_v52 }
 0xe3d   :  { %1390 = vadd.xlane.f32.xlu0 %v1385_v19 }
 0xe3e   :  { %v1403_v40 = vadd.f32 %v1402_v29, %v1401_v46  ;;  %v1400_v27 = vsub.f32 %v1398_v63, %v1399_v39 }
 0xe40   :  { %1407 = vadd.xlane.f32.xlu1 %v1403_v40 }
 0xe41   :  { %1405 = vadd.xlane.f32.xlu0 %v1400_v27 }
 0xe93   :  { %v1354_v3 = vpop.xlane.xlu1 %1353  ;;  %v1352_v48 = vpop.xlane.xlu0 %1351 }
 0xe94   :  { %v1356_v47 = vsel %vm1296_vm2, %v1354_v3, %v1287_v43  ;;  %v1355_v34 = vsel %vm1296_vm2, %v1352_v48, %v1286_v26  ;;  %vm1777_vm2 = vcmp.eq.s32.totalorder %v2180_v1, 0 }
 0xe95   :  { %v1414_v49 = vmul.f32 %v1362_v33, %v1356_v47  ;;  %v1416_v25 = vmul.f32 %v1361_v2, %v1356_v47  ;;  %v1413_v58 = vmul.f32 %v1361_v2, %v1355_v34  ;;  %v1417_v45 = vmul.f32 %v1362_v33, %v1355_v34 }
 0xe97   :  { %v1418_v17 = vadd.f32 %v1417_v45, %v1416_v25  ;;  %v1415_v53 = vsub.f32 %v1413_v58, %v1414_v49 }
 0xe99   :  { %1422 = vadd.xlane.f32.xlu1 %v1418_v17  ;;  %1420 = vadd.xlane.f32.xlu0 %v1415_v53 }
 0xec5   :  { %v1378_v60 = vpop.xlane.xlu1 %1377 }
 0xec6   :  { %v1376_v9 = vpop.xlane.xlu0 %1375  ;;  %v1380_v43 = vsel %vm1365_vm0, %v1378_v60, %v1311_v16 }
 0xec7   :  { %v1379_v26 = vsel %vm1365_vm0, %v1376_v9, %v1310_v32  ;;  %v1438_v2 = vmul.f32 %v1431_v59, %v1380_v43  ;;  %v1440_v33 = vmul.f32 %v1430_v57, %v1380_v43 }
 0xec8   :  { %v1437_v23 = vmul.f32 %v1430_v57, %v1379_v26  ;;  %v1441_v35 = vmul.f32 %v1431_v59, %v1379_v26 }
 0xec9   :  { %v1393_v0 = vpop.xlane.xlu1 %1392 }
 0xeca   :  { %v1391_v55 = vpop.xlane.xlu0 %1390  ;;  %v1442_v7 = vadd.f32 %v1441_v35, %v1440_v33  ;;  %v1439_v56 = vsub.f32 %v1437_v23, %v1438_v2  ;;  %v1395_v52 = vsel %vm1365_vm0, %v1393_v0, %v1326_v54  ;;  %v1497_v23 = vld [vmem:[#allocation4 + $0x4] ss:$0 sm:$0xff] }
 0xecb   :  { %v1394_v19 = vsel %vm1365_vm0, %v1391_v55, %v1325_v61  ;;  %v1453_v39 = vmul.f32 %v1431_v59, %v1395_v52  ;;  %v1455_v46 = vmul.f32 %v1430_v57, %v1395_v52  ;;  %v1498_v35 = vld [vmem:[#allocation5 + $0x4] ss:$0 sm:$0xff]  ;;  %v1499_v0 = vxor.u32 2147483648, %v1497_v23 }
 0xecc   :  { %v1452_v16 = vmul.f32 %v1430_v57, %v1394_v19  ;;  %v1456_v63 = vmul.f32 %v1431_v59, %v1394_v19  ;;  %1446 = vadd.xlane.f32.xlu1 %v1442_v7  ;;  %1444 = vadd.xlane.f32.xlu0 %v1439_v56  ;;  %v1500_v55 = vxor.u32 2147483648, %v1498_v35 }
 0xecd   :  { %v1408_v32 = vpop.xlane.xlu1 %1407 }
 0xece   :  { %v1406_v29 = vpop.xlane.xlu0 %1405  ;;  %v1457_v40 = vadd.f32 %v1456_v63, %v1455_v46  ;;  %v1454_v27 = vsub.f32 %v1452_v16, %v1453_v39  ;;  %v1410_v3 = vsel %vm1365_vm0, %v1408_v32, %v1341_v8 }
 0xecf   :  { %v1409_v48 = vsel %vm1365_vm0, %v1406_v29, %v1340_v28  ;;  %v1468_v54 = vmul.f32 %v1431_v59, %v1410_v3  ;;  %v1470_v49 = vmul.f32 %v1430_v57, %v1410_v3 }
 0xed0   :  { %v1467_v25 = vmul.f32 %v1430_v57, %v1409_v48  ;;  %v1471_v61 = vmul.f32 %v1431_v59, %v1409_v48  ;;  %1461 = vadd.xlane.f32.xlu1 %v1457_v40  ;;  %1459 = vadd.xlane.f32.xlu0 %v1454_v27 }
 0xed2   :  { %v1472_v58 = vadd.f32 %v1471_v61, %v1470_v49  ;;  %v1469_v45 = vsub.f32 %v1467_v25, %v1468_v54 }
 0xed4   :  { %1476 = vadd.xlane.f32.xlu1 %v1472_v58  ;;  %1474 = vadd.xlane.f32.xlu0 %v1469_v45 }
 0xf26   :  { %v1423_v17 = vpop.xlane.xlu1 %1422  ;;  %v1421_v53 = vpop.xlane.xlu0 %1420 }
 0xf27   :  { %v1425_v38 = vsel %vm1365_vm0, %v1423_v17, %v1356_v47  ;;  %v1424_v8 = vsel %vm1365_vm0, %v1421_v53, %v1355_v34  ;;  %vm1927_vm0 = vweird.f32 %v2421_v6 }
 0xf28   :  { %v1483_v50 = vmul.f32 %v1431_v59, %v1425_v38  ;;  %v1485_v28 = vmul.f32 %v1430_v57, %v1425_v38  ;;  %v1482_v60 = vmul.f32 %v1430_v57, %v1424_v8  ;;  %v1486_v9 = vmul.f32 %v1431_v59, %v1424_v8 }
 0xf2a   :  { %v1487_v2 = vadd.f32 %v1486_v9, %v1485_v28  ;;  %v1484_v33 = vsub.f32 %v1482_v60, %v1483_v50 }
 0xf2c   :  { %1491 = vadd.xlane.f32.xlu1 %v1487_v2  ;;  %1489 = vadd.xlane.f32.xlu0 %v1484_v33 }
 0xf59   :  { %v1447_v7 = vpop.xlane.xlu1 %1446  ;;  %v1445_v56 = vpop.xlane.xlu0 %1444 }
 0xf5a   :  { %v1449_v47 = vsel %vm1434_vm3, %v1447_v7, %v1380_v43  ;;  %v1448_v57 = vsel %vm1434_vm3, %v1445_v56, %v1379_v26 }
 0xf5b   :  { %v1507_v34 = vmul.f32 %v1500_v55, %v1449_v47  ;;  %v1509_v39 = vmul.f32 %v1499_v0, %v1449_v47  ;;  %v1506_v59 = vmul.f32 %v1499_v0, %v1448_v57  ;;  %v1510_v46 = vmul.f32 %v1500_v55, %v1448_v57 }
 0xf5d   :  { %v1462_v16 = vpop.xlane.xlu1 %1461  ;;  %v1460_v32 = vpop.xlane.xlu0 %1459  ;;  %v1511_v29 = vadd.f32 %v1510_v46, %v1509_v39  ;;  %v1508_v40 = vsub.f32 %v1506_v59, %v1507_v34  ;;  %v1566_v59 = vld [vmem:[#allocation4 + $0x3] ss:$0 sm:$0xff] }
 0xf5e   :  { %v1464_v63 = vsel %vm1434_vm3, %v1462_v16, %v1395_v52  ;;  %v1463_v43 = vsel %vm1434_vm3, %v1460_v32, %v1394_v19  ;;  %v1567_v46 = vld [vmem:[#allocation5 + $0x3] ss:$0 sm:$0xff]  ;;  %v1568_v16 = vxor.u32 2147483648, %v1566_v59 }
 0xf5f   :  { %v1522_v27 = vmul.f32 %v1500_v55, %v1464_v63  ;;  %v1524_v54 = vmul.f32 %v1499_v0, %v1464_v63  ;;  %v1521_v49 = vmul.f32 %v1499_v0, %v1463_v43  ;;  %v1525_v25 = vmul.f32 %v1500_v55, %v1463_v43  ;;  %1515 = vadd.xlane.f32.xlu1 %v1511_v29 }
 0xf60   :  { %1513 = vadd.xlane.f32.xlu0 %v1508_v40  ;;  %v1569_v32 = vxor.u32 2147483648, %v1567_v46 }
 0xf61   :  { %v1477_v61 = vpop.xlane.xlu1 %1476  ;;  %v1475_v58 = vpop.xlane.xlu0 %1474  ;;  %v1526_v45 = vadd.f32 %v1525_v25, %v1524_v54  ;;  %v1523_v17 = vsub.f32 %v1521_v49, %v1522_v27 }
 0xf62   :  { %v1479_v26 = vsel %vm1434_vm3, %v1477_v61, %v1410_v3  ;;  %v1478_v50 = vsel %vm1434_vm3, %v1475_v58, %v1409_v48 }
 0xf63   :  { %v1537_v52 = vmul.f32 %v1500_v55, %v1479_v26  ;;  %v1539_v53 = vmul.f32 %v1499_v0, %v1479_v26  ;;  %v1536_v28 = vmul.f32 %v1499_v0, %v1478_v50  ;;  %v1540_v60 = vmul.f32 %v1500_v55, %v1478_v50  ;;  %1530 = vadd.xlane.f32.xlu1 %v1526_v45 }
 0xf64   :  { %1528 = vadd.xlane.f32.xlu0 %v1523_v17 }
 0xf65   :  { %v1541_v19 = vadd.f32 %v1540_v60, %v1539_v53  ;;  %v1538_v9 = vsub.f32 %v1536_v28, %v1537_v52 }
 0xf67   :  { %1545 = vadd.xlane.f32.xlu1 %v1541_v19 }
 0xf68   :  { %1543 = vadd.xlane.f32.xlu0 %v1538_v9 }
 0xfb9   :  { %v1492_v2 = vpop.xlane.xlu1 %1491  ;;  %v1490_v33 = vpop.xlane.xlu0 %1489 }
 0xfba   :  { %v1494_v3 = vsel %vm1434_vm3, %v1492_v2, %v1425_v38  ;;  %v1493_v23 = vsel %vm1434_vm3, %v1490_v33, %v1424_v8  ;;  %vm1928_vm3 = vweird.f32 %v2419_v5 }
 0xfbb   :  { %v1552_v35 = vmul.f32 %v1500_v55, %v1494_v3  ;;  %v1554_v7 = vmul.f32 %v1499_v0, %v1494_v3  ;;  %v1551_v56 = vmul.f32 %v1499_v0, %v1493_v23  ;;  %v1555_v48 = vmul.f32 %v1500_v55, %v1493_v23 }
 0xfbd   :  { %v1556_v34 = vadd.f32 %v1555_v48, %v1554_v7  ;;  %v1553_v39 = vsub.f32 %v1551_v56, %v1552_v35 }
 0xfbf   :  { %1560 = vadd.xlane.f32.xlu1 %v1556_v34  ;;  %1558 = vadd.xlane.f32.xlu0 %v1553_v39 }
 0xfec   :  { %v1516_v29 = vpop.xlane.xlu1 %1515 }
 0xfed   :  { %v1514_v40 = vpop.xlane.xlu0 %1513  ;;  %v1518_v38 = vsel %vm1503_vm6, %v1516_v29, %v1449_v47 }
 0xfee   :  { %v1517_v8 = vsel %vm1503_vm6, %v1514_v40, %v1448_v57  ;;  %v1576_v0 = vmul.f32 %v1569_v32, %v1518_v38  ;;  %v1578_v55 = vmul.f32 %v1568_v16, %v1518_v38 }
 0xfef   :  { %v1575_v27 = vmul.f32 %v1568_v16, %v1517_v8  ;;  %v1579_v54 = vmul.f32 %v1569_v32, %v1517_v8 }
 0xff0   :  { %v1531_v49 = vpop.xlane.xlu1 %1530 }
 0xff1   :  { %v1529_v25 = vpop.xlane.xlu0 %1528  ;;  %v1580_v61 = vadd.f32 %v1579_v54, %v1578_v55  ;;  %v1577_v58 = vsub.f32 %v1575_v27, %v1576_v0  ;;  %v1533_v45 = vsel %vm1503_vm6, %v1531_v49, %v1464_v63  ;;  %v1635_v27 = vld [vmem:[#allocation4 + $0x2] ss:$0 sm:$0xff] }
 0xff2   :  { %v1532_v17 = vsel %vm1503_vm6, %v1529_v25, %v1463_v43  ;;  %v1591_v52 = vmul.f32 %v1569_v32, %v1533_v45  ;;  %v1593_v53 = vmul.f32 %v1568_v16, %v1533_v45  ;;  %v1636_v54 = vld [vmem:[#allocation5 + $0x2] ss:$0 sm:$0xff]  ;;  %v1637_v49 = vxor.u32 2147483648, %v1635_v27 }
 0xff3   :  { %v1590_v47 = vmul.f32 %v1568_v16, %v1532_v17  ;;  %v1594_v28 = vmul.f32 %v1569_v32, %v1532_v17  ;;  %1584 = vadd.xlane.f32.xlu1 %v1580_v61  ;;  %1582 = vadd.xlane.f32.xlu0 %v1577_v58  ;;  %v1638_v25 = vxor.u32 2147483648, %v1636_v54 }
 0xff4   :  { %v1546_v57 = vpop.xlane.xlu1 %1545 }
 0xff5   :  { %v1544_v60 = vpop.xlane.xlu0 %1543  ;;  %v1595_v19 = vadd.f32 %v1594_v28, %v1593_v53  ;;  %v1592_v9 = vsub.f32 %v1590_v47, %v1591_v52  ;;  %v1548_v2 = vsel %vm1503_vm6, %v1546_v57, %v1479_v26 }
 0xff6   :  { %v1547_v33 = vsel %vm1503_vm6, %v1544_v60, %v1478_v50  ;;  %v1606_v63 = vmul.f32 %v1569_v32, %v1548_v2  ;;  %v1608_v35 = vmul.f32 %v1568_v16, %v1548_v2 }
 0xff7   :  { %v1605_v7 = vmul.f32 %v1568_v16, %v1547_v33  ;;  %v1609_v43 = vmul.f32 %v1569_v32, %v1547_v33  ;;  %1599 = vadd.xlane.f32.xlu1 %v1595_v19  ;;  %1597 = vadd.xlane.f32.xlu0 %v1592_v9 }
 0xff9   :  { %v1610_v56 = vadd.f32 %v1609_v43, %v1608_v35  ;;  %v1607_v48 = vsub.f32 %v1605_v7, %v1606_v63 }
 0xffb   :  { %1614 = vadd.xlane.f32.xlu1 %v1610_v56  ;;  %1612 = vadd.xlane.f32.xlu0 %v1607_v48 }
0x104c   :  { %v1561_v34 = vpop.xlane.xlu1 %1560  ;;  %v1559_v39 = vpop.xlane.xlu0 %1558 }
0x104d   :  { %v1563_v59 = vsel %vm1503_vm6, %v1561_v34, %v1494_v3  ;;  %v1562_v26 = vsel %vm1503_vm6, %v1559_v39, %v1493_v23 }
0x104e   :  { %v1621_v46 = vmul.f32 %v1569_v32, %v1563_v59  ;;  %v1623_v50 = vmul.f32 %v1568_v16, %v1563_v59  ;;  %v1620_v29 = vmul.f32 %v1568_v16, %v1562_v26  ;;  %v1624_v40 = vmul.f32 %v1569_v32, %v1562_v26 }
0x1050   :  { %v1625_v0 = vadd.f32 %v1624_v40, %v1623_v50  ;;  %v1622_v55 = vsub.f32 %v1620_v29, %v1621_v46 }
0x1052   :  { %1629 = vadd.xlane.f32.xlu1 %v1625_v0  ;;  %1627 = vadd.xlane.f32.xlu0 %v1622_v55 }
0x1080   :  { %v1585_v61 = vpop.xlane.xlu1 %1584  ;;  %v1583_v58 = vpop.xlane.xlu0 %1582 }
0x1081   :  { %v1587_v3 = vsel %vm1572_vm8, %v1585_v61, %v1518_v38  ;;  %v1586_v16 = vsel %vm1572_vm8, %v1583_v58, %v1517_v8 }
0x1082   :  { %v1645_v23 = vmul.f32 %v1638_v25, %v1587_v3  ;;  %v1647_v52 = vmul.f32 %v1637_v49, %v1587_v3  ;;  %v1644_v32 = vmul.f32 %v1637_v49, %v1586_v16  ;;  %v1648_v53 = vmul.f32 %v1638_v25, %v1586_v16 }
0x1084   :  { %v1600_v47 = vpop.xlane.xlu1 %1599  ;;  %v1598_v57 = vpop.xlane.xlu0 %1597  ;;  %v1649_v60 = vadd.f32 %v1648_v53, %v1647_v52  ;;  %v1646_v19 = vsub.f32 %v1644_v32, %v1645_v23  ;;  %v1704_v32 = vld [vmem:[#allocation4 + $0x1] ss:$0 sm:$0xff] }
0x1085   :  { %v1602_v28 = vsel %vm1572_vm8, %v1600_v47, %v1533_v45  ;;  %v1601_v38 = vsel %vm1572_vm8, %v1598_v57, %v1532_v17  ;;  %v1705_v53 = vld [vmem:[#allocation5 + $0x1] ss:$0 sm:$0xff]  ;;  %v1706_v47 = vxor.u32 2147483648, %v1704_v32 }
0x1086   :  { %v1660_v9 = vmul.f32 %v1638_v25, %v1602_v28  ;;  %v1662_v63 = vmul.f32 %v1637_v49, %v1602_v28  ;;  %v1659_v35 = vmul.f32 %v1637_v49, %v1601_v38  ;;  %v1663_v7 = vmul.f32 %v1638_v25, %v1601_v38  ;;  %1653 = vadd.xlane.f32.xlu1 %v1649_v60 }
0x1087   :  { %1651 = vadd.xlane.f32.xlu0 %v1646_v19  ;;  %v1707_v57 = vxor.u32 2147483648, %v1705_v53 }
0x1088   :  { %v1615_v43 = vpop.xlane.xlu1 %1614  ;;  %v1613_v56 = vpop.xlane.xlu0 %1612  ;;  %v1664_v48 = vadd.f32 %v1663_v7, %v1662_v63  ;;  %v1661_v34 = vsub.f32 %v1659_v35, %v1660_v9 }
0x1089   :  { %v1617_v8 = vsel %vm1572_vm8, %v1615_v43, %v1548_v2  ;;  %v1616_v46 = vsel %vm1572_vm8, %v1613_v56, %v1547_v33 }
0x108a   :  { %v1675_v45 = vmul.f32 %v1638_v25, %v1617_v8  ;;  %v1677_v39 = vmul.f32 %v1637_v49, %v1617_v8  ;;  %v1674_v50 = vmul.f32 %v1637_v49, %v1616_v46  ;;  %v1678_v29 = vmul.f32 %v1638_v25, %v1616_v46  ;;  %1668 = vadd.xlane.f32.xlu1 %v1664_v48 }
0x108b   :  { %1666 = vadd.xlane.f32.xlu0 %v1661_v34 }
0x108c   :  { %v1679_v17 = vadd.f32 %v1678_v29, %v1677_v39  ;;  %v1676_v40 = vsub.f32 %v1674_v50, %v1675_v45 }
0x108e   :  { %1683 = vadd.xlane.f32.xlu1 %v1679_v17 }
0x108f   :  { %1681 = vadd.xlane.f32.xlu0 %v1676_v40 }
0x10df   :  { %v1630_v0 = vpop.xlane.xlu1 %1629  ;;  %v1628_v55 = vpop.xlane.xlu0 %1627 }
0x10e0   :  { %v1632_v2 = vsel %vm1572_vm8, %v1630_v0, %v1563_v59  ;;  %v1631_v27 = vsel %vm1572_vm8, %v1628_v55, %v1562_v26 }
0x10e1   :  { %v1690_v54 = vmul.f32 %v1638_v25, %v1632_v2  ;;  %v1692_v61 = vmul.f32 %v1637_v49, %v1632_v2  ;;  %v1689_v58 = vmul.f32 %v1637_v49, %v1631_v27  ;;  %v1693_v33 = vmul.f32 %v1638_v25, %v1631_v27 }
0x10e3   :  { %v1694_v23 = vadd.f32 %v1693_v33, %v1692_v61  ;;  %v1691_v52 = vsub.f32 %v1689_v58, %v1690_v54 }
0x10e5   :  { %1698 = vadd.xlane.f32.xlu1 %v1694_v23  ;;  %1696 = vadd.xlane.f32.xlu0 %v1691_v52 }
0x1113   :  { %v1654_v60 = vpop.xlane.xlu1 %1653 }
0x1114   :  { %v1652_v19 = vpop.xlane.xlu0 %1651  ;;  %v1656_v59 = vsel %vm1641_vm11, %v1654_v60, %v1587_v3 }
0x1115   :  { %v1655_v26 = vsel %vm1641_vm11, %v1652_v19, %v1586_v16  ;;  %v1714_v49 = vmul.f32 %v1707_v57, %v1656_v59  ;;  %v1716_v25 = vmul.f32 %v1706_v47, %v1656_v59 }
0x1116   :  { %v1713_v9 = vmul.f32 %v1706_v47, %v1655_v26  ;;  %v1717_v63 = vmul.f32 %v1707_v57, %v1655_v26 }
0x1117   :  { %v1669_v35 = vpop.xlane.xlu1 %1668 }
0x1118   :  { %v1667_v7 = vpop.xlane.xlu0 %1666  ;;  %v1718_v43 = vadd.f32 %v1717_v63, %v1716_v25  ;;  %v1715_v56 = vsub.f32 %v1713_v9, %v1714_v49  ;;  %v1671_v48 = vsel %vm1641_vm11, %v1669_v35, %v1602_v28  ;;  %v1771_v9 = vld [vmem:[#allocation4] ss:$0 sm:$0xff] }
0x1119   :  { %v1670_v34 = vsel %vm1641_vm11, %v1667_v7, %v1601_v38  ;;  %v1729_v45 = vmul.f32 %v1707_v57, %v1671_v48  ;;  %v1731_v39 = vmul.f32 %v1706_v47, %v1671_v48  ;;  %v1772_v63 = vld [vmem:[#allocation5] ss:$0 sm:$0xff]  ;;  %v1773_v35 = vxor.u32 2147483648, %v1771_v9 }
0x111a   :  { %v1728_v3 = vmul.f32 %v1706_v47, %v1670_v34  ;;  %v1732_v50 = vmul.f32 %v1707_v57, %v1670_v34  ;;  %1722 = vadd.xlane.f32.xlu1 %v1718_v43  ;;  %1720 = vadd.xlane.f32.xlu0 %v1715_v56  ;;  %v1774_v7 = vxor.u32 2147483648, %v1772_v63 }
0x111b   :  { %v1684_v16 = vpop.xlane.xlu1 %1683 }
0x111c   :  { %v1682_v29 = vpop.xlane.xlu0 %1681  ;;  %v1733_v17 = vadd.f32 %v1732_v50, %v1731_v39  ;;  %v1730_v40 = vsub.f32 %v1728_v3, %v1729_v45  ;;  %v1686_v0 = vsel %vm1641_vm11, %v1684_v16, %v1617_v8 }
0x111d   :  { %v1685_v55 = vsel %vm1641_vm11, %v1682_v29, %v1616_v46  ;;  %v1744_v28 = vmul.f32 %v1707_v57, %v1686_v0  ;;  %v1746_v54 = vmul.f32 %v1706_v47, %v1686_v0 }
0x111e   :  { %v1743_v61 = vmul.f32 %v1706_v47, %v1685_v55  ;;  %v1747_v38 = vmul.f32 %v1707_v57, %v1685_v55  ;;  %1737 = vadd.xlane.f32.xlu1 %v1733_v17  ;;  %1735 = vadd.xlane.f32.xlu0 %v1730_v40 }
0x1120   :  { %v1748_v58 = vadd.f32 %v1747_v38, %v1746_v54  ;;  %v1745_v33 = vsub.f32 %v1743_v61, %v1744_v28 }
0x1122   :  { %1752 = vadd.xlane.f32.xlu1 %v1748_v58  ;;  %1750 = vadd.xlane.f32.xlu0 %v1745_v33 }
0x1172   :  { %v1699_v23 = vpop.xlane.xlu1 %1698  ;;  %v1697_v52 = vpop.xlane.xlu0 %1696 }
0x1173   :  { %v1701_v32 = vsel %vm1641_vm11, %v1699_v23, %v1632_v2  ;;  %v1700_v8 = vsel %vm1641_vm11, %v1697_v52, %v1631_v27  ;;  %vm1978_vm11 = vweird.f32 %v2271_v30 }
0x1174   :  { %v1759_v53 = vmul.f32 %v1707_v57, %v1701_v32  ;;  %v1761_v46 = vmul.f32 %v1706_v47, %v1701_v32  ;;  %v1758_v60 = vmul.f32 %v1706_v47, %v1700_v8  ;;  %v1762_v19 = vmul.f32 %v1707_v57, %v1700_v8 }
0x1176   :  { %v1763_v49 = vadd.f32 %v1762_v19, %v1761_v46  ;;  %v1760_v25 = vsub.f32 %v1758_v60, %v1759_v53 }
0x1178   :  { %1767 = vadd.xlane.f32.xlu1 %v1763_v49  ;;  %1765 = vadd.xlane.f32.xlu0 %v1760_v25 }
0x11a7   :  { %v1723_v43 = vpop.xlane.xlu1 %1722  ;;  %v1721_v56 = vpop.xlane.xlu0 %1720 }
0x11a8   :  { %v1725_v2 = vsel %vm1710_vm1, %v1723_v43, %v1656_v59  ;;  %v1724_v47 = vsel %vm1710_vm1, %v1721_v56, %v1655_v26 }
0x11a9   :  { %v1781_v27 = vmul.f32 %v1774_v7, %v1725_v2  ;;  %v1783_v45 = vmul.f32 %v1773_v35, %v1725_v2  ;;  %v1780_v57 = vmul.f32 %v1773_v35, %v1724_v47  ;;  %v1784_v39 = vmul.f32 %v1774_v7, %v1724_v47 }
0x11ab   :  { %v1738_v3 = vpop.xlane.xlu1 %1737  ;;  %v1736_v16 = vpop.xlane.xlu0 %1735  ;;  %v1785_v29 = vadd.f32 %v1784_v39, %v1783_v45  ;;  %v1782_v17 = vsub.f32 %v1780_v57, %v1781_v27 }
0x11ac   :  { %v1740_v50 = vsel %vm1710_vm1, %v1738_v3, %v1671_v48  ;;  %v1739_v59 = vsel %vm1710_vm1, %v1736_v16, %v1670_v34 }
0x11ad   :  { %v1796_v40 = vmul.f32 %v1774_v7, %v1740_v50  ;;  %v1798_v28 = vmul.f32 %v1773_v35, %v1740_v50  ;;  %v1795_v54 = vmul.f32 %v1773_v35, %v1739_v59  ;;  %v1799_v61 = vmul.f32 %v1774_v7, %v1739_v59  ;;  %1789 = vadd.xlane.f32.xlu1 %v1785_v29 }
0x11ae   :  { %1787 = vadd.xlane.f32.xlu0 %v1782_v17 }
0x11af   :  { %v1753_v38 = vpop.xlane.xlu1 %1752  ;;  %v1751_v58 = vpop.xlane.xlu0 %1750  ;;  %v1800_v33 = vadd.f32 %v1799_v61, %v1798_v28  ;;  %v1797_v48 = vsub.f32 %v1795_v54, %v1796_v40 }
0x11b0   :  { %v2793_v26 = vsel %vm1710_vm1, %v1753_v38, %v1686_v0  ;;  %v2799_v53 = vsel %vm1710_vm1, %v1751_v58, %v1685_v55 }
0x11b1   :  { %v1811_v23 = vmul.f32 %v1774_v7, %v2793_v26  ;;  %v1813_v52 = vmul.f32 %v1773_v35, %v2793_v26  ;;  %v1810_v34 = vmul.f32 %v1773_v35, %v2799_v53  ;;  %v1814_v46 = vmul.f32 %v1774_v7, %v2799_v53  ;;  %1804 = vadd.xlane.f32.xlu1 %v1800_v33 }
0x11b2   :  { %1802 = vadd.xlane.f32.xlu0 %v1797_v48 }
0x11b3   :  { %v1815_v60 = vadd.f32 %v1814_v46, %v1813_v52  ;;  %v1812_v0 = vsub.f32 %v1810_v34, %v1811_v23 }
0x11b5   :  { %1819 = vadd.xlane.f32.xlu1 %v1815_v60 }
0x11b6   :  { %1817 = vadd.xlane.f32.xlu0 %v1812_v0 }
0x1205   :  { %v1768_v19 = vpop.xlane.xlu1 %1767  ;;  %v1766_v49 = vpop.xlane.xlu0 %1765 }
0x1206   :  { %v2805_v25 = vsel %vm1710_vm1, %v1768_v19, %v1701_v32  ;;  %v2809_v55 = vsel %vm1710_vm1, %v1766_v49, %v1700_v8 }
0x1207   :  { %v1826_v9 = vmul.f32 %v1774_v7, %v2805_v25  ;;  %v1828_v63 = vmul.f32 %v1773_v35, %v2805_v25  ;;  %v1825_v43 = vmul.f32 %v1773_v35, %v2809_v55  ;;  %v1829_v56 = vmul.f32 %v1774_v7, %v2809_v55 }
0x1209   :  { %v1830_v27 = vadd.f32 %v1829_v56, %v1828_v63  ;;  %v1827_v45 = vsub.f32 %v1825_v43, %v1826_v9 }
0x120b   :  { %1834 = vadd.xlane.f32.xlu1 %v1830_v27  ;;  %1832 = vadd.xlane.f32.xlu0 %v1827_v45 }
0x123a   :  { %v1790_v32 = vpop.xlane.xlu1 %1789 }
0x123b   :  { %v1788_v57 = vpop.xlane.xlu0 %1787  ;;  %v1792_v8 = vsel %vm1777_vm2, %v1790_v32, %v1725_v2 }
0x123c   :  { %v1791_v39 = vsel %vm1777_vm2, %v1788_v57, %v1724_v47  ;;  %v1853_v3 = vmul.f32 %v1792_v8, %v2634_v42  ;;  %v1870_v16 = vand.u32 2147483648, %v1792_v8  ;;  %vm1874_vm6 = vcmp.eq.f32.partialorder %v1792_v8, 0.0 }
0x123d   :  { %v1851_v35 = vmul.f32 %v1791_v39, %v2634_v42  ;;  %v1868_v7 = vand.u32 2147483648, %v1791_v39  ;;  %vm1872_vm8 = vcmp.eq.f32.partialorder %v1791_v39, 0.0 }
0x123e   :  { %v1871_v29 = vor.u32 inf, %v1870_v16  ;;  %v1854_v40 = vadd.f32 %v1853_v3, %v1791_v39  ;;  %v1860_v28 = vsub.f32 %v1853_v3, %v1791_v39  ;;  %v1805_v54 = vpop.xlane.xlu1 %1804 }
0x123f   :  { %v1852_v17 = vadd.f32 %v1851_v35, %v1792_v8  ;;  %v1803_v61 = vpop.xlane.xlu0 %1802  ;;  %v1862_v38 = vsub.f32 %v1792_v8, %v1851_v35  ;;  %v1869_v58 = vor.u32 inf, %v1868_v7  ;;  %v1807_v2 = vsel %vm1777_vm2, %v1805_v54, %v1740_v50 }
0x1240   :  { %v1806_v47 = vsel %vm1777_vm2, %v1803_v61, %v1739_v59  ;;  %v1901_v33 = vmul.f32 %v1807_v2, %v2441_v22  ;;  %v1918_v48 = vand.u32 2147483648, %v1807_v2  ;;  %v1875_v0 = vsel %vm1874_vm6, nan, %v1871_v29 }
0x1241   :  { %v1855_v42 = vsel %vm2616_vm14, %v1852_v17, %v1854_v40  ;;  %v1863_v52 = vsel %vm2616_vm14, %v1860_v28, %v1862_v38  ;;  %v1873_v34 = vsel %vm1872_vm8, nan, %v1869_v58  ;;  %v1899_v59 = vmul.f32 %v1806_v47, %v2441_v22 }
0x1242   :  { %v1858_v23 = vmul.f32 %v2646_v13, %v1855_v42  ;;  %v1864_v50 = vmul.f32 %v2646_v13, %v1863_v52  ;;  %v1902_v46 = vadd.f32 %v1901_v33, %v1806_v47  ;;  %v1820_v60 = vpop.xlane.xlu1 %1819  ;;  %v1908_v49 = vsub.f32 %v1901_v33, %v1806_v47 }
0x1243   :  { %v1916_v9 = vand.u32 2147483648, %v1806_v47  ;;  %v1919_v43 = vor.u32 inf, %v1918_v48  ;;  %v1900_v56 = vadd.f32 %v1899_v59, %v1807_v2  ;;  %v1818_v13 = vpop.xlane.xlu0 %1817  ;;  %v1910_v27 = vsub.f32 %v1807_v2, %v1899_v59 }
0x1244   :  { %v1876_v19 = vsel %vm2648_vm10, %v1873_v34, %v1858_v23  ;;  %v1877_v63 = vsel %vm2648_vm10, %v1875_v0, %v1864_v50  ;;  %v1822_v20 = vsel %vm1777_vm2, %v1820_v60, %v2793_v26  ;;  %vm1922_vm14 = vcmp.eq.f32.partialorder %v1807_v2, 0.0 }
0x1245   :  { %v1882_v12 = vsel %vm2620_vm15, %v1791_v39, %v1876_v19  ;;  %v1883_v22 = vsel %vm2620_vm15, %v1792_v8, %v1877_v63  ;;  %v1917_v45 = vor.u32 inf, %v1916_v9  ;;  %v1903_v32 = vsel %vm2425_vm12, %v1900_v56, %v1902_v46  ;;  %vm1929_vm15 = vmor %vm1927_vm0, %vm1928_vm3 }
0x1246   :  { %2070 = vst [vmem:[%s2924_s2] sm:$0xff] %v1882_v12  ;;  %2114 = vst [vmem:[%s2925_s3] sm:$0xff] %v1883_v22  ;;  %vm1920_vm10 = vcmp.eq.f32.partialorder %v1806_v47, 0.0  ;;  %v1951_v21 = vmul.f32 %v1822_v20, %v2293_v44  ;;  %v1906_v57 = vmul.f32 %v2459_v24, %v1903_v32  ;;  %v1911_v8 = vsel %vm2425_vm12, %v1908_v49, %v1910_v27 }
0x1247   :  { %v1968_v39 = vand.u32 2147483648, %v1822_v20  ;;  %v1821_v26 = vsel %vm1777_vm2, %v1818_v13, %v2799_v53  ;;  %v1912_v3 = vmul.f32 %v2459_v24, %v1911_v8  ;;  %v1921_v16 = vsel %vm1920_vm10, nan, %v1917_v45 }
0x1248   :  { %v1949_v35 = vmul.f32 %v1821_v26, %v2293_v44  ;;  %v1952_v7 = vadd.f32 %v1951_v21, %v1821_v26  ;;  %v1923_v29 = vsel %vm1922_vm14, nan, %v1919_v43  ;;  %v1924_v15 = vsel %vm2461_vm7, %v1921_v16, %v1906_v57 }
0x1249   :  { %v1958_v17 = vsub.f32 %v1951_v21, %v1821_v26  ;;  %v1966_v40 = vand.u32 2147483648, %v1821_v26  ;;  %v1925_v53 = vsel %vm2461_vm7, %v1923_v29, %v1912_v3  ;;  %v1930_v28 = vsel %vm1929_vm15, %v1806_v47, %v1924_v15 }
0x124a   :  { %v1950_v24 = vadd.f32 %v1949_v35, %v1822_v20  ;;  %v1931_v54 = vsel %vm1929_vm15, %v1807_v2, %v1925_v53  ;;  %2072 = vst [vmem:[%s2924_s2 + $0x8] sm:$0xff] %v1930_v28  ;;  %v1969_v44 = vor.u32 inf, %v1968_v39  ;;  %v1960_v5 = vsub.f32 %v1822_v20, %v1949_v35 }
0x124b   :  { %v1967_v61 = vor.u32 inf, %v1966_v40  ;;  %2116 = vst [vmem:[%s2925_s3 + $0x8] sm:$0xff] %v1931_v54  ;;  %vm1977_vm12 = vweird.f32 %v2273_v31  ;;  %vm1970_vm7 = vcmp.eq.f32.partialorder %v1821_v26, 0.0  ;;  %vm1972_vm1 = vcmp.eq.f32.partialorder %v1822_v20, 0.0 }
0x124c   :  { %v1953_v6 = vsel %vm2277_vm5, %v1950_v24, %v1952_v7  ;;  %v1961_v38 = vsel %vm2277_vm5, %v1958_v17, %v1960_v5  ;;  %v1973_v47 = vsel %vm1972_vm1, nan, %v1969_v44  ;;  %vm1979_vm0 = vmor %vm1977_vm12, %vm1978_vm11  ;;  %vm2028_vm5 = vweird.f32 %v2198_v11 }
0x124d   :  { %v1956_v51 = vmul.f32 %v2311_v62, %v1953_v6  ;;  %v1962_v58 = vmul.f32 %v2311_v62, %v1961_v38  ;;  %v1971_v2 = vsel %vm1970_vm7, nan, %v1967_v61  ;;  %vm2027_vm3 = vweird.f32 %v2196_v10 }
0x124e   :  { %vm2029_vm6 = vmor %vm2027_vm3, %vm2028_vm5 }
0x124f   :  { %v1974_v31 = vsel %vm2313_vm13, %v1971_v2, %v1956_v51  ;;  %v1975_v30 = vsel %vm2313_vm13, %v1973_v47, %v1962_v58 }
0x1250   :  { %v1980_v42 = vsel %vm1979_vm0, %v1821_v26, %v1974_v31  ;;  %v1981_v33 = vsel %vm1979_vm0, %v1822_v20, %v1975_v30 }
0x1251   :  { %2074 = vst [vmem:[%s2924_s2 + $0x10] sm:$0xff] %v1980_v42  ;;  %2118 = vst [vmem:[%s2925_s3 + $0x10] sm:$0xff] %v1981_v33 }
0x1298   :  { %v1835_v37 = vpop.xlane.xlu1 %1834  ;;  %v1833_v62 = vpop.xlane.xlu0 %1832 }
0x1299   :  { %v1837_v48 = vsel %vm1777_vm2, %v1835_v37, %v2805_v25  ;;  %v1836_v4 = vsel %vm1777_vm2, %v1833_v62, %v2809_v55 }
0x129a   :  { %v2001_v23 = vmul.f32 %v1837_v48, %v2214_v18  ;;  %v2018_v52 = vand.u32 2147483648, %v1837_v48  ;;  %v1999_v50 = vmul.f32 %v1836_v4, %v2214_v18  ;;  %v2016_v34 = vand.u32 2147483648, %v1836_v4 }
0x129b   :  { %vm2020_vm13 = vcmp.eq.f32.partialorder %v1836_v4, 0.0  ;;  %vm2022_vm2 = vcmp.eq.f32.partialorder %v1837_v48, 0.0 }
0x129c   :  { %v2000_v59 = vadd.f32 %v1999_v50, %v1837_v48  ;;  %v2002_v46 = vadd.f32 %v2001_v23, %v1836_v4  ;;  %v2008_v60 = vsub.f32 %v2001_v23, %v1836_v4  ;;  %v2019_v0 = vor.u32 inf, %v2018_v52 }
0x129d   :  { %v2010_v19 = vsub.f32 %v1837_v48, %v1999_v50  ;;  %v2017_v49 = vor.u32 inf, %v2016_v34 }
0x129e   :  { %v2003_v25 = vsel %vm2202_vm4, %v2000_v59, %v2002_v46  ;;  %v2023_v63 = vsel %vm2022_vm2, nan, %v2019_v0 }
0x129f   :  { %v2006_v1 = vmul.f32 %v2231_v36, %v2003_v25  ;;  %v2011_v55 = vsel %vm2202_vm4, %v2008_v60, %v2010_v19  ;;  %v2021_v9 = vsel %vm2020_vm13, nan, %v2017_v49 }
0x12a0   :  { %v2012_v18 = vmul.f32 %v2231_v36, %v2011_v55 }
0x12a1   :  { %v2024_v11 = vsel %vm2236_vm9, %v2021_v9, %v2006_v1 }
0x12a2   :  { %v2025_v12 = vsel %vm2236_vm9, %v2023_v63, %v2012_v18  ;;  %v2030_v43 = vsel %vm2029_vm6, %v1836_v4, %v2024_v11 }
0x12a3   :  { %v2031_v56 = vsel %vm2029_vm6, %v1837_v48, %v2025_v12  ;;  %2076 = vst [vmem:[%s2924_s2 + $0x18] sm:$0xff] %v2030_v43 }
0x12a4   :  { %2120 = vst [vmem:[%s2925_s3 + $0x18] sm:$0xff] %v2031_v56 }

// kernel: custom-call.13
= control target key start
LH: loop header
LB: loop body
LE: loop exit
PB: predicated region body
PF: predicated region fallthrough
CT: control target
= control target key end

     0   :  { %v93_v0 = vlaneseq  ;;  %v2160_v43 = vmov -1.0   ;;  %s2937_s0 = inlined_call_operand.vmem [shape: f32[1,32,32], index: 0, kind: input, shape index: {}]   ;;  %s2938_s1 = inlined_call_operand.vmem [shape: f32[1,32,32], index: 1, kind: input, shape index: {}]   ;;  %s2939_s2 = inlined_call_operand.vmem [shape: f32[1,32,32], index: 2, kind: output, shape index: {0}]   ;;  %s2940_s3 = inlined_call_operand.vmem [shape: f32[1,32,32], index: 3, kind: output, shape index: {1}]  }
   0x1   :  { %v38_v1 = vld [vmem:[%s2937_s0] sm:$0xff] }
   0x2   :  { %v2185_v2 = vand.u32 127, %v93_v0  ;;  %v2187_v3 = vshrl.u32 %v93_v0, 7  ;;  %v82_v4 = vld [vmem:[%s2938_s1] sm:$0xff] }
   0x4   :  { %vm99_vm0 = vcmp.eq.s32.totalorder %v2187_v3, %v2185_v2  ;;  %vm95_vm2 = vcmp.lt.s32.totalorder %v2185_v2, 32  ;;  %vm108_vm3 = vcmp.ge.s32.totalorder %v2187_v3, %v2185_v2  ;;  %vm352_vm10 = vcmp.eq.s32.totalorder %v2185_v2, 0 }
   0x5   :  { %v102_v5 = vsel %vm99_vm0, %v38_v1, 0.0  ;;  %v103_v6 = vsel %vm99_vm0, %v82_v4, 0.0  ;;  %vm109_vm4 = vmand %vm108_vm3, %vm95_vm2  ;;  %vm349_vm11 = vcmp.eq.s32.totalorder %v2185_v2, %v2187_v3  ;;  %v353_v44 = vsel %vm352_vm10, 1.0, %v2160_v43 }
   0x6   :  { %104 = vadd.xlane.f32.xlu0 %v102_v5  ;;  %v110_v14 = vsel %vm109_vm4, %v38_v1, 0.0  ;;  %v111_v15 = vsel %vm109_vm4, %v82_v4, 0.0  ;;  %v354_v45 = vsel %vm349_vm11, %v353_v44, 0.0  ;;  %vm384_vm12 = vcmp.eq.s32.totalorder %v2185_v2, 1 }
   0x7   :  { %v142_v31 = vand.u32 2147483648, %v110_v14  ;;  %v144_v32 = vand.u32 2147483648, %v111_v15  ;;  %vm146_vm5 = vcmp.eq.f32.partialorder %v110_v14, 0.0  ;;  %vm148_vm6 = vcmp.eq.f32.partialorder %v111_v15, 0.0 }
   0x8   :  { %vm408_vm13 = vcmp.eq.s32.totalorder %v2185_v2, 2  ;;  %vm432_vm14 = vcmp.eq.s32.totalorder %v2185_v2, 3  ;;  %vm456_vm15 = vcmp.eq.s32.totalorder %v2185_v2, 4  ;;  %vm480_vm0 = vcmp.eq.s32.totalorder %v2185_v2, 5 }
   0x9   :  { %v143_v33 = vor.u32 inf, %v142_v31  ;;  %v145_v34 = vor.u32 inf, %v144_v32  ;;  %vm504_vm4 = vcmp.eq.s32.totalorder %v2185_v2, 6 }
   0xa   :  { %106 = vadd.xlane.f32.xlu0 %v103_v6 }
   0xb   :  { %v147_v36 = vsel %vm146_vm5, nan, %v143_v33  ;;  %v149_v37 = vsel %vm148_vm6, nan, %v145_v34 }
  0x93   :  { %v2194_v7 = vpop.xlane.xlu0 %104 }
  0x94   :  { %v114_v9 = vand.u32 2147483647, %v2194_v7  ;;  %vm139_vm8 = vcmp.eq.f32.partialorder %v2194_v7, 0.0 }
  0x97   :  { %v2196_v8 = vpop.xlane.xlu0 %106 }
  0x98   :  { %v115_v10 = vand.u32 2147483647, %v2196_v8  ;;  %vm140_vm7 = vcmp.eq.f32.partialorder %v2196_v8, 0.0 }
  0x99   :  { %vm2239_vm9 = vmand %vm139_vm8, %vm140_vm7 }
  0x9a   :  { %vm2200_vm1 = vcmp.lt.f32.partialorder %v114_v9, %v115_v10 }
  0x9b   :  { %v118_v12 = vsel %vm2200_vm1, %v2196_v8, %v2194_v7  ;;  %v117_v16 = vsel %vm2200_vm1, %v2194_v7, %v2196_v8 }
  0x9c   :  { %2144 = vrcp.f32 %v118_v12 }
  0xa6   :  { %v2145_v13 = vpop.eup %2144 }
  0xa7   :  { %v2217_v17 = vmul.f32 %v2145_v13, %v117_v16 }
  0xa9   :  { %v121_v18 = vmul.f32 %v2217_v17, %v2194_v7  ;;  %v123_v19 = vmul.f32 %v2217_v17, %v2196_v8  ;;  %v125_v20 = vmul.f32 %v2217_v17, %v110_v14  ;;  %v127_v21 = vmul.f32 %v2217_v17, %v111_v15 }
  0xab   :  { %v122_v22 = vadd.f32 %v121_v18, %v2196_v8  ;;  %v124_v23 = vadd.f32 %v123_v19, %v2194_v7  ;;  %v126_v24 = vadd.f32 %v125_v20, %v111_v15  ;;  %v128_v25 = vadd.f32 %v127_v21, %v110_v14 }
  0xac   :  { %v134_v26 = vsub.f32 %v127_v21, %v110_v14  ;;  %v136_v27 = vsub.f32 %v111_v15, %v125_v20 }
  0xad   :  { %v129_v28 = vsel %vm2200_vm1, %v126_v24, %v128_v25  ;;  %v130_v29 = vsel %vm2200_vm1, %v122_v22, %v124_v23 }
  0xae   :  { %2146 = vrcp.f32 %v130_v29  ;;  %v137_v30 = vsel %vm2200_vm1, %v134_v26, %v136_v27 }
  0xb8   :  { %v2234_v35 = vpop.eup %2146 }
  0xb9   :  { %v132_v38 = vmul.f32 %v2234_v35, %v129_v28  ;;  %v138_v39 = vmul.f32 %v2234_v35, %v137_v30 }
  0xbb   :  { %v150_v41 = vsel %vm2239_vm9, %v147_v36, %v132_v38  ;;  %v151_v42 = vsel %vm2239_vm9, %v149_v37, %v138_v39 }
  0xbc   :  { %153 = vst [vmem:[#allocation4] sm:$0xff] %v150_v41  ;;  %154 = vst [vmem:[#allocation5] sm:$0xff] %v151_v42 }
  0xc3   :  { %v378_v46 = vld [vmem:[#allocation4 + $0x1] ss:$0 sm:$0xff]  ;;  %v402_v57 = vld [vmem:[#allocation4 + $0x2] ss:$0 sm:$0xff]  ;;  %v426_v10 = vld [vmem:[#allocation4 + $0x3] ss:$0 sm:$0xff] }
  0xc4   :  { %v379_v47 = vld [vmem:[#allocation5 + $0x1] ss:$0 sm:$0xff]  ;;  %v380_v48 = vxor.u32 2147483648, %v378_v46  ;;  %v403_v58 = vld [vmem:[#allocation5 + $0x2] ss:$0 sm:$0xff]  ;;  %v404_v61 = vxor.u32 2147483648, %v402_v57 }
  0xc5   :  { %v381_v49 = vxor.u32 2147483648, %v379_v47  ;;  %v405_v62 = vxor.u32 2147483648, %v403_v58  ;;  %v427_v12 = vld [vmem:[#allocation5 + $0x3] ss:$0 sm:$0xff]  ;;  %v428_v15 = vxor.u32 2147483648, %v426_v10 }
  0xc6   :  { %v387_v50 = vmul.f32 %v380_v48, %v354_v45  ;;  %v390_v53 = vmul.f32 0.0, %v380_v48  ;;  %v429_v16 = vxor.u32 2147483648, %v427_v12  ;;  %v450_v26 = vld [vmem:[#allocation4 + $0x4] ss:$0 sm:$0xff]  ;;  %v474_v42 = vld [vmem:[#allocation4 + $0x5] ss:$0 sm:$0xff] }
  0xc7   :  { %v388_v51 = vmul.f32 0.0, %v381_v49  ;;  %v391_v54 = vmul.f32 %v381_v49, %v354_v45  ;;  %v451_v27 = vld [vmem:[#allocation5 + $0x4] ss:$0 sm:$0xff]  ;;  %v452_v30 = vxor.u32 2147483648, %v450_v26  ;;  %v475_v43 = vld [vmem:[#allocation5 + $0x5] ss:$0 sm:$0xff] }
  0xc8   :  { %v453_v31 = vxor.u32 2147483648, %v451_v27  ;;  %v476_v46 = vxor.u32 2147483648, %v474_v42  ;;  %v477_v47 = vxor.u32 2147483648, %v475_v43  ;;  %v499_v57 = vld [vmem:[#allocation5 + $0x6] ss:$0 sm:$0xff]  ;;  %v84_v12 = vld [vmem:[%s2938_s1 + $0x8] sm:$0xff] }
  0xc9   :  { %v389_v52 = vsub.f32 %v387_v50, %v388_v51  ;;  %v392_v55 = vadd.f32 %v391_v54, %v390_v53 }
  0xcb   :  { %394 = vadd.xlane.f32.xlu1 %v389_v52 }
  0xcf   :  { %396 = vadd.xlane.f32.xlu1 %v392_v55 }
 0x158   :  { %v395_v56 = vpop.xlane.xlu1 %394 }
 0x159   :  { %v398_v59 = vsel %vm384_vm12, %v395_v56, %v354_v45  ;;  %v498_v56 = vld [vmem:[#allocation4 + $0x6] ss:$0 sm:$0xff] }
 0x15a   :  { %v415_v1 = vmul.f32 %v405_v62, %v398_v59  ;;  %v411_v4 = vmul.f32 %v404_v61, %v398_v59 }
 0x15c   :  { %v397_v60 = vpop.xlane.xlu1 %396 }
 0x15d   :  { %v399_v63 = vsel %vm384_vm12, %v397_v60, 0.0  ;;  %v500_v60 = vxor.u32 2147483648, %v498_v56 }
 0x15e   :  { %v414_v0 = vmul.f32 %v404_v61, %v399_v63  ;;  %v412_v5 = vmul.f32 %v405_v62, %v399_v63  ;;  %v501_v61 = vxor.u32 2147483648, %v499_v57  ;;  %v2256_v62 = vadd.s32 8, %v2187_v3 }
 0x160   :  { %v416_v6 = vadd.f32 %v415_v1, %v414_v0  ;;  %v413_v9 = vsub.f32 %v411_v4, %v412_v5  ;;  %vm162_vm3 = vcmp.eq.s32.totalorder %v2256_v62, %v2185_v2  ;;  %vm171_vm6 = vcmp.ge.s32.totalorder %v2256_v62, %v2185_v2 }
 0x161   :  { %vm172_vm7 = vmand %vm171_vm6, %vm95_vm2  ;;  %vm669_vm6 = vcmp.eq.s32.totalorder %v2185_v2, 11 }
 0x162   :  { %420 = vadd.xlane.f32.xlu1 %v416_v6  ;;  %418 = vadd.xlane.f32.xlu0 %v413_v9 }
 0x1ef   :  { %v421_v13 = vpop.xlane.xlu1 %420  ;;  %v419_v14 = vpop.xlane.xlu0 %418 }
 0x1f0   :  { %v423_v18 = vsel %vm408_vm13, %v421_v13, %v399_v63  ;;  %v422_v19 = vsel %vm408_vm13, %v419_v14, %v398_v59  ;;  %v40_v13 = vld [vmem:[%s2937_s0 + $0x8] sm:$0xff]  ;;  %v166_v14 = vsel %vm162_vm3, %v84_v12, 0.0 }
 0x1f1   :  { %v438_v20 = vmul.f32 %v428_v15, %v423_v18  ;;  %v439_v21 = vmul.f32 %v429_v16, %v422_v19  ;;  %v435_v22 = vmul.f32 %v428_v15, %v422_v19  ;;  %v436_v23 = vmul.f32 %v429_v16, %v423_v18  ;;  %v522_v16 = vld [vmem:[#allocation4 + $0x7] ss:$0 sm:$0xff] }
 0x1f2   :  { %v165_v15 = vsel %vm162_vm3, %v40_v13, 0.0  ;;  %v173_v42 = vsel %vm172_vm7, %v40_v13, 0.0  ;;  %vm591_vm3 = vcmp.eq.s32.totalorder %v2185_v2, 9 }
 0x1f3   :  { %v440_v24 = vadd.f32 %v439_v21, %v438_v20  ;;  %v437_v25 = vsub.f32 %v435_v22, %v436_v23  ;;  %v524_v21 = vxor.u32 2147483648, %v522_v16  ;;  %vm209_vm10 = vcmp.eq.f32.partialorder %v173_v42, 0.0 }
 0x1f5   :  { %444 = vadd.xlane.f32.xlu1 %v440_v24  ;;  %442 = vadd.xlane.f32.xlu0 %v437_v25 }
 0x282   :  { %v445_v28 = vpop.xlane.xlu1 %444  ;;  %v443_v29 = vpop.xlane.xlu0 %442 }
 0x283   :  { %v447_v32 = vsel %vm432_vm14, %v445_v28, %v423_v18  ;;  %v446_v33 = vsel %vm432_vm14, %v443_v29, %v422_v19  ;;  %v523_v18 = vld [vmem:[#allocation5 + $0x7] ss:$0 sm:$0xff]  ;;  %vm360_vm14 = vcmp.eq.s32.totalorder %v2185_v2, %v2256_v62 }
 0x284   :  { %v462_v34 = vmul.f32 %v452_v30, %v447_v32  ;;  %v463_v36 = vmul.f32 %v453_v31, %v446_v33  ;;  %v459_v37 = vmul.f32 %v452_v30, %v446_v33  ;;  %v460_v38 = vmul.f32 %v453_v31, %v447_v32 }
 0x285   :  { %v525_v22 = vxor.u32 2147483648, %v523_v18  ;;  %v2161_v18 = vmov 0.0  }
 0x286   :  { %v464_v39 = vadd.f32 %v463_v36, %v462_v34  ;;  %v461_v41 = vsub.f32 %v459_v37, %v460_v38 }
 0x288   :  { %468 = vadd.xlane.f32.xlu1 %v464_v39  ;;  %466 = vadd.xlane.f32.xlu0 %v461_v41  ;;  %v174_v41 = vsel %vm172_vm7, %v84_v12, 0.0  ;;  %vm708_vm7 = vcmp.eq.s32.totalorder %v2185_v2, 12 }
 0x289   :  { %v207_v57 = vand.u32 2147483648, %v174_v41  ;;  %vm211_vm8 = vcmp.eq.f32.partialorder %v174_v41, 0.0 }
 0x315   :  { %v469_v44 = vpop.xlane.xlu1 %468  ;;  %v467_v45 = vpop.xlane.xlu0 %466 }
 0x316   :  { %v471_v48 = vsel %vm456_vm15, %v469_v44, %v447_v32  ;;  %v470_v49 = vsel %vm456_vm15, %v467_v45, %v446_v33  ;;  %vm528_vm15 = vcmp.eq.s32.totalorder %v2185_v2, 7 }
 0x317   :  { %v486_v50 = vmul.f32 %v476_v46, %v471_v48  ;;  %v487_v51 = vmul.f32 %v477_v47, %v470_v49  ;;  %v483_v52 = vmul.f32 %v476_v46, %v470_v49  ;;  %v484_v53 = vmul.f32 %v477_v47, %v471_v48 }
 0x319   :  { %v488_v54 = vadd.f32 %v487_v51, %v486_v50  ;;  %v485_v55 = vsub.f32 %v483_v52, %v484_v53 }
 0x31b   :  { %492 = vadd.xlane.f32.xlu1 %v488_v54  ;;  %490 = vadd.xlane.f32.xlu0 %v485_v55 }
 0x3a8   :  { %v493_v58 = vpop.xlane.xlu1 %492  ;;  %v491_v59 = vpop.xlane.xlu0 %490 }
 0x3a9   :  { %v495_v63 = vsel %vm480_vm0, %v493_v58, %v471_v48  ;;  %v494_v0 = vsel %vm480_vm0, %v491_v59, %v470_v49  ;;  %v205_v58 = vand.u32 2147483648, %v173_v42  ;;  %v208_v59 = vor.u32 inf, %v207_v57 }
 0x3aa   :  { %v510_v1 = vmul.f32 %v500_v60, %v495_v63  ;;  %v511_v4 = vmul.f32 %v501_v61, %v494_v0  ;;  %v507_v5 = vmul.f32 %v500_v60, %v494_v0  ;;  %v508_v6 = vmul.f32 %v501_v61, %v495_v63 }
 0x3ab   :  { %v206_v60 = vor.u32 inf, %v205_v58  ;;  %vm552_vm0 = vcmp.eq.s32.totalorder %v2185_v2, 8 }
 0x3ac   :  { %v512_v9 = vadd.f32 %v511_v4, %v510_v1  ;;  %v509_v10 = vsub.f32 %v507_v5, %v508_v6 }
 0x3ae   :  { %516 = vadd.xlane.f32.xlu1 %v512_v9  ;;  %514 = vadd.xlane.f32.xlu0 %v509_v10 }
 0x3b2   :  { %169 = vadd.xlane.f32.xlu1 %v166_v14  ;;  %167 = vadd.xlane.f32.xlu0 %v165_v15 }
 0x43b   :  { %v517_v19 = vpop.xlane.xlu1 %516  ;;  %v515_v20 = vpop.xlane.xlu0 %514 }
 0x43c   :  { %v2267_v23 = vsel %vm504_vm4, %v517_v19, %v495_v63  ;;  %v2269_v24 = vsel %vm504_vm4, %v515_v20, %v494_v0  ;;  %v212_v63 = vsel %vm211_vm8, nan, %v208_v59  ;;  %v210_v0 = vsel %vm209_vm10, nan, %v206_v60 }
 0x43d   :  { %v534_v25 = vmul.f32 %v524_v21, %v2267_v23  ;;  %v535_v26 = vmul.f32 %v525_v22, %v2269_v24  ;;  %v531_v27 = vmul.f32 %v524_v21, %v2269_v24  ;;  %v532_v28 = vmul.f32 %v525_v22, %v2267_v23 }
 0x43e   :  { %v361_v19 = vsel %vm360_vm14, -1.0, %v2161_v18  ;;  %vm630_vm4 = vcmp.eq.s32.totalorder %v2185_v2, 10  ;;  %vm747_vm8 = vcmp.eq.s32.totalorder %v2185_v2, 13 }
 0x43f   :  { %v536_v29 = vadd.f32 %v535_v26, %v534_v25  ;;  %v533_v30 = vsub.f32 %v531_v27, %v532_v28  ;;  %v2275_v31 = vpop.xlane.xlu1 %169  ;;  %v2277_v32 = vpop.xlane.xlu0 %167 }
 0x440   :  { %v178_v33 = vand.u32 2147483647, %v2275_v31  ;;  %v177_v34 = vand.u32 2147483647, %v2277_v32  ;;  %vm203_vm11 = vcmp.eq.f32.partialorder %v2275_v31, 0.0  ;;  %vm202_vm12 = vcmp.eq.f32.partialorder %v2277_v32, 0.0 }
 0x441   :  { %540 = vadd.xlane.f32.xlu1 %v536_v29  ;;  %538 = vadd.xlane.f32.xlu0 %v533_v30  ;;  %vm2317_vm13 = vmand %vm202_vm12, %vm203_vm11  ;;  %vm786_vm11 = vcmp.eq.s32.totalorder %v2185_v2, 14 }
 0x442   :  { %vm2281_vm5 = vcmp.lt.f32.partialorder %v177_v34, %v178_v33 }
 0x443   :  { %v181_v37 = vsel %vm2281_vm5, %v2275_v31, %v2277_v32  ;;  %v180_v38 = vsel %vm2281_vm5, %v2277_v32, %v2275_v31 }
 0x444   :  { %2148 = vrcp.f32 %v181_v37 }
 0x44e   :  { %v2149_v39 = vpop.eup %2148 }
 0x44f   :  { %v2297_v43 = vmul.f32 %v2149_v39, %v180_v38 }
 0x451   :  { %v184_v44 = vmul.f32 %v2297_v43, %v2277_v32  ;;  %v186_v45 = vmul.f32 %v2297_v43, %v2275_v31  ;;  %v188_v46 = vmul.f32 %v2297_v43, %v173_v42  ;;  %v190_v47 = vmul.f32 %v2297_v43, %v174_v41 }
 0x453   :  { %v185_v48 = vadd.f32 %v184_v44, %v2275_v31  ;;  %v187_v49 = vadd.f32 %v186_v45, %v2277_v32  ;;  %v189_v50 = vadd.f32 %v188_v46, %v174_v41  ;;  %v191_v51 = vadd.f32 %v190_v47, %v173_v42 }
 0x454   :  { %v197_v52 = vsub.f32 %v190_v47, %v173_v42  ;;  %v199_v53 = vsub.f32 %v174_v41, %v188_v46 }
 0x455   :  { %v192_v54 = vsel %vm2281_vm5, %v189_v50, %v191_v51  ;;  %v193_v55 = vsel %vm2281_vm5, %v185_v48, %v187_v49 }
 0x456   :  { %2150 = vrcp.f32 %v193_v55  ;;  %v200_v56 = vsel %vm2281_vm5, %v197_v52, %v199_v53 }
 0x460   :  { %v2315_v61 = vpop.eup %2150 }
 0x461   :  { %v195_v4 = vmul.f32 %v2315_v61, %v192_v54  ;;  %v201_v5 = vmul.f32 %v2315_v61, %v200_v56 }
 0x463   :  { %v213_v6 = vsel %vm2317_vm13, %v210_v0, %v195_v4  ;;  %v214_v9 = vsel %vm2317_vm13, %v212_v63, %v201_v5 }
 0x464   :  { %216 = vst [vmem:[#allocation4 + $0x8] sm:$0xff] %v213_v6  ;;  %217 = vst [vmem:[#allocation5 + $0x8] sm:$0xff] %v214_v9 }
 0x46b   :  { %v546_v10 = vld [vmem:[#allocation4 + $0x8] ss:$0 sm:$0xff]  ;;  %v585_v39 = vld [vmem:[#allocation4 + $0x9] ss:$0 sm:$0xff]  ;;  %v624_v4 = vld [vmem:[#allocation4 + $0xa] ss:$0 sm:$0xff] }
 0x46c   :  { %v547_v12 = vld [vmem:[#allocation5 + $0x8] ss:$0 sm:$0xff]  ;;  %v548_v13 = vxor.u32 2147483648, %v546_v10  ;;  %v587_v42 = vxor.u32 2147483648, %v585_v39  ;;  %v625_v5 = vld [vmem:[#allocation5 + $0xa] ss:$0 sm:$0xff] }
 0x46d   :  { %v549_v14 = vxor.u32 2147483648, %v547_v12  ;;  %v626_v10 = vxor.u32 2147483648, %v624_v4  ;;  %v627_v12 = vxor.u32 2147483648, %v625_v5  ;;  %v664_v39 = vld [vmem:[#allocation5 + $0xb] ss:$0 sm:$0xff] }
 0x46e   :  { %v573_v28 = vmul.f32 0.0, %v548_v13  ;;  %v570_v33 = vmul.f32 %v548_v13, %v361_v19  ;;  %v703_v4 = vld [vmem:[#allocation5 + $0xc] ss:$0 sm:$0xff] }
 0x46f   :  { %v574_v29 = vmul.f32 %v549_v14, %v361_v19  ;;  %v571_v34 = vmul.f32 0.0, %v549_v14 }
 0x471   :  { %v575_v37 = vadd.f32 %v574_v29, %v573_v28  ;;  %v572_v38 = vsub.f32 %v570_v33, %v571_v34 }
 0x4ce   :  { %v541_v15 = vpop.xlane.xlu1 %540  ;;  %v539_v16 = vpop.xlane.xlu0 %538 }
 0x4cf   :  { %v543_v20 = vsel %vm528_vm15, %v541_v15, %v2267_v23  ;;  %v542_v21 = vsel %vm528_vm15, %v539_v16, %v2269_v24  ;;  %v586_v23 = vld [vmem:[#allocation5 + $0x9] ss:$0 sm:$0xff] }
 0x4d0   :  { %v558_v22 = vmul.f32 %v548_v13, %v543_v20  ;;  %v559_v25 = vmul.f32 %v549_v14, %v542_v21  ;;  %v555_v26 = vmul.f32 %v548_v13, %v542_v21  ;;  %v556_v27 = vmul.f32 %v549_v14, %v543_v20 }
 0x4d1   :  { %v588_v44 = vxor.u32 2147483648, %v586_v23 }
 0x4d2   :  { %v560_v62 = vadd.f32 %v559_v25, %v558_v22  ;;  %v557_v30 = vsub.f32 %v555_v26, %v556_v27 }
 0x4d4   :  { %564 = vadd.xlane.f32.xlu1 %v560_v62  ;;  %562 = vadd.xlane.f32.xlu0 %v557_v30 }
 0x4d8   :  { %579 = vadd.xlane.f32.xlu1 %v575_v37  ;;  %577 = vadd.xlane.f32.xlu0 %v572_v38  ;;  %v663_v38 = vld [vmem:[#allocation4 + $0xb] ss:$0 sm:$0xff] }
 0x561   :  { %v565_v24 = vpop.xlane.xlu1 %564  ;;  %v563_v41 = vpop.xlane.xlu0 %562 }
 0x562   :  { %v567_v45 = vsel %vm552_vm0, %v565_v24, %v543_v20  ;;  %v566_v46 = vsel %vm552_vm0, %v563_v41, %v542_v21  ;;  %v665_v41 = vxor.u32 2147483648, %v663_v38  ;;  %v742_v38 = vld [vmem:[#allocation5 + $0xd] ss:$0 sm:$0xff] }
 0x563   :  { %v597_v47 = vmul.f32 %v587_v42, %v567_v45  ;;  %v598_v48 = vmul.f32 %v588_v44, %v566_v46  ;;  %v594_v49 = vmul.f32 %v587_v42, %v566_v46  ;;  %v595_v50 = vmul.f32 %v588_v44, %v567_v45 }
 0x565   :  { %v580_v51 = vpop.xlane.xlu1 %579  ;;  %v578_v52 = vpop.xlane.xlu0 %577  ;;  %v599_v53 = vadd.f32 %v598_v48, %v597_v47  ;;  %v596_v54 = vsub.f32 %v594_v49, %v595_v50 }
 0x566   :  { %v582_v55 = vsel %vm552_vm0, %v580_v51, 0.0  ;;  %v581_v56 = vsel %vm552_vm0, %v578_v52, %v361_v19 }
 0x567   :  { %603 = vadd.xlane.f32.xlu1 %v599_v53  ;;  %601 = vadd.xlane.f32.xlu0 %v596_v54  ;;  %v612_v57 = vmul.f32 %v587_v42, %v582_v55  ;;  %v613_v58 = vmul.f32 %v588_v44, %v581_v56  ;;  %v609_v59 = vmul.f32 %v587_v42, %v581_v56  ;;  %v666_v42 = vxor.u32 2147483648, %v664_v39 }
 0x568   :  { %v610_v60 = vmul.f32 %v588_v44, %v582_v55 }
 0x569   :  { %v614_v63 = vadd.f32 %v613_v58, %v612_v57 }
 0x56a   :  { %v611_v0 = vsub.f32 %v609_v59, %v610_v60 }
 0x56b   :  { %618 = vadd.xlane.f32.xlu1 %v614_v63 }
 0x56c   :  { %616 = vadd.xlane.f32.xlu0 %v611_v0  ;;  %v702_v0 = vld [vmem:[#allocation4 + $0xc] ss:$0 sm:$0xff] }
 0x5f4   :  { %v604_v6 = vpop.xlane.xlu1 %603  ;;  %v602_v9 = vpop.xlane.xlu0 %601 }
 0x5f5   :  { %v606_v13 = vsel %vm591_vm3, %v604_v6, %v567_v45  ;;  %v605_v14 = vsel %vm591_vm3, %v602_v9, %v566_v46  ;;  %v704_v9 = vxor.u32 2147483648, %v702_v0  ;;  %v781_v0 = vld [vmem:[#allocation5 + $0xe] ss:$0 sm:$0xff] }
 0x5f6   :  { %v636_v15 = vmul.f32 %v626_v10, %v606_v13  ;;  %v637_v16 = vmul.f32 %v627_v12, %v605_v14  ;;  %v633_v19 = vmul.f32 %v626_v10, %v605_v14  ;;  %v634_v20 = vmul.f32 %v627_v12, %v606_v13 }
 0x5f8   :  { %v619_v21 = vpop.xlane.xlu1 %618  ;;  %v638_v22 = vadd.f32 %v637_v16, %v636_v15  ;;  %v635_v25 = vsub.f32 %v633_v19, %v634_v20 }
 0x5f9   :  { %v621_v26 = vsel %vm591_vm3, %v619_v21, %v582_v55  ;;  %v617_v27 = vpop.xlane.xlu0 %616 }
 0x5fa   :  { %v620_v28 = vsel %vm591_vm3, %v617_v27, %v581_v56  ;;  %642 = vadd.xlane.f32.xlu1 %v638_v22  ;;  %640 = vadd.xlane.f32.xlu0 %v635_v25  ;;  %v651_v29 = vmul.f32 %v626_v10, %v621_v26  ;;  %v649_v62 = vmul.f32 %v627_v12, %v621_v26 }
 0x5fb   :  { %v652_v30 = vmul.f32 %v627_v12, %v620_v28  ;;  %v648_v33 = vmul.f32 %v626_v10, %v620_v28  ;;  %v705_v10 = vxor.u32 2147483648, %v703_v4 }
 0x5fd   :  { %v653_v34 = vadd.f32 %v652_v30, %v651_v29  ;;  %v650_v37 = vsub.f32 %v648_v33, %v649_v62 }
 0x5ff   :  { %657 = vadd.xlane.f32.xlu1 %v653_v34  ;;  %655 = vadd.xlane.f32.xlu0 %v650_v37  ;;  %v741_v37 = vld [vmem:[#allocation4 + $0xd] ss:$0 sm:$0xff] }
 0x687   :  { %v643_v23 = vpop.xlane.xlu1 %642  ;;  %v641_v24 = vpop.xlane.xlu0 %640 }
 0x688   :  { %v645_v44 = vsel %vm630_vm4, %v643_v23, %v606_v13  ;;  %v644_v45 = vsel %vm630_vm4, %v641_v24, %v605_v14  ;;  %v743_v24 = vxor.u32 2147483648, %v741_v37  ;;  %v86_v37 = vld [vmem:[%s2938_s1 + $0x10] sm:$0xff] }
 0x689   :  { %v675_v46 = vmul.f32 %v665_v41, %v645_v44  ;;  %v676_v47 = vmul.f32 %v666_v42, %v644_v45  ;;  %v672_v48 = vmul.f32 %v665_v41, %v644_v45  ;;  %v673_v49 = vmul.f32 %v666_v42, %v645_v44 }
 0x68b   :  { %v677_v50 = vadd.f32 %v676_v47, %v675_v46  ;;  %v674_v51 = vsub.f32 %v672_v48, %v673_v49 }
 0x68c   :  { %v658_v52 = vpop.xlane.xlu1 %657  ;;  %v656_v53 = vpop.xlane.xlu0 %655 }
 0x68d   :  { %v660_v54 = vsel %vm630_vm4, %v658_v52, %v621_v26  ;;  %v659_v55 = vsel %vm630_vm4, %v656_v53, %v620_v28  ;;  %681 = vadd.xlane.f32.xlu1 %v677_v50  ;;  %679 = vadd.xlane.f32.xlu0 %v674_v51 }
 0x68e   :  { %v690_v56 = vmul.f32 %v665_v41, %v660_v54  ;;  %v691_v57 = vmul.f32 %v666_v42, %v659_v55  ;;  %v687_v58 = vmul.f32 %v665_v41, %v659_v55  ;;  %v688_v59 = vmul.f32 %v666_v42, %v660_v54 }
 0x68f   :  { %v744_v41 = vxor.u32 2147483648, %v742_v38  ;;  %v42_v38 = vld [vmem:[%s2937_s0 + $0x10] sm:$0xff] }
 0x690   :  { %v692_v60 = vadd.f32 %v691_v57, %v690_v56  ;;  %v689_v63 = vsub.f32 %v687_v58, %v688_v59 }
 0x692   :  { %696 = vadd.xlane.f32.xlu1 %v692_v60  ;;  %694 = vadd.xlane.f32.xlu0 %v689_v63  ;;  %v780_v63 = vld [vmem:[#allocation4 + $0xe] ss:$0 sm:$0xff] }
 0x71a   :  { %v682_v5 = vpop.xlane.xlu1 %681  ;;  %v680_v6 = vpop.xlane.xlu0 %679 }
 0x71b   :  { %v684_v12 = vsel %vm669_vm6, %v682_v5, %v645_v44  ;;  %v683_v13 = vsel %vm669_vm6, %v680_v6, %v644_v45  ;;  %v782_v6 = vxor.u32 2147483648, %v780_v63 }
 0x71c   :  { %v714_v14 = vmul.f32 %v704_v9, %v684_v12  ;;  %v715_v15 = vmul.f32 %v705_v10, %v683_v13  ;;  %v711_v16 = vmul.f32 %v704_v9, %v683_v13  ;;  %v712_v19 = vmul.f32 %v705_v10, %v684_v12 }
 0x71e   :  { %v716_v20 = vadd.f32 %v715_v15, %v714_v14  ;;  %v713_v21 = vsub.f32 %v711_v16, %v712_v19 }
 0x71f   :  { %v697_v22 = vpop.xlane.xlu1 %696  ;;  %v695_v25 = vpop.xlane.xlu0 %694 }
 0x720   :  { %v699_v26 = vsel %vm669_vm6, %v697_v22, %v660_v54  ;;  %v698_v27 = vsel %vm669_vm6, %v695_v25, %v659_v55  ;;  %720 = vadd.xlane.f32.xlu1 %v716_v20  ;;  %718 = vadd.xlane.f32.xlu0 %v713_v21  ;;  %v2384_v25 = vadd.s32 16, %v2187_v3 }
 0x721   :  { %v729_v28 = vmul.f32 %v704_v9, %v699_v26  ;;  %v730_v29 = vmul.f32 %v705_v10, %v698_v27  ;;  %v726_v62 = vmul.f32 %v704_v9, %v698_v27  ;;  %v727_v30 = vmul.f32 %v705_v10, %v699_v26 }
 0x722   :  { %v783_v9 = vxor.u32 2147483648, %v781_v0  ;;  %vm225_vm10 = vcmp.eq.s32.totalorder %v2384_v25, %v2185_v2  ;;  %vm234_vm14 = vcmp.ge.s32.totalorder %v2384_v25, %v2185_v2 }
 0x723   :  { %v731_v33 = vadd.f32 %v730_v29, %v729_v28  ;;  %v728_v34 = vsub.f32 %v726_v62, %v727_v30  ;;  %vm235_vm15 = vmand %vm234_vm14, %vm95_vm2  ;;  %vm918_vm14 = vcmp.eq.s32.totalorder %v2185_v2, 17 }
 0x725   :  { %735 = vadd.xlane.f32.xlu1 %v731_v33  ;;  %733 = vadd.xlane.f32.xlu0 %v728_v34 }
 0x7ad   :  { %v721_v39 = vpop.xlane.xlu1 %720  ;;  %v719_v23 = vpop.xlane.xlu0 %718 }
 0x7ae   :  { %v723_v42 = vsel %vm708_vm7, %v721_v39, %v684_v12  ;;  %v722_v44 = vsel %vm708_vm7, %v719_v23, %v683_v13  ;;  %v229_v39 = vsel %vm225_vm10, %v86_v37, 0.0  ;;  %v228_v23 = vsel %vm225_vm10, %v42_v38, 0.0 }
 0x7af   :  { %v753_v45 = vmul.f32 %v743_v24, %v723_v42  ;;  %v754_v46 = vmul.f32 %v744_v41, %v722_v44  ;;  %v750_v47 = vmul.f32 %v743_v24, %v722_v44  ;;  %v751_v48 = vmul.f32 %v744_v41, %v723_v42 }
 0x7b0   :  { %vm367_vm10 = vcmp.eq.s32.totalorder %v2185_v2, %v2384_v25 }
 0x7b1   :  { %v755_v49 = vadd.f32 %v754_v46, %v753_v45  ;;  %v752_v50 = vsub.f32 %v750_v47, %v751_v48  ;;  %v368_v25 = vsel %vm367_vm10, -1.0, %v2161_v18 }
 0x7b2   :  { %v736_v51 = vpop.xlane.xlu1 %735  ;;  %v734_v52 = vpop.xlane.xlu0 %733 }
 0x7b3   :  { %v738_v53 = vsel %vm708_vm7, %v736_v51, %v699_v26  ;;  %v737_v54 = vsel %vm708_vm7, %v734_v52, %v698_v27  ;;  %759 = vadd.xlane.f32.xlu1 %v755_v49  ;;  %757 = vadd.xlane.f32.xlu0 %v752_v50 }
 0x7b4   :  { %v768_v55 = vmul.f32 %v743_v24, %v738_v53  ;;  %v769_v56 = vmul.f32 %v744_v41, %v737_v54  ;;  %v765_v57 = vmul.f32 %v743_v24, %v737_v54  ;;  %v766_v58 = vmul.f32 %v744_v41, %v738_v53  ;;  %v819_v24 = vld [vmem:[#allocation4 + $0xf] ss:$0 sm:$0xff] }
 0x7b5   :  { %v820_v41 = vld [vmem:[#allocation5 + $0xf] ss:$0 sm:$0xff]  ;;  %v821_v45 = vxor.u32 2147483648, %v819_v24 }
 0x7b6   :  { %v770_v59 = vadd.f32 %v769_v56, %v768_v55  ;;  %v767_v60 = vsub.f32 %v765_v57, %v766_v58  ;;  %v822_v46 = vxor.u32 2147483648, %v820_v41 }
 0x7b8   :  { %774 = vadd.xlane.f32.xlu1 %v770_v59  ;;  %772 = vadd.xlane.f32.xlu0 %v767_v60 }
 0x840   :  { %v760_v4 = vpop.xlane.xlu1 %759  ;;  %v758_v5 = vpop.xlane.xlu0 %757 }
 0x841   :  { %v762_v10 = vsel %vm747_vm8, %v760_v4, %v723_v42  ;;  %v761_v12 = vsel %vm747_vm8, %v758_v5, %v722_v44 }
 0x842   :  { %v792_v13 = vmul.f32 %v782_v6, %v762_v10  ;;  %v793_v14 = vmul.f32 %v783_v9, %v761_v12  ;;  %v789_v15 = vmul.f32 %v782_v6, %v761_v12  ;;  %v790_v16 = vmul.f32 %v783_v9, %v762_v10 }
 0x844   :  { %v794_v19 = vadd.f32 %v793_v14, %v792_v13  ;;  %v791_v20 = vsub.f32 %v789_v15, %v790_v16 }
 0x845   :  { %v775_v21 = vpop.xlane.xlu1 %774  ;;  %v773_v22 = vpop.xlane.xlu0 %772 }
 0x846   :  { %v777_v26 = vsel %vm747_vm8, %v775_v21, %v738_v53  ;;  %v776_v27 = vsel %vm747_vm8, %v773_v22, %v737_v54  ;;  %798 = vadd.xlane.f32.xlu1 %v794_v19  ;;  %796 = vadd.xlane.f32.xlu0 %v791_v20  ;;  %v237_v19 = vsel %vm235_vm15, %v86_v37, 0.0  ;;  %v236_v20 = vsel %vm235_vm15, %v42_v38, 0.0 }
 0x847   :  { %v807_v28 = vmul.f32 %v782_v6, %v777_v26  ;;  %v808_v29 = vmul.f32 %v783_v9, %v776_v27  ;;  %v804_v62 = vmul.f32 %v782_v6, %v776_v27  ;;  %v805_v30 = vmul.f32 %v783_v9, %v777_v26 }
 0x848   :  { %v270_v24 = vand.u32 2147483648, %v237_v19  ;;  %v268_v41 = vand.u32 2147483648, %v236_v20  ;;  %vm274_vm0 = vcmp.eq.f32.partialorder %v237_v19, 0.0  ;;  %vm272_vm3 = vcmp.eq.f32.partialorder %v236_v20, 0.0 }
 0x849   :  { %v809_v33 = vadd.f32 %v808_v29, %v807_v28  ;;  %v806_v34 = vsub.f32 %v804_v62, %v805_v30  ;;  %vm825_vm8 = vcmp.eq.s32.totalorder %v2185_v2, 15  ;;  %vm972_vm15 = vcmp.eq.s32.totalorder %v2185_v2, 18 }
 0x84b   :  { %813 = vadd.xlane.f32.xlu1 %v809_v33  ;;  %811 = vadd.xlane.f32.xlu0 %v806_v34 }
 0x84f   :  { %232 = vadd.xlane.f32.xlu1 %v229_v39  ;;  %230 = vadd.xlane.f32.xlu0 %v228_v23 }
 0x8d3   :  { %v799_v42 = vpop.xlane.xlu1 %798  ;;  %v797_v44 = vpop.xlane.xlu0 %796 }
 0x8d4   :  { %v2401_v47 = vsel %vm786_vm11, %v799_v42, %v762_v10  ;;  %v2405_v48 = vsel %vm786_vm11, %v797_v44, %v761_v12  ;;  %v271_v42 = vor.u32 inf, %v270_v24  ;;  %v269_v44 = vor.u32 inf, %v268_v41 }
 0x8d5   :  { %v831_v49 = vmul.f32 %v821_v45, %v2401_v47  ;;  %v832_v50 = vmul.f32 %v822_v46, %v2405_v48  ;;  %v828_v51 = vmul.f32 %v821_v45, %v2405_v48  ;;  %v829_v52 = vmul.f32 %v822_v46, %v2401_v47 }
 0x8d7   :  { %v833_v53 = vadd.f32 %v832_v50, %v831_v49  ;;  %v830_v54 = vsub.f32 %v828_v51, %v829_v52  ;;  %v273_v49 = vsel %vm272_vm3, nan, %v269_v44  ;;  %vm1080_vm3 = vcmp.eq.s32.totalorder %v2185_v2, 20 }
 0x8d8   :  { %v814_v55 = vpop.xlane.xlu1 %813  ;;  %v812_v56 = vpop.xlane.xlu0 %811 }
 0x8d9   :  { %v2413_v57 = vsel %vm786_vm11, %v814_v55, %v777_v26  ;;  %v2417_v58 = vsel %vm786_vm11, %v812_v56, %v776_v27  ;;  %837 = vadd.xlane.f32.xlu1 %v833_v53  ;;  %835 = vadd.xlane.f32.xlu0 %v830_v54  ;;  %vm864_vm11 = vcmp.eq.s32.totalorder %v2185_v2, 16 }
 0x8da   :  { %v846_v59 = vmul.f32 %v821_v45, %v2413_v57  ;;  %v847_v60 = vmul.f32 %v822_v46, %v2417_v58  ;;  %v843_v63 = vmul.f32 %v821_v45, %v2417_v58  ;;  %v844_v0 = vmul.f32 %v822_v46, %v2413_v57 }
 0x8db   :  { %v275_v46 = vsel %vm274_vm0, nan, %v271_v42  ;;  %vm1026_vm0 = vcmp.eq.s32.totalorder %v2185_v2, 19 }
 0x8dc   :  { %v848_v4 = vadd.f32 %v847_v60, %v846_v59  ;;  %v845_v5 = vsub.f32 %v843_v63, %v844_v0  ;;  %v2423_v6 = vpop.xlane.xlu1 %232  ;;  %v2425_v9 = vpop.xlane.xlu0 %230 }
 0x8dd   :  { %v241_v10 = vand.u32 2147483647, %v2423_v6  ;;  %v240_v12 = vand.u32 2147483647, %v2425_v9  ;;  %vm266_vm4 = vcmp.eq.f32.partialorder %v2423_v6, 0.0  ;;  %vm265_vm6 = vcmp.eq.f32.partialorder %v2425_v9, 0.0 }
 0x8de   :  { %852 = vadd.xlane.f32.xlu1 %v848_v4  ;;  %850 = vadd.xlane.f32.xlu0 %v845_v5  ;;  %vm2465_vm7 = vmand %vm265_vm6, %vm266_vm4  ;;  %vm1134_vm4 = vcmp.eq.s32.totalorder %v2185_v2, 21 }
 0x8df   :  { %vm2429_vm12 = vcmp.lt.f32.partialorder %v240_v12, %v241_v10 }
 0x8e0   :  { %v244_v14 = vsel %vm2429_vm12, %v2423_v6, %v2425_v9  ;;  %v243_v15 = vsel %vm2429_vm12, %v2425_v9, %v2423_v6 }
 0x8e1   :  { %2152 = vrcp.f32 %v244_v14 }
 0x8eb   :  { %v2153_v16 = vpop.eup %2152 }
 0x8ec   :  { %v2445_v21 = vmul.f32 %v2153_v16, %v243_v15 }
 0x8ee   :  { %v247_v22 = vmul.f32 %v2445_v21, %v2425_v9  ;;  %v249_v26 = vmul.f32 %v2445_v21, %v2423_v6  ;;  %v251_v27 = vmul.f32 %v2445_v21, %v236_v20  ;;  %v253_v28 = vmul.f32 %v2445_v21, %v237_v19 }
 0x8f0   :  { %v248_v29 = vadd.f32 %v247_v22, %v2423_v6  ;;  %v250_v62 = vadd.f32 %v249_v26, %v2425_v9  ;;  %v252_v30 = vadd.f32 %v251_v27, %v237_v19  ;;  %v254_v33 = vadd.f32 %v253_v28, %v236_v20 }
 0x8f1   :  { %v260_v34 = vsub.f32 %v253_v28, %v236_v20  ;;  %v262_v37 = vsub.f32 %v237_v19, %v251_v27 }
 0x8f2   :  { %v255_v38 = vsel %vm2429_vm12, %v252_v30, %v254_v33  ;;  %v256_v39 = vsel %vm2429_vm12, %v248_v29, %v250_v62 }
 0x8f3   :  { %2154 = vrcp.f32 %v256_v39  ;;  %v263_v23 = vsel %vm2429_vm12, %v260_v34, %v262_v37 }
 0x8fd   :  { %v2463_v45 = vpop.eup %2154 }
 0x8fe   :  { %v258_v51 = vmul.f32 %v2463_v45, %v255_v38  ;;  %v264_v52 = vmul.f32 %v2463_v45, %v263_v23 }
 0x900   :  { %v276_v53 = vsel %vm2465_vm7, %v273_v49, %v258_v51  ;;  %v277_v54 = vsel %vm2465_vm7, %v275_v46, %v264_v52 }
 0x901   :  { %279 = vst [vmem:[#allocation4 + $0x10] sm:$0xff] %v276_v53  ;;  %280 = vst [vmem:[#allocation5 + $0x10] sm:$0xff] %v277_v54 }
 0x908   :  { %v858_v59 = vld [vmem:[#allocation4 + $0x10] ss:$0 sm:$0xff]  ;;  %v912_v39 = vld [vmem:[#allocation4 + $0x11] ss:$0 sm:$0xff] }
 0x909   :  { %v859_v60 = vld [vmem:[#allocation5 + $0x10] ss:$0 sm:$0xff]  ;;  %v860_v10 = vxor.u32 2147483648, %v858_v59  ;;  %v913_v23 = vld [vmem:[#allocation5 + $0x11] ss:$0 sm:$0xff]  ;;  %v914_v42 = vxor.u32 2147483648, %v912_v39 }
 0x90a   :  { %v861_v12 = vxor.u32 2147483648, %v859_v60  ;;  %v915_v44 = vxor.u32 2147483648, %v913_v23 }
 0x90b   :  { %v900_v62 = vmul.f32 0.0, %v860_v10  ;;  %v897_v34 = vmul.f32 %v860_v10, %v368_v25 }
 0x90c   :  { %v901_v30 = vmul.f32 %v861_v12, %v368_v25 }
 0x90e   :  { %v902_v37 = vadd.f32 %v901_v30, %v900_v62  ;;  %v966_v62 = vld [vmem:[#allocation4 + $0x12] ss:$0 sm:$0xff] }
 0x90f   :  { %v967_v30 = vld [vmem:[#allocation5 + $0x12] ss:$0 sm:$0xff] }
 0x966   :  { %v838_v55 = vpop.xlane.xlu1 %837  ;;  %v836_v56 = vpop.xlane.xlu0 %835 }
 0x967   :  { %v840_v63 = vsel %vm825_vm8, %v838_v55, %v2401_v47  ;;  %v839_v0 = vsel %vm825_vm8, %v836_v56, %v2405_v48 }
 0x968   :  { %v870_v26 = vmul.f32 %v860_v10, %v840_v63  ;;  %v871_v27 = vmul.f32 %v861_v12, %v839_v0  ;;  %v867_v29 = vmul.f32 %v860_v10, %v839_v0  ;;  %v868_v48 = vmul.f32 %v861_v12, %v840_v63 }
 0x96a   :  { %v872_v33 = vadd.f32 %v871_v27, %v870_v26 }
 0x96b   :  { %v853_v4 = vpop.xlane.xlu1 %852  ;;  %v851_v5 = vpop.xlane.xlu0 %850 }
 0x96c   :  { %v855_v14 = vsel %vm825_vm8, %v853_v4, %v2413_v57  ;;  %v854_v15 = vsel %vm825_vm8, %v851_v5, %v2417_v58  ;;  %v869_v57 = vsub.f32 %v867_v29, %v868_v48  ;;  %v898_v58 = vmul.f32 0.0, %v861_v12 }
 0x96d   :  { %v885_v16 = vmul.f32 %v860_v10, %v855_v14  ;;  %v886_v19 = vmul.f32 %v861_v12, %v854_v15  ;;  %v882_v20 = vmul.f32 %v860_v10, %v854_v15  ;;  %v883_v22 = vmul.f32 %v861_v12, %v855_v14 }
 0x96e   :  { %v899_v38 = vsub.f32 %v897_v34, %v898_v58  ;;  %v968_v34 = vxor.u32 2147483648, %v966_v62  ;;  %v969_v58 = vxor.u32 2147483648, %v967_v30  ;;  %vm1188_vm8 = vcmp.eq.s32.totalorder %v2185_v2, 22 }
 0x96f   :  { %v887_v28 = vadd.f32 %v886_v19, %v885_v16  ;;  %v884_v47 = vsub.f32 %v882_v20, %v883_v22 }
 0x971   :  { %891 = vadd.xlane.f32.xlu1 %v887_v28  ;;  %889 = vadd.xlane.f32.xlu0 %v884_v47 }
 0x975   :  { %876 = vadd.xlane.f32.xlu1 %v872_v33  ;;  %874 = vadd.xlane.f32.xlu0 %v869_v57 }
 0x979   :  { %906 = vadd.xlane.f32.xlu1 %v902_v37  ;;  %904 = vadd.xlane.f32.xlu0 %v899_v38 }
 0x9fe   :  { %v892_v24 = vpop.xlane.xlu1 %891  ;;  %v890_v41 = vpop.xlane.xlu0 %889 }
 0x9ff   :  { %v894_v46 = vsel %vm864_vm11, %v892_v24, %v855_v14  ;;  %v893_v49 = vsel %vm864_vm11, %v890_v41, %v854_v15 }
 0xa00   :  { %v939_v51 = vmul.f32 %v914_v42, %v894_v46  ;;  %v940_v52 = vmul.f32 %v915_v44, %v893_v49  ;;  %v936_v53 = vmul.f32 %v914_v42, %v893_v49  ;;  %v937_v54 = vmul.f32 %v915_v44, %v894_v46 }
 0xa02   :  { %v877_v55 = vpop.xlane.xlu1 %876  ;;  %v875_v56 = vpop.xlane.xlu0 %874  ;;  %v941_v59 = vadd.f32 %v940_v52, %v939_v51  ;;  %v938_v60 = vsub.f32 %v936_v53, %v937_v54 }
 0xa03   :  { %v879_v4 = vsel %vm864_vm11, %v877_v55, %v840_v63  ;;  %v878_v5 = vsel %vm864_vm11, %v875_v56, %v839_v0 }
 0xa04   :  { %945 = vadd.xlane.f32.xlu1 %v941_v59  ;;  %943 = vadd.xlane.f32.xlu0 %v938_v60  ;;  %v924_v10 = vmul.f32 %v914_v42, %v879_v4  ;;  %v925_v12 = vmul.f32 %v915_v44, %v878_v5  ;;  %v921_v14 = vmul.f32 %v914_v42, %v878_v5 }
 0xa05   :  { %v922_v15 = vmul.f32 %v915_v44, %v879_v4 }
 0xa06   :  { %v907_v16 = vpop.xlane.xlu1 %906  ;;  %v905_v19 = vpop.xlane.xlu0 %904  ;;  %v926_v20 = vadd.f32 %v925_v12, %v924_v10 }
 0xa07   :  { %v909_v22 = vsel %vm864_vm11, %v907_v16, 0.0  ;;  %v908_v26 = vsel %vm864_vm11, %v905_v19, %v368_v25  ;;  %v923_v27 = vsub.f32 %v921_v14, %v922_v15 }
 0xa08   :  { %930 = vadd.xlane.f32.xlu1 %v926_v20  ;;  %v954_v63 = vmul.f32 %v914_v42, %v909_v22  ;;  %v955_v28 = vmul.f32 %v915_v44, %v908_v26  ;;  %v951_v0 = vmul.f32 %v914_v42, %v908_v26  ;;  %v952_v47 = vmul.f32 %v915_v44, %v909_v22 }
 0xa09   :  { %928 = vadd.xlane.f32.xlu0 %v923_v27  ;;  %v1020_v27 = vld [vmem:[#allocation4 + $0x13] ss:$0 sm:$0xff] }
 0xa0a   :  { %v956_v29 = vadd.f32 %v955_v28, %v954_v63  ;;  %v953_v48 = vsub.f32 %v951_v0, %v952_v47  ;;  %v1021_v63 = vld [vmem:[#allocation5 + $0x13] ss:$0 sm:$0xff]  ;;  %v1022_v0 = vxor.u32 2147483648, %v1020_v27 }
 0xa0b   :  { %v1023_v47 = vxor.u32 2147483648, %v1021_v63 }
 0xa0c   :  { %960 = vadd.xlane.f32.xlu1 %v956_v29 }
 0xa0d   :  { %958 = vadd.xlane.f32.xlu0 %v953_v48 }
 0xa91   :  { %v946_v33 = vpop.xlane.xlu1 %945  ;;  %v944_v57 = vpop.xlane.xlu0 %943 }
 0xa92   :  { %v948_v25 = vsel %vm918_vm14, %v946_v33, %v894_v46  ;;  %v947_v37 = vsel %vm918_vm14, %v944_v57, %v893_v49 }
 0xa93   :  { %v993_v38 = vmul.f32 %v968_v34, %v948_v25  ;;  %v994_v39 = vmul.f32 %v969_v58, %v947_v37  ;;  %v990_v23 = vmul.f32 %v968_v34, %v947_v37  ;;  %v991_v24 = vmul.f32 %v969_v58, %v948_v25 }
 0xa95   :  { %v931_v41 = vpop.xlane.xlu1 %930  ;;  %v995_v42 = vadd.f32 %v994_v39, %v993_v38  ;;  %v992_v44 = vsub.f32 %v990_v23, %v991_v24 }
 0xa96   :  { %v933_v51 = vsel %vm918_vm14, %v931_v41, %v879_v4  ;;  %v929_v52 = vpop.xlane.xlu0 %928 }
 0xa97   :  { %v932_v53 = vsel %vm918_vm14, %v929_v52, %v878_v5  ;;  %999 = vadd.xlane.f32.xlu1 %v995_v42  ;;  %997 = vadd.xlane.f32.xlu0 %v992_v44  ;;  %v978_v46 = vmul.f32 %v968_v34, %v933_v51  ;;  %v976_v54 = vmul.f32 %v969_v58, %v933_v51 }
 0xa98   :  { %v979_v55 = vmul.f32 %v969_v58, %v932_v53  ;;  %v975_v49 = vmul.f32 %v968_v34, %v932_v53 }
 0xa99   :  { %v961_v56 = vpop.xlane.xlu1 %960 }
 0xa9a   :  { %v963_v59 = vsel %vm918_vm14, %v961_v56, %v909_v22  ;;  %v959_v60 = vpop.xlane.xlu0 %958  ;;  %v980_v10 = vadd.f32 %v979_v55, %v978_v46  ;;  %v977_v12 = vsub.f32 %v975_v49, %v976_v54 }
 0xa9b   :  { %v962_v4 = vsel %vm918_vm14, %v959_v60, %v908_v26  ;;  %v1008_v14 = vmul.f32 %v968_v34, %v963_v59  ;;  %v1006_v15 = vmul.f32 %v969_v58, %v963_v59 }
 0xa9c   :  { %984 = vadd.xlane.f32.xlu1 %v980_v10  ;;  %982 = vadd.xlane.f32.xlu0 %v977_v12  ;;  %v1009_v5 = vmul.f32 %v969_v58, %v962_v4  ;;  %v1005_v16 = vmul.f32 %v968_v34, %v962_v4  ;;  %v1074_v12 = vld [vmem:[#allocation4 + $0x14] ss:$0 sm:$0xff] }
 0xa9e   :  { %v1010_v19 = vadd.f32 %v1009_v5, %v1008_v14  ;;  %v1007_v20 = vsub.f32 %v1005_v16, %v1006_v15  ;;  %v1075_v14 = vld [vmem:[#allocation5 + $0x14] ss:$0 sm:$0xff] }
 0xa9f   :  { %v1077_v16 = vxor.u32 2147483648, %v1075_v14 }
 0xaa0   :  { %1014 = vadd.xlane.f32.xlu1 %v1010_v19  ;;  %1012 = vadd.xlane.f32.xlu0 %v1007_v20 }
 0xb24   :  { %v1000_v22 = vpop.xlane.xlu1 %999  ;;  %v998_v28 = vpop.xlane.xlu0 %997 }
 0xb25   :  { %v1002_v26 = vsel %vm972_vm15, %v1000_v22, %v948_v25  ;;  %v1001_v29 = vsel %vm972_vm15, %v998_v28, %v947_v37 }
 0xb26   :  { %v1047_v48 = vmul.f32 %v1022_v0, %v1002_v26  ;;  %v1048_v62 = vmul.f32 %v1023_v47, %v1001_v29  ;;  %v1044_v30 = vmul.f32 %v1022_v0, %v1001_v29  ;;  %v1045_v33 = vmul.f32 %v1023_v47, %v1002_v26 }
 0xb28   :  { %v1049_v57 = vadd.f32 %v1048_v62, %v1047_v48  ;;  %v1046_v34 = vsub.f32 %v1044_v30, %v1045_v33 }
 0xb29   :  { %v985_v58 = vpop.xlane.xlu1 %984  ;;  %v983_v38 = vpop.xlane.xlu0 %982 }
 0xb2a   :  { %v987_v39 = vsel %vm972_vm15, %v985_v58, %v933_v51  ;;  %v986_v23 = vsel %vm972_vm15, %v983_v38, %v932_v53  ;;  %1053 = vadd.xlane.f32.xlu1 %v1049_v57  ;;  %1051 = vadd.xlane.f32.xlu0 %v1046_v34 }
 0xb2b   :  { %v1032_v25 = vmul.f32 %v1022_v0, %v987_v39  ;;  %v1033_v24 = vmul.f32 %v1023_v47, %v986_v23  ;;  %v1029_v41 = vmul.f32 %v1022_v0, %v986_v23  ;;  %v1030_v37 = vmul.f32 %v1023_v47, %v987_v39 }
 0xb2d   :  { %v1015_v42 = vpop.xlane.xlu1 %1014  ;;  %v1013_v44 = vpop.xlane.xlu0 %1012  ;;  %v1034_v52 = vadd.f32 %v1033_v24, %v1032_v25  ;;  %v1031_v46 = vsub.f32 %v1029_v41, %v1030_v37 }
 0xb2e   :  { %v1017_v54 = vsel %vm972_vm15, %v1015_v42, %v963_v59  ;;  %v1016_v55 = vsel %vm972_vm15, %v1013_v44, %v962_v4  ;;  %v1076_v59 = vxor.u32 2147483648, %v1074_v12 }
 0xb2f   :  { %1038 = vadd.xlane.f32.xlu1 %v1034_v52  ;;  %1036 = vadd.xlane.f32.xlu0 %v1031_v46  ;;  %v1062_v51 = vmul.f32 %v1022_v0, %v1017_v54  ;;  %v1063_v53 = vmul.f32 %v1023_v47, %v1016_v55  ;;  %v1059_v49 = vmul.f32 %v1022_v0, %v1016_v55  ;;  %v1128_v46 = vld [vmem:[#allocation4 + $0x15] ss:$0 sm:$0xff] }
 0xb30   :  { %v1060_v56 = vmul.f32 %v1023_v47, %v1017_v54 }
 0xb31   :  { %v1064_v60 = vadd.f32 %v1063_v53, %v1062_v51  ;;  %v1129_v51 = vld [vmem:[#allocation5 + $0x15] ss:$0 sm:$0xff] }
 0xb32   :  { %v1061_v10 = vsub.f32 %v1059_v49, %v1060_v56  ;;  %v1130_v49 = vxor.u32 2147483648, %v1128_v46  ;;  %v1131_v56 = vxor.u32 2147483648, %v1129_v51 }
 0xb33   :  { %1068 = vadd.xlane.f32.xlu1 %v1064_v60 }
 0xb34   :  { %1066 = vadd.xlane.f32.xlu0 %v1061_v10 }
 0xbb7   :  { %v1054_v15 = vpop.xlane.xlu1 %1053  ;;  %v1052_v5 = vpop.xlane.xlu0 %1051 }
 0xbb8   :  { %v1056_v4 = vsel %vm1026_vm0, %v1054_v15, %v1002_v26  ;;  %v1055_v19 = vsel %vm1026_vm0, %v1052_v5, %v1001_v29 }
 0xbb9   :  { %v1101_v20 = vmul.f32 %v1076_v59, %v1056_v4  ;;  %v1102_v27 = vmul.f32 %v1077_v16, %v1055_v19  ;;  %v1098_v63 = vmul.f32 %v1076_v59, %v1055_v19  ;;  %v1099_v22 = vmul.f32 %v1077_v16, %v1056_v4 }
 0xbbb   :  { %v1103_v28 = vadd.f32 %v1102_v27, %v1101_v20  ;;  %v1100_v0 = vsub.f32 %v1098_v63, %v1099_v22 }
 0xbbc   :  { %v1039_v47 = vpop.xlane.xlu1 %1038  ;;  %v1037_v48 = vpop.xlane.xlu0 %1036 }
 0xbbd   :  { %v1041_v62 = vsel %vm1026_vm0, %v1039_v47, %v987_v39  ;;  %v1040_v30 = vsel %vm1026_vm0, %v1037_v48, %v986_v23  ;;  %1107 = vadd.xlane.f32.xlu1 %v1103_v28  ;;  %1105 = vadd.xlane.f32.xlu0 %v1100_v0 }
 0xbbe   :  { %v1086_v26 = vmul.f32 %v1076_v59, %v1041_v62  ;;  %v1087_v33 = vmul.f32 %v1077_v16, %v1040_v30  ;;  %v1083_v57 = vmul.f32 %v1076_v59, %v1040_v30  ;;  %v1084_v29 = vmul.f32 %v1077_v16, %v1041_v62 }
 0xbc0   :  { %v1069_v34 = vpop.xlane.xlu1 %1068  ;;  %v1088_v58 = vadd.f32 %v1087_v33, %v1086_v26  ;;  %v1085_v38 = vsub.f32 %v1083_v57, %v1084_v29 }
 0xbc1   :  { %v1071_v25 = vsel %vm1026_vm0, %v1069_v34, %v1017_v54  ;;  %v1067_v24 = vpop.xlane.xlu0 %1066 }
 0xbc2   :  { %v1070_v41 = vsel %vm1026_vm0, %v1067_v24, %v1016_v55  ;;  %1092 = vadd.xlane.f32.xlu1 %v1088_v58  ;;  %1090 = vadd.xlane.f32.xlu0 %v1085_v38  ;;  %v1116_v39 = vmul.f32 %v1076_v59, %v1071_v25  ;;  %v1114_v23 = vmul.f32 %v1077_v16, %v1071_v25  ;;  %v1182_v24 = vld [vmem:[#allocation4 + $0x16] ss:$0 sm:$0xff] }
 0xbc3   :  { %v1117_v37 = vmul.f32 %v1077_v16, %v1070_v41  ;;  %v1113_v42 = vmul.f32 %v1076_v59, %v1070_v41 }
 0xbc5   :  { %v1118_v44 = vadd.f32 %v1117_v37, %v1116_v39  ;;  %v1115_v52 = vsub.f32 %v1113_v42, %v1114_v23  ;;  %v1183_v39 = vld [vmem:[#allocation5 + $0x16] ss:$0 sm:$0xff] }
 0xbc6   :  { %v1185_v42 = vxor.u32 2147483648, %v1183_v39 }
 0xbc7   :  { %1122 = vadd.xlane.f32.xlu1 %v1118_v44  ;;  %1120 = vadd.xlane.f32.xlu0 %v1115_v52 }
 0xc4a   :  { %v1108_v53 = vpop.xlane.xlu1 %1107  ;;  %v1106_v54 = vpop.xlane.xlu0 %1105 }
 0xc4b   :  { %v1110_v55 = vsel %vm1080_vm3, %v1108_v53, %v1056_v4  ;;  %v1109_v60 = vsel %vm1080_vm3, %v1106_v54, %v1055_v19 }
 0xc4c   :  { %v1155_v10 = vmul.f32 %v1130_v49, %v1110_v55  ;;  %v1156_v12 = vmul.f32 %v1131_v56, %v1109_v60  ;;  %v1152_v14 = vmul.f32 %v1130_v49, %v1109_v60  ;;  %v1153_v15 = vmul.f32 %v1131_v56, %v1110_v55 }
 0xc4e   :  { %v1157_v5 = vadd.f32 %v1156_v12, %v1155_v10  ;;  %v1154_v59 = vsub.f32 %v1152_v14, %v1153_v15 }
 0xc4f   :  { %v1093_v16 = vpop.xlane.xlu1 %1092  ;;  %v1091_v20 = vpop.xlane.xlu0 %1090 }
 0xc50   :  { %v1095_v27 = vsel %vm1080_vm3, %v1093_v16, %v1041_v62  ;;  %v1094_v63 = vsel %vm1080_vm3, %v1091_v20, %v1040_v30  ;;  %1161 = vadd.xlane.f32.xlu1 %v1157_v5  ;;  %1159 = vadd.xlane.f32.xlu0 %v1154_v59 }
 0xc51   :  { %v1140_v4 = vmul.f32 %v1130_v49, %v1095_v27  ;;  %v1141_v22 = vmul.f32 %v1131_v56, %v1094_v63  ;;  %v1137_v28 = vmul.f32 %v1130_v49, %v1094_v63  ;;  %v1138_v19 = vmul.f32 %v1131_v56, %v1095_v27 }
 0xc53   :  { %v1142_v0 = vadd.f32 %v1141_v22, %v1140_v4  ;;  %v1139_v47 = vsub.f32 %v1137_v28, %v1138_v19  ;;  %v2558_v22 = vadd.s32 24, %v2187_v3  ;;  %v44_v3 = vld [vmem:[%s2937_s0 + $0x18] sm:$0xff] }
 0xc54   :  { %v1123_v48 = vpop.xlane.xlu1 %1122  ;;  %v1121_v26 = vpop.xlane.xlu0 %1120 }
 0xc55   :  { %v1125_v33 = vsel %vm1080_vm3, %v1123_v48, %v1071_v25  ;;  %v1124_v57 = vsel %vm1080_vm3, %v1121_v26, %v1070_v41  ;;  %1146 = vadd.xlane.f32.xlu1 %v1142_v0  ;;  %1144 = vadd.xlane.f32.xlu0 %v1139_v47  ;;  %v1184_v25 = vxor.u32 2147483648, %v1182_v24  ;;  %vm288_vm6 = vcmp.eq.s32.totalorder %v2558_v22, %v2185_v2 }
 0xc56   :  { %v1170_v62 = vmul.f32 %v1130_v49, %v1125_v33  ;;  %v1171_v30 = vmul.f32 %v1131_v56, %v1124_v57  ;;  %v1167_v29 = vmul.f32 %v1130_v49, %v1124_v57  ;;  %v1168_v34 = vmul.f32 %v1131_v56, %v1125_v33 }
 0xc57   :  { %vm297_vm11 = vcmp.ge.s32.totalorder %v2558_v22, %v2185_v2 }
 0xc58   :  { %v1172_v58 = vadd.f32 %v1171_v30, %v1170_v62  ;;  %v1169_v38 = vsub.f32 %v1167_v29, %v1168_v34  ;;  %v88_v62 = vld [vmem:[%s2938_s1 + $0x18] sm:$0xff]  ;;  %v1236_v30 = vld [vmem:[#allocation4 + $0x17] ss:$0 sm:$0xff]  ;;  %vm298_vm14 = vmand %vm297_vm11, %vm95_vm2  ;;  %vm1296_vm11 = vcmp.eq.s32.totalorder %v2185_v2, 24 }
 0xc59   :  { %v1237_v29 = vld [vmem:[#allocation5 + $0x17] ss:$0 sm:$0xff] }
 0xc5a   :  { %1176 = vadd.xlane.f32.xlu1 %v1172_v58  ;;  %1174 = vadd.xlane.f32.xlu0 %v1169_v38  ;;  %v1238_v38 = vxor.u32 2147483648, %v1236_v30  ;;  %v1239_v24 = vxor.u32 2147483648, %v1237_v29  ;;  %v300_v29 = vsel %vm298_vm14, %v88_v62, 0.0 }
 0xc5b   :  { %vm337_vm2 = vcmp.eq.f32.partialorder %v300_v29, 0.0 }
 0xcdd   :  { %v1162_v23 = vpop.xlane.xlu1 %1161  ;;  %v1160_v37 = vpop.xlane.xlu0 %1159 }
 0xcde   :  { %v1164_v41 = vsel %vm1134_vm4, %v1162_v23, %v1110_v55  ;;  %v1163_v44 = vsel %vm1134_vm4, %v1160_v37, %v1109_v60 }
 0xcdf   :  { %v1209_v52 = vmul.f32 %v1184_v25, %v1164_v41  ;;  %v1210_v46 = vmul.f32 %v1185_v42, %v1163_v44  ;;  %v1206_v51 = vmul.f32 %v1184_v25, %v1163_v44  ;;  %v1207_v53 = vmul.f32 %v1185_v42, %v1164_v41 }
 0xce1   :  { %v1211_v54 = vadd.f32 %v1210_v46, %v1209_v52  ;;  %v1208_v49 = vsub.f32 %v1206_v51, %v1207_v53 }
 0xce2   :  { %v1147_v56 = vpop.xlane.xlu1 %1146  ;;  %v1145_v10 = vpop.xlane.xlu0 %1144 }
 0xce3   :  { %v1149_v12 = vsel %vm1134_vm4, %v1147_v56, %v1095_v27  ;;  %v1148_v14 = vsel %vm1134_vm4, %v1145_v10, %v1094_v63  ;;  %1215 = vadd.xlane.f32.xlu1 %v1211_v54  ;;  %1213 = vadd.xlane.f32.xlu0 %v1208_v49 }
 0xce4   :  { %v1194_v55 = vmul.f32 %v1184_v25, %v1149_v12  ;;  %v1195_v15 = vmul.f32 %v1185_v42, %v1148_v14  ;;  %v1191_v5 = vmul.f32 %v1184_v25, %v1148_v14  ;;  %v1192_v60 = vmul.f32 %v1185_v42, %v1149_v12 }
 0xce6   :  { %v1196_v59 = vadd.f32 %v1195_v15, %v1194_v55  ;;  %v1193_v16 = vsub.f32 %v1191_v5, %v1192_v60 }
 0xce7   :  { %v1177_v20 = vpop.xlane.xlu1 %1176  ;;  %v1175_v4 = vpop.xlane.xlu0 %1174 }
 0xce8   :  { %v1179_v28 = vsel %vm1134_vm4, %v1177_v20, %v1125_v33  ;;  %v1178_v27 = vsel %vm1134_vm4, %v1175_v4, %v1124_v57  ;;  %1200 = vadd.xlane.f32.xlu1 %v1196_v59  ;;  %1198 = vadd.xlane.f32.xlu0 %v1193_v16  ;;  %v292_v33 = vsel %vm288_vm6, %v88_v62, 0.0  ;;  %v291_v57 = vsel %vm288_vm6, %v44_v3, 0.0 }
 0xce9   :  { %v1224_v63 = vmul.f32 %v1184_v25, %v1179_v28  ;;  %v1225_v19 = vmul.f32 %v1185_v42, %v1178_v27  ;;  %v1221_v0 = vmul.f32 %v1184_v25, %v1178_v27  ;;  %v1222_v47 = vmul.f32 %v1185_v42, %v1179_v28 }
 0xcea   :  { %vm1242_vm6 = vcmp.eq.s32.totalorder %v2185_v2, 23 }
 0xceb   :  { %v1226_v48 = vadd.f32 %v1225_v19, %v1224_v63  ;;  %v1223_v26 = vsub.f32 %v1221_v0, %v1222_v47 }
 0xced   :  { %1230 = vadd.xlane.f32.xlu1 %v1226_v48  ;;  %1228 = vadd.xlane.f32.xlu0 %v1223_v26 }
 0xcf1   :  { %295 = vadd.xlane.f32.xlu1 %v292_v33  ;;  %293 = vadd.xlane.f32.xlu0 %v291_v57 }
 0xd70   :  { %v1216_v34 = vpop.xlane.xlu1 %1215  ;;  %v1214_v58 = vpop.xlane.xlu0 %1213 }
 0xd71   :  { %v2575_v39 = vsel %vm1188_vm8, %v1216_v34, %v1164_v41  ;;  %v2579_v23 = vsel %vm1188_vm8, %v1214_v58, %v1163_v44  ;;  %v299_v34 = vsel %vm298_vm14, %v44_v3, 0.0  ;;  %vm1365_vm14 = vcmp.eq.s32.totalorder %v2185_v2, 25 }
 0xd72   :  { %v1263_v37 = vmul.f32 %v1238_v38, %v2575_v39  ;;  %v1264_v25 = vmul.f32 %v1239_v24, %v2579_v23  ;;  %v1260_v42 = vmul.f32 %v1238_v38, %v2579_v23  ;;  %v1261_v52 = vmul.f32 %v1239_v24, %v2575_v39 }
 0xd73   :  { %vm335_vm15 = vcmp.eq.f32.partialorder %v299_v34, 0.0 }
 0xd74   :  { %v1265_v46 = vadd.f32 %v1264_v25, %v1263_v37  ;;  %v1262_v51 = vsub.f32 %v1260_v42, %v1261_v52 }
 0xd75   :  { %v1201_v53 = vpop.xlane.xlu1 %1200  ;;  %v1199_v54 = vpop.xlane.xlu0 %1198 }
 0xd76   :  { %v2587_v41 = vsel %vm1188_vm8, %v1201_v53, %v1149_v12  ;;  %v2591_v44 = vsel %vm1188_vm8, %v1199_v54, %v1148_v14  ;;  %1269 = vadd.xlane.f32.xlu1 %v1265_v46  ;;  %1267 = vadd.xlane.f32.xlu0 %v1262_v51 }
 0xd77   :  { %v1246_v49 = vmul.f32 %v1239_v24, %v2587_v41  ;;  %v1248_v56 = vmul.f32 %v1238_v38, %v2587_v41  ;;  %v1245_v10 = vmul.f32 %v1238_v38, %v2591_v44  ;;  %v1249_v55 = vmul.f32 %v1239_v24, %v2591_v44 }
 0xd79   :  { %v1250_v15 = vadd.f32 %v1249_v55, %v1248_v56  ;;  %v1247_v5 = vsub.f32 %v1245_v10, %v1246_v49  ;;  %v333_v56 = vand.u32 2147483648, %v300_v29  ;;  %v331_v10 = vand.u32 2147483648, %v299_v34 }
 0xd7a   :  { %v1231_v60 = vpop.xlane.xlu1 %1230  ;;  %v1229_v59 = vpop.xlane.xlu0 %1228 }
 0xd7b   :  { %v2599_v12 = vsel %vm1188_vm8, %v1231_v60, %v1179_v28  ;;  %v2603_v14 = vsel %vm1188_vm8, %v1229_v59, %v1178_v27  ;;  %1254 = vadd.xlane.f32.xlu1 %v1250_v15  ;;  %1252 = vadd.xlane.f32.xlu0 %v1247_v5  ;;  %v334_v55 = vor.u32 inf, %v333_v56  ;;  %v332_v15 = vor.u32 inf, %v331_v10 }
 0xd7c   :  { %v1276_v16 = vmul.f32 %v1239_v24, %v2599_v12  ;;  %v1278_v20 = vmul.f32 %v1238_v38, %v2599_v12  ;;  %v1275_v4 = vmul.f32 %v1238_v38, %v2603_v14  ;;  %v1279_v63 = vmul.f32 %v1239_v24, %v2603_v14 }
 0xd7d   :  { %v338_v60 = vsel %vm337_vm2, nan, %v334_v55  ;;  %v336_v59 = vsel %vm335_vm15, nan, %v332_v15  ;;  %vm374_vm8 = vcmp.eq.s32.totalorder %v2185_v2, %v2558_v22  ;;  %vm1434_vm2 = vcmp.eq.s32.totalorder %v2185_v2, 26 }
 0xd7e   :  { %v1280_v19 = vadd.f32 %v1279_v63, %v1278_v20  ;;  %v1277_v0 = vsub.f32 %v1275_v4, %v1276_v16  ;;  %v2609_v47 = vpop.xlane.xlu1 %295  ;;  %v2611_v28 = vpop.xlane.xlu0 %293  ;;  %v375_v22 = vsel %vm374_vm8, -1.0, %v2161_v18  ;;  %vm1503_vm15 = vcmp.eq.s32.totalorder %v2185_v2, 27 }
 0xd7f   :  { %v304_v48 = vand.u32 2147483647, %v2609_v47  ;;  %v303_v27 = vand.u32 2147483647, %v2611_v28  ;;  %vm329_vm0 = vcmp.eq.f32.partialorder %v2609_v47, 0.0  ;;  %vm328_vm3 = vcmp.eq.f32.partialorder %v2611_v28, 0.0 }
 0xd80   :  { %1284 = vadd.xlane.f32.xlu1 %v1280_v19  ;;  %1282 = vadd.xlane.f32.xlu0 %v1277_v0  ;;  %vm2651_vm4 = vmand %vm328_vm3, %vm329_vm0  ;;  %vm1572_vm0 = vcmp.eq.s32.totalorder %v2185_v2, 28  ;;  %vm1641_vm3 = vcmp.eq.s32.totalorder %v2185_v2, 29  ;;  %vm1779_vm8 = vcmp.eq.s32.totalorder %v2185_v2, 31 }
 0xd81   :  { %vm2615_vm10 = vcmp.lt.f32.partialorder %v303_v27, %v304_v48 }
 0xd82   :  { %v307_v33 = vsel %vm2615_vm10, %v2609_v47, %v2611_v28  ;;  %v306_v57 = vsel %vm2615_vm10, %v2611_v28, %v2609_v47 }
 0xd83   :  { %2156 = vrcp.f32 %v307_v33 }
 0xd8d   :  { %v2157_v30 = vpop.eup %2156 }
 0xd8e   :  { %v2631_v58 = vmul.f32 %v2157_v30, %v306_v57 }
 0xd90   :  { %v310_v38 = vmul.f32 %v2631_v58, %v2611_v28  ;;  %v312_v24 = vmul.f32 %v2631_v58, %v2609_v47  ;;  %v314_v37 = vmul.f32 %v2631_v58, %v299_v34  ;;  %v316_v25 = vmul.f32 %v2631_v58, %v300_v29 }
 0xd92   :  { %v311_v42 = vadd.f32 %v310_v38, %v2609_v47  ;;  %v313_v52 = vadd.f32 %v312_v24, %v2611_v28  ;;  %v315_v46 = vadd.f32 %v314_v37, %v300_v29  ;;  %v317_v51 = vadd.f32 %v316_v25, %v299_v34 }
 0xd93   :  { %v323_v62 = vsub.f32 %v316_v25, %v299_v34  ;;  %v325_v3 = vsub.f32 %v300_v29, %v314_v37 }
 0xd94   :  { %v318_v53 = vsel %vm2615_vm10, %v315_v46, %v317_v51  ;;  %v319_v54 = vsel %vm2615_vm10, %v311_v42, %v313_v52 }
 0xd95   :  { %2158 = vrcp.f32 %v319_v54  ;;  %v326_v49 = vsel %vm2615_vm10, %v323_v62, %v325_v3 }
 0xd9f   :  { %v2649_v5 = vpop.eup %2158 }
 0xda0   :  { %v321_v20 = vmul.f32 %v2649_v5, %v318_v53  ;;  %v327_v4 = vmul.f32 %v2649_v5, %v326_v49 }
 0xda2   :  { %v339_v63 = vsel %vm2651_vm4, %v336_v59, %v321_v20  ;;  %v340_v19 = vsel %vm2651_vm4, %v338_v60, %v327_v4 }
 0xda3   :  { %342 = vst [vmem:[#allocation4 + $0x18] sm:$0xff] %v339_v63  ;;  %343 = vst [vmem:[#allocation5 + $0x18] sm:$0xff] %v340_v19 }
 0xdaa   :  { %v1290_v0 = vld [vmem:[#allocation4 + $0x18] ss:$0 sm:$0xff]  ;;  %v1360_v18 = vld [vmem:[#allocation5 + $0x19] ss:$0 sm:$0xff] }
 0xdab   :  { %v1291_v48 = vld [vmem:[#allocation5 + $0x18] ss:$0 sm:$0xff]  ;;  %v1292_v33 = vxor.u32 2147483648, %v1290_v0 }
 0xdac   :  { %v1293_v57 = vxor.u32 2147483648, %v1291_v48 }
 0xdad   :  { %v1347_v4 = vmul.f32 0.0, %v1292_v33  ;;  %v1344_v0 = vmul.f32 %v1292_v33, %v375_v22 }
 0xe03   :  { %v1270_v27 = vpop.xlane.xlu1 %1269  ;;  %v1268_v30 = vpop.xlane.xlu0 %1267 }
 0xe04   :  { %v1272_v29 = vsel %vm1242_vm6, %v1270_v27, %v2575_v39  ;;  %v1271_v34 = vsel %vm1242_vm6, %v1268_v30, %v2579_v23  ;;  %v1359_v30 = vld [vmem:[#allocation4 + $0x19] ss:$0 sm:$0xff] }
 0xe05   :  { %v1315_v38 = vmul.f32 %v1293_v57, %v1272_v29  ;;  %v1317_v24 = vmul.f32 %v1292_v33, %v1272_v29  ;;  %v1314_v37 = vmul.f32 %v1292_v33, %v1271_v34  ;;  %v1318_v25 = vmul.f32 %v1293_v57, %v1271_v34 }
 0xe07   :  { %v1319_v42 = vadd.f32 %v1318_v25, %v1317_v24  ;;  %v1316_v52 = vsub.f32 %v1314_v37, %v1315_v38  ;;  %v1361_v38 = vxor.u32 2147483648, %v1359_v30  ;;  %v1362_v24 = vxor.u32 2147483648, %v1360_v18 }
 0xe08   :  { %v1255_v46 = vpop.xlane.xlu1 %1254  ;;  %v1253_v51 = vpop.xlane.xlu0 %1252 }
 0xe09   :  { %1323 = vadd.xlane.f32.xlu1 %v1319_v42  ;;  %1321 = vadd.xlane.f32.xlu0 %v1316_v52  ;;  %v1257_v62 = vsel %vm1242_vm6, %v1255_v46, %v2587_v41  ;;  %v1256_v23 = vsel %vm1242_vm6, %v1253_v51, %v2591_v44 }
 0xe0a   :  { %v1300_v55 = vmul.f32 %v1293_v57, %v1257_v62  ;;  %v1302_v15 = vmul.f32 %v1292_v33, %v1257_v62  ;;  %v1299_v60 = vmul.f32 %v1292_v33, %v1256_v23  ;;  %v1303_v59 = vmul.f32 %v1293_v57, %v1256_v23 }
 0xe0c   :  { %v1304_v63 = vadd.f32 %v1303_v59, %v1302_v15  ;;  %v1301_v19 = vsub.f32 %v1299_v60, %v1300_v55 }
 0xe0d   :  { %v1285_v3 = vpop.xlane.xlu1 %1284  ;;  %v1283_v39 = vpop.xlane.xlu0 %1282 }
 0xe0e   :  { %v1287_v53 = vsel %vm1242_vm6, %v1285_v3, %v2599_v12  ;;  %v1286_v54 = vsel %vm1242_vm6, %v1283_v39, %v2603_v14  ;;  %v1348_v12 = vmul.f32 %v1293_v57, %v375_v22  ;;  %v1345_v14 = vmul.f32 0.0, %v1293_v57 }
 0xe0f   :  { %v1330_v49 = vmul.f32 %v1293_v57, %v1287_v53  ;;  %v1332_v56 = vmul.f32 %v1292_v33, %v1287_v53  ;;  %v1329_v41 = vmul.f32 %v1292_v33, %v1286_v54  ;;  %v1333_v10 = vmul.f32 %v1293_v57, %v1286_v54 }
 0xe10   :  { %v1349_v48 = vadd.f32 %v1348_v12, %v1347_v4  ;;  %v1346_v27 = vsub.f32 %v1344_v0, %v1345_v14  ;;  %vm1710_vm6 = vcmp.eq.s32.totalorder %v2185_v2, 30 }
 0xe11   :  { %v1334_v20 = vadd.f32 %v1333_v10, %v1332_v56  ;;  %v1331_v44 = vsub.f32 %v1329_v41, %v1330_v49 }
 0xe13   :  { %1338 = vadd.xlane.f32.xlu1 %v1334_v20  ;;  %1336 = vadd.xlane.f32.xlu0 %v1331_v44 }
 0xe17   :  { %1308 = vadd.xlane.f32.xlu1 %v1304_v63  ;;  %1306 = vadd.xlane.f32.xlu0 %v1301_v19 }
 0xe1b   :  { %1353 = vadd.xlane.f32.xlu1 %v1349_v48  ;;  %1351 = vadd.xlane.f32.xlu0 %v1346_v27 }
 0xe96   :  { %v1324_v37 = vpop.xlane.xlu1 %1323  ;;  %v1322_v25 = vpop.xlane.xlu0 %1321 }
 0xe97   :  { %v1326_v42 = vsel %vm1296_vm11, %v1324_v37, %v1272_v29  ;;  %v1325_v33 = vsel %vm1296_vm11, %v1322_v25, %v1271_v34 }
 0xe98   :  { %v1384_v57 = vmul.f32 %v1362_v24, %v1326_v42  ;;  %v1386_v52 = vmul.f32 %v1361_v38, %v1326_v42  ;;  %v1383_v46 = vmul.f32 %v1361_v38, %v1325_v33  ;;  %v1387_v51 = vmul.f32 %v1362_v24, %v1325_v33 }
 0xe9a   :  { %v1388_v3 = vadd.f32 %v1387_v51, %v1386_v52  ;;  %v1385_v39 = vsub.f32 %v1383_v46, %v1384_v57  ;;  %v1428_v46 = vld [vmem:[#allocation4 + $0x1a] ss:$0 sm:$0xff] }
 0xe9b   :  { %v1429_v51 = vld [vmem:[#allocation5 + $0x1a] ss:$0 sm:$0xff] }
 0xe9c   :  { %1392 = vadd.xlane.f32.xlu1 %v1388_v3  ;;  %1390 = vadd.xlane.f32.xlu0 %v1385_v39  ;;  %v1430_v3 = vxor.u32 2147483648, %v1428_v46  ;;  %v1431_v39 = vxor.u32 2147483648, %v1429_v51 }
 0xea0   :  { %v1339_v49 = vpop.xlane.xlu1 %1338  ;;  %v1337_v56 = vpop.xlane.xlu0 %1336 }
 0xea1   :  { %v1341_v41 = vsel %vm1296_vm11, %v1339_v49, %v1287_v53  ;;  %v1340_v10 = vsel %vm1296_vm11, %v1337_v56, %v1286_v54 }
 0xea2   :  { %v1399_v29 = vmul.f32 %v1362_v24, %v1341_v41  ;;  %v1401_v55 = vmul.f32 %v1361_v38, %v1341_v41  ;;  %v1398_v15 = vmul.f32 %v1361_v38, %v1340_v10  ;;  %v1402_v34 = vmul.f32 %v1362_v24, %v1340_v10 }
 0xea4   :  { %v1309_v60 = vpop.xlane.xlu1 %1308  ;;  %v1307_v59 = vpop.xlane.xlu0 %1306  ;;  %v1403_v20 = vadd.f32 %v1402_v34, %v1401_v55  ;;  %v1400_v44 = vsub.f32 %v1398_v15, %v1399_v29 }
 0xea5   :  { %v1311_v4 = vsel %vm1296_vm11, %v1309_v60, %v1257_v62  ;;  %v1310_v12 = vsel %vm1296_vm11, %v1307_v59, %v1256_v23 }
 0xea6   :  { %v1369_v63 = vmul.f32 %v1362_v24, %v1311_v4  ;;  %v1371_v19 = vmul.f32 %v1361_v38, %v1311_v4  ;;  %v1368_v53 = vmul.f32 %v1361_v38, %v1310_v12  ;;  %v1372_v0 = vmul.f32 %v1362_v24, %v1310_v12  ;;  %1407 = vadd.xlane.f32.xlu1 %v1403_v20 }
 0xea7   :  { %1405 = vadd.xlane.f32.xlu0 %v1400_v44 }
 0xea8   :  { %v1354_v54 = vpop.xlane.xlu1 %1353  ;;  %v1352_v14 = vpop.xlane.xlu0 %1351  ;;  %v1373_v48 = vadd.f32 %v1372_v0, %v1371_v19  ;;  %v1370_v27 = vsub.f32 %v1368_v53, %v1369_v63 }
 0xea9   :  { %v1356_v30 = vsel %vm1296_vm11, %v1354_v54, 0.0  ;;  %v1355_v18 = vsel %vm1296_vm11, %v1352_v14, %v375_v22  ;;  %vm1929_vm11 = vweird.f32 %v2277_v32 }
 0xeaa   :  { %v1414_v62 = vmul.f32 %v1362_v24, %v1356_v30  ;;  %v1416_v37 = vmul.f32 %v1361_v38, %v1356_v30  ;;  %v1413_v25 = vmul.f32 %v1361_v38, %v1355_v18  ;;  %v1417_v23 = vmul.f32 %v1362_v24, %v1355_v18  ;;  %1377 = vadd.xlane.f32.xlu1 %v1373_v48 }
 0xeab   :  { %1375 = vadd.xlane.f32.xlu0 %v1370_v27 }
 0xeac   :  { %v1418_v57 = vadd.f32 %v1417_v23, %v1416_v37  ;;  %v1415_v52 = vsub.f32 %v1413_v25, %v1414_v62 }
 0xeae   :  { %1422 = vadd.xlane.f32.xlu1 %v1418_v57 }
 0xeaf   :  { %1420 = vadd.xlane.f32.xlu0 %v1415_v52 }
 0xf29   :  { %v1393_v49 = vpop.xlane.xlu1 %1392  ;;  %v1391_v56 = vpop.xlane.xlu0 %1390 }
 0xf2a   :  { %v1395_v22 = vsel %vm1365_vm14, %v1393_v49, %v1326_v42  ;;  %v1394_v38 = vsel %vm1365_vm14, %v1391_v56, %v1325_v33 }
 0xf2b   :  { %v1453_v24 = vmul.f32 %v1431_v39, %v1395_v22  ;;  %v1455_v29 = vmul.f32 %v1430_v3, %v1395_v22  ;;  %v1452_v55 = vmul.f32 %v1430_v3, %v1394_v38  ;;  %v1456_v15 = vmul.f32 %v1431_v39, %v1394_v38 }
 0xf2d   :  { %v1457_v34 = vadd.f32 %v1456_v15, %v1455_v29  ;;  %v1454_v60 = vsub.f32 %v1452_v55, %v1453_v24  ;;  %v1497_v15 = vld [vmem:[#allocation4 + $0x1b] ss:$0 sm:$0xff] }
 0xf2f   :  { %1461 = vadd.xlane.f32.xlu1 %v1457_v34  ;;  %1459 = vadd.xlane.f32.xlu0 %v1454_v60  ;;  %v1498_v34 = vld [vmem:[#allocation5 + $0x1b] ss:$0 sm:$0xff] }
 0xf30   :  { %v1500_v60 = vxor.u32 2147483648, %v1498_v34 }
 0xf33   :  { %v1408_v59 = vpop.xlane.xlu1 %1407 }
 0xf34   :  { %v1410_v20 = vsel %vm1365_vm14, %v1408_v59, %v1341_v41  ;;  %v1406_v44 = vpop.xlane.xlu0 %1405 }
 0xf35   :  { %v1468_v63 = vmul.f32 %v1431_v39, %v1410_v20  ;;  %v1470_v19 = vmul.f32 %v1430_v3, %v1410_v20  ;;  %v1409_v42 = vsel %vm1365_vm14, %v1406_v44, %v1340_v10 }
 0xf36   :  { %v1467_v53 = vmul.f32 %v1430_v3, %v1409_v42  ;;  %v1471_v33 = vmul.f32 %v1431_v39, %v1409_v42 }
 0xf37   :  { %v1378_v0 = vpop.xlane.xlu1 %1377 }
 0xf38   :  { %v1380_v54 = vsel %vm1365_vm14, %v1378_v0, %v1311_v4  ;;  %v1376_v14 = vpop.xlane.xlu0 %1375  ;;  %v1472_v48 = vadd.f32 %v1471_v33, %v1470_v19  ;;  %v1469_v27 = vsub.f32 %v1467_v53, %v1468_v63 }
 0xf39   :  { %v1438_v62 = vmul.f32 %v1431_v39, %v1380_v54  ;;  %v1440_v37 = vmul.f32 %v1430_v3, %v1380_v54  ;;  %v1379_v41 = vsel %vm1365_vm14, %v1376_v14, %v1310_v12 }
 0xf3a   :  { %v1437_v25 = vmul.f32 %v1430_v3, %v1379_v41  ;;  %v1441_v23 = vmul.f32 %v1431_v39, %v1379_v41  ;;  %1476 = vadd.xlane.f32.xlu1 %v1472_v48  ;;  %1474 = vadd.xlane.f32.xlu0 %v1469_v27 }
 0xf3b   :  { %v1423_v57 = vpop.xlane.xlu1 %1422 }
 0xf3c   :  { %v1425_v10 = vsel %vm1365_vm14, %v1423_v57, %v1356_v30  ;;  %v1421_v52 = vpop.xlane.xlu0 %1420  ;;  %v1442_v46 = vadd.f32 %v1441_v23, %v1440_v37  ;;  %v1439_v51 = vsub.f32 %v1437_v25, %v1438_v62  ;;  %v1499_v30 = vxor.u32 2147483648, %v1497_v15 }
 0xf3d   :  { %v1483_v4 = vmul.f32 %v1431_v39, %v1425_v10  ;;  %v1485_v49 = vmul.f32 %v1430_v3, %v1425_v10  ;;  %v1424_v56 = vsel %vm1365_vm14, %v1421_v52, %v1355_v18  ;;  %vm1930_vm14 = vweird.f32 %v2275_v31 }
 0xf3e   :  { %v1482_v24 = vmul.f32 %v1430_v3, %v1424_v56  ;;  %v1486_v29 = vmul.f32 %v1431_v39, %v1424_v56  ;;  %1446 = vadd.xlane.f32.xlu1 %v1442_v46  ;;  %1444 = vadd.xlane.f32.xlu0 %v1439_v51 }
 0xf40   :  { %v1487_v12 = vadd.f32 %v1486_v29, %v1485_v49  ;;  %v1484_v55 = vsub.f32 %v1482_v24, %v1483_v4 }
 0xf42   :  { %1491 = vadd.xlane.f32.xlu1 %v1487_v12  ;;  %1489 = vadd.xlane.f32.xlu0 %v1484_v55 }
 0xfbc   :  { %v1462_v59 = vpop.xlane.xlu1 %1461  ;;  %v1460_v44 = vpop.xlane.xlu0 %1459 }
 0xfbd   :  { %v1464_v63 = vsel %vm1434_vm2, %v1462_v59, %v1395_v22  ;;  %v1463_v18 = vsel %vm1434_vm2, %v1460_v44, %v1394_v38 }
 0xfbe   :  { %v1522_v3 = vmul.f32 %v1500_v60, %v1464_v63  ;;  %v1524_v39 = vmul.f32 %v1499_v30, %v1464_v63  ;;  %v1521_v19 = vmul.f32 %v1499_v30, %v1463_v18  ;;  %v1525_v53 = vmul.f32 %v1500_v60, %v1463_v18 }
 0xfc0   :  { %v1526_v33 = vadd.f32 %v1525_v53, %v1524_v39  ;;  %v1523_v0 = vsub.f32 %v1521_v19, %v1522_v3  ;;  %v1566_v53 = vld [vmem:[#allocation4 + $0x1c] ss:$0 sm:$0xff] }
 0xfc2   :  { %1530 = vadd.xlane.f32.xlu1 %v1526_v33  ;;  %1528 = vadd.xlane.f32.xlu0 %v1523_v0  ;;  %v1567_v33 = vld [vmem:[#allocation5 + $0x1c] ss:$0 sm:$0xff]  ;;  %v1568_v0 = vxor.u32 2147483648, %v1566_v53 }
 0xfc7   :  { %v1477_v14 = vpop.xlane.xlu1 %1476  ;;  %v1475_v48 = vpop.xlane.xlu0 %1474 }
 0xfc8   :  { %v1479_v27 = vsel %vm1434_vm2, %v1477_v14, %v1410_v20  ;;  %v1478_v62 = vsel %vm1434_vm2, %v1475_v48, %v1409_v42  ;;  %v1569_v14 = vxor.u32 2147483648, %v1567_v33 }
 0xfc9   :  { %v1537_v22 = vmul.f32 %v1500_v60, %v1479_v27  ;;  %v1539_v37 = vmul.f32 %v1499_v30, %v1479_v27  ;;  %v1536_v25 = vmul.f32 %v1499_v30, %v1478_v62  ;;  %v1540_v38 = vmul.f32 %v1500_v60, %v1478_v62 }
 0xfcb   :  { %v1447_v23 = vpop.xlane.xlu1 %1446  ;;  %v1445_v57 = vpop.xlane.xlu0 %1444  ;;  %v1541_v52 = vadd.f32 %v1540_v38, %v1539_v37  ;;  %v1538_v46 = vsub.f32 %v1536_v25, %v1537_v22 }
 0xfcc   :  { %v1449_v51 = vsel %vm1434_vm2, %v1447_v23, %v1380_v54  ;;  %v1448_v4 = vsel %vm1434_vm2, %v1445_v57, %v1379_v41 }
 0xfcd   :  { %v1507_v49 = vmul.f32 %v1500_v60, %v1449_v51  ;;  %v1509_v24 = vmul.f32 %v1499_v30, %v1449_v51  ;;  %v1506_v20 = vmul.f32 %v1499_v30, %v1448_v4  ;;  %v1510_v29 = vmul.f32 %v1500_v60, %v1448_v4  ;;  %1545 = vadd.xlane.f32.xlu1 %v1541_v52 }
 0xfce   :  { %1543 = vadd.xlane.f32.xlu0 %v1538_v46 }
 0xfcf   :  { %v1492_v42 = vpop.xlane.xlu1 %1491  ;;  %v1490_v12 = vpop.xlane.xlu0 %1489  ;;  %v1511_v55 = vadd.f32 %v1510_v29, %v1509_v24  ;;  %v1508_v15 = vsub.f32 %v1506_v20, %v1507_v49 }
 0xfd0   :  { %v1494_v34 = vsel %vm1434_vm2, %v1492_v42, %v1425_v10  ;;  %v1493_v59 = vsel %vm1434_vm2, %v1490_v12, %v1424_v56 }
 0xfd1   :  { %v1552_v54 = vmul.f32 %v1500_v60, %v1494_v34  ;;  %v1554_v44 = vmul.f32 %v1499_v30, %v1494_v34  ;;  %v1551_v3 = vmul.f32 %v1499_v30, %v1493_v59  ;;  %v1555_v41 = vmul.f32 %v1500_v60, %v1493_v59  ;;  %1515 = vadd.xlane.f32.xlu1 %v1511_v55 }
 0xfd2   :  { %1513 = vadd.xlane.f32.xlu0 %v1508_v15 }
 0xfd3   :  { %v1556_v39 = vadd.f32 %v1555_v41, %v1554_v44  ;;  %v1553_v19 = vsub.f32 %v1551_v3, %v1552_v54 }
 0xfd5   :  { %1560 = vadd.xlane.f32.xlu1 %v1556_v39 }
 0xfd6   :  { %1558 = vadd.xlane.f32.xlu0 %v1553_v19 }
0x104f   :  { %v1531_v10 = vpop.xlane.xlu1 %1530  ;;  %v1529_v48 = vpop.xlane.xlu0 %1528 }
0x1050   :  { %v1533_v56 = vsel %vm1503_vm15, %v1531_v10, %v1464_v63  ;;  %v1532_v30 = vsel %vm1503_vm15, %v1529_v48, %v1463_v18 }
0x1051   :  { %v1591_v60 = vmul.f32 %v1569_v14, %v1533_v56  ;;  %v1593_v22 = vmul.f32 %v1568_v0, %v1533_v56  ;;  %v1590_v37 = vmul.f32 %v1568_v0, %v1532_v30  ;;  %v1594_v25 = vmul.f32 %v1569_v14, %v1532_v30 }
0x1053   :  { %v1595_v38 = vadd.f32 %v1594_v25, %v1593_v22  ;;  %v1592_v23 = vsub.f32 %v1590_v37, %v1591_v60  ;;  %v1635_v25 = vld [vmem:[#allocation4 + $0x1d] ss:$0 sm:$0xff] }
0x1055   :  { %1599 = vadd.xlane.f32.xlu1 %v1595_v38  ;;  %1597 = vadd.xlane.f32.xlu0 %v1592_v23  ;;  %v1636_v38 = vld [vmem:[#allocation5 + $0x1d] ss:$0 sm:$0xff] }
0x1056   :  { %v1638_v23 = vxor.u32 2147483648, %v1636_v38 }
0x105a   :  { %v1546_v57 = vpop.xlane.xlu1 %1545 }
0x105b   :  { %v1548_v52 = vsel %vm1503_vm15, %v1546_v57, %v1479_v27  ;;  %v1544_v46 = vpop.xlane.xlu0 %1543 }
0x105c   :  { %v1606_v49 = vmul.f32 %v1569_v14, %v1548_v52  ;;  %v1608_v24 = vmul.f32 %v1568_v0, %v1548_v52  ;;  %v1547_v63 = vsel %vm1503_vm15, %v1544_v46, %v1478_v62 }
0x105d   :  { %v1605_v20 = vmul.f32 %v1568_v0, %v1547_v63  ;;  %v1609_v18 = vmul.f32 %v1569_v14, %v1547_v63 }
0x105e   :  { %v1516_v29 = vpop.xlane.xlu1 %1515 }
0x105f   :  { %v1518_v42 = vsel %vm1503_vm15, %v1516_v29, %v1449_v51  ;;  %v1514_v12 = vpop.xlane.xlu0 %1513  ;;  %v1610_v55 = vadd.f32 %v1609_v18, %v1608_v24  ;;  %v1607_v15 = vsub.f32 %v1605_v20, %v1606_v49 }
0x1060   :  { %v1576_v54 = vmul.f32 %v1569_v14, %v1518_v42  ;;  %v1578_v44 = vmul.f32 %v1568_v0, %v1518_v42  ;;  %v1517_v27 = vsel %vm1503_vm15, %v1514_v12, %v1448_v4 }
0x1061   :  { %v1575_v3 = vmul.f32 %v1568_v0, %v1517_v27  ;;  %v1579_v41 = vmul.f32 %v1569_v14, %v1517_v27  ;;  %1614 = vadd.xlane.f32.xlu1 %v1610_v55  ;;  %1612 = vadd.xlane.f32.xlu0 %v1607_v15 }
0x1062   :  { %v1561_v39 = vpop.xlane.xlu1 %1560 }
0x1063   :  { %v1563_v62 = vsel %vm1503_vm15, %v1561_v39, %v1494_v34  ;;  %v1559_v19 = vpop.xlane.xlu0 %1558  ;;  %v1580_v53 = vadd.f32 %v1579_v41, %v1578_v44  ;;  %v1577_v33 = vsub.f32 %v1575_v3, %v1576_v54  ;;  %v1637_v34 = vxor.u32 2147483648, %v1635_v25 }
0x1064   :  { %v1621_v51 = vmul.f32 %v1569_v14, %v1563_v62  ;;  %v1623_v10 = vmul.f32 %v1568_v0, %v1563_v62  ;;  %v1562_v48 = vsel %vm1503_vm15, %v1559_v19, %v1493_v59 }
0x1065   :  { %v1620_v60 = vmul.f32 %v1568_v0, %v1562_v48  ;;  %v1624_v22 = vmul.f32 %v1569_v14, %v1562_v48  ;;  %1584 = vadd.xlane.f32.xlu1 %v1580_v53  ;;  %1582 = vadd.xlane.f32.xlu0 %v1577_v33 }
0x1067   :  { %v1625_v4 = vadd.f32 %v1624_v22, %v1623_v10  ;;  %v1622_v37 = vsub.f32 %v1620_v60, %v1621_v51 }
0x1069   :  { %1629 = vadd.xlane.f32.xlu1 %v1625_v4  ;;  %1627 = vadd.xlane.f32.xlu0 %v1622_v37 }
0x10e2   :  { %v1600_v57 = vpop.xlane.xlu1 %1599  ;;  %v1598_v46 = vpop.xlane.xlu0 %1597 }
0x10e3   :  { %v1602_v49 = vsel %vm1572_vm0, %v1600_v57, %v1533_v56  ;;  %v1601_v59 = vsel %vm1572_vm0, %v1598_v46, %v1532_v30 }
0x10e4   :  { %v1660_v0 = vmul.f32 %v1638_v23, %v1602_v49  ;;  %v1662_v14 = vmul.f32 %v1637_v34, %v1602_v49  ;;  %v1659_v24 = vmul.f32 %v1637_v34, %v1601_v59  ;;  %v1663_v20 = vmul.f32 %v1638_v23, %v1601_v59 }
0x10e6   :  { %v1664_v18 = vadd.f32 %v1663_v20, %v1662_v14  ;;  %v1661_v29 = vsub.f32 %v1659_v24, %v1660_v0  ;;  %v1704_v20 = vld [vmem:[#allocation4 + $0x1e] ss:$0 sm:$0xff] }
0x10e8   :  { %1668 = vadd.xlane.f32.xlu1 %v1664_v18  ;;  %1666 = vadd.xlane.f32.xlu0 %v1661_v29  ;;  %v1705_v18 = vld [vmem:[#allocation5 + $0x1e] ss:$0 sm:$0xff]  ;;  %v1706_v29 = vxor.u32 2147483648, %v1704_v20 }
0x10ee   :  { %v1615_v12 = vpop.xlane.xlu1 %1614  ;;  %v1613_v55 = vpop.xlane.xlu0 %1612 }
0x10ef   :  { %v1617_v15 = vsel %vm1572_vm0, %v1615_v12, %v1548_v52  ;;  %v1616_v54 = vsel %vm1572_vm0, %v1613_v55, %v1547_v63  ;;  %v1707_v12 = vxor.u32 2147483648, %v1705_v18 }
0x10f0   :  { %v1675_v56 = vmul.f32 %v1638_v23, %v1617_v15  ;;  %v1677_v44 = vmul.f32 %v1637_v34, %v1617_v15  ;;  %v1674_v3 = vmul.f32 %v1637_v34, %v1616_v54  ;;  %v1678_v30 = vmul.f32 %v1638_v23, %v1616_v54 }
0x10f2   :  { %v1585_v41 = vpop.xlane.xlu1 %1584  ;;  %v1583_v39 = vpop.xlane.xlu0 %1582  ;;  %v1679_v19 = vadd.f32 %v1678_v30, %v1677_v44  ;;  %v1676_v53 = vsub.f32 %v1674_v3, %v1675_v56 }
0x10f3   :  { %v1587_v33 = vsel %vm1572_vm0, %v1585_v41, %v1518_v42  ;;  %v1586_v51 = vsel %vm1572_vm0, %v1583_v39, %v1517_v27 }
0x10f4   :  { %v1645_v10 = vmul.f32 %v1638_v23, %v1587_v33  ;;  %v1647_v60 = vmul.f32 %v1637_v34, %v1587_v33  ;;  %v1644_v52 = vmul.f32 %v1637_v34, %v1586_v51  ;;  %v1648_v22 = vmul.f32 %v1638_v23, %v1586_v51  ;;  %1683 = vadd.xlane.f32.xlu1 %v1679_v19 }
0x10f5   :  { %1681 = vadd.xlane.f32.xlu0 %v1676_v53 }
0x10f6   :  { %v1630_v63 = vpop.xlane.xlu1 %1629  ;;  %v1628_v4 = vpop.xlane.xlu0 %1627  ;;  %v1649_v37 = vadd.f32 %v1648_v22, %v1647_v60  ;;  %v1646_v25 = vsub.f32 %v1644_v52, %v1645_v10 }
0x10f7   :  { %v1632_v38 = vsel %vm1572_vm0, %v1630_v63, %v1563_v62  ;;  %v1631_v57 = vsel %vm1572_vm0, %v1628_v4, %v1562_v48  ;;  %vm1931_vm0 = vmor %vm1929_vm11, %vm1930_vm14  ;;  %vm1881_vm14 = vweird.f32 %v2194_v7 }
0x10f8   :  { %v1690_v42 = vmul.f32 %v1638_v23, %v1632_v38  ;;  %v1692_v46 = vmul.f32 %v1637_v34, %v1632_v38  ;;  %v1689_v0 = vmul.f32 %v1637_v34, %v1631_v57  ;;  %v1693_v27 = vmul.f32 %v1638_v23, %v1631_v57  ;;  %1653 = vadd.xlane.f32.xlu1 %v1649_v37 }
0x10f9   :  { %1651 = vadd.xlane.f32.xlu0 %v1646_v25 }
0x10fa   :  { %v1694_v14 = vadd.f32 %v1693_v27, %v1692_v46  ;;  %v1691_v24 = vsub.f32 %v1689_v0, %v1690_v42 }
0x10fc   :  { %1698 = vadd.xlane.f32.xlu1 %v1694_v14 }
0x10fd   :  { %1696 = vadd.xlane.f32.xlu0 %v1691_v24 }
0x1175   :  { %v1669_v62 = vpop.xlane.xlu1 %1668  ;;  %v1667_v55 = vpop.xlane.xlu0 %1666 }
0x1176   :  { %v1671_v48 = vsel %vm1641_vm3, %v1669_v62, %v1602_v49  ;;  %v1670_v34 = vsel %vm1641_vm3, %v1667_v55, %v1601_v59 }
0x1177   :  { %v1729_v23 = vmul.f32 %v1707_v12, %v1671_v48  ;;  %v1731_v56 = vmul.f32 %v1706_v29, %v1671_v48  ;;  %v1728_v44 = vmul.f32 %v1706_v29, %v1670_v34  ;;  %v1732_v3 = vmul.f32 %v1707_v12, %v1670_v34 }
0x1179   :  { %v1733_v30 = vadd.f32 %v1732_v3, %v1731_v56  ;;  %v1730_v41 = vsub.f32 %v1728_v44, %v1729_v23  ;;  %v1773_v3 = vld [vmem:[#allocation4 + $0x1f] ss:$0 sm:$0xff] }
0x117b   :  { %1737 = vadd.xlane.f32.xlu1 %v1733_v30  ;;  %1735 = vadd.xlane.f32.xlu0 %v1730_v41  ;;  %v1774_v30 = vld [vmem:[#allocation5 + $0x1f] ss:$0 sm:$0xff] }
0x117c   :  { %v1776_v41 = vxor.u32 2147483648, %v1774_v30 }
0x1181   :  { %v1684_v39 = vpop.xlane.xlu1 %1683 }
0x1182   :  { %v1686_v19 = vsel %vm1641_vm3, %v1684_v39, %v1617_v15  ;;  %v1682_v53 = vpop.xlane.xlu0 %1681 }
0x1183   :  { %v1744_v10 = vmul.f32 %v1707_v12, %v1686_v19  ;;  %v1746_v60 = vmul.f32 %v1706_v29, %v1686_v19  ;;  %v1685_v49 = vsel %vm1641_vm3, %v1682_v53, %v1616_v54 }
0x1184   :  { %v1743_v52 = vmul.f32 %v1706_v29, %v1685_v49  ;;  %v1747_v59 = vmul.f32 %v1707_v12, %v1685_v49 }
0x1185   :  { %v1654_v22 = vpop.xlane.xlu1 %1653 }
0x1186   :  { %v1656_v63 = vsel %vm1641_vm3, %v1654_v22, %v1587_v33  ;;  %v1652_v4 = vpop.xlane.xlu0 %1651  ;;  %v1748_v37 = vadd.f32 %v1747_v59, %v1746_v60  ;;  %v1745_v25 = vsub.f32 %v1743_v52, %v1744_v10 }
0x1187   :  { %v1714_v42 = vmul.f32 %v1707_v12, %v1656_v63  ;;  %v1716_v46 = vmul.f32 %v1706_v29, %v1656_v63  ;;  %v1655_v15 = vsel %vm1641_vm3, %v1652_v4, %v1586_v51 }
0x1188   :  { %v1713_v0 = vmul.f32 %v1706_v29, %v1655_v15  ;;  %v1717_v27 = vmul.f32 %v1707_v12, %v1655_v15  ;;  %1752 = vadd.xlane.f32.xlu1 %v1748_v37  ;;  %1750 = vadd.xlane.f32.xlu0 %v1745_v25 }
0x1189   :  { %v1699_v14 = vpop.xlane.xlu1 %1698 }
0x118a   :  { %v1701_v54 = vsel %vm1641_vm3, %v1699_v14, %v1632_v38  ;;  %v1697_v24 = vpop.xlane.xlu0 %1696  ;;  %v1718_v20 = vadd.f32 %v1717_v27, %v1716_v46  ;;  %v1715_v18 = vsub.f32 %v1713_v0, %v1714_v42  ;;  %v1775_v38 = vxor.u32 2147483648, %v1773_v3 }
0x118b   :  { %v1759_v33 = vmul.f32 %v1707_v12, %v1701_v54  ;;  %v1761_v62 = vmul.f32 %v1706_v29, %v1701_v54  ;;  %v1700_v55 = vsel %vm1641_vm3, %v1697_v24, %v1631_v57  ;;  %vm1882_vm3 = vweird.f32 %v2196_v8 }
0x118c   :  { %v1758_v23 = vmul.f32 %v1706_v29, %v1700_v55  ;;  %v1762_v56 = vmul.f32 %v1707_v12, %v1700_v55  ;;  %1722 = vadd.xlane.f32.xlu1 %v1718_v20  ;;  %1720 = vadd.xlane.f32.xlu0 %v1715_v18 }
0x118e   :  { %v1763_v51 = vadd.f32 %v1762_v56, %v1761_v62  ;;  %v1760_v44 = vsub.f32 %v1758_v23, %v1759_v33 }
0x1190   :  { %1767 = vadd.xlane.f32.xlu1 %v1763_v51  ;;  %1765 = vadd.xlane.f32.xlu0 %v1760_v44 }
0x1208   :  { %v1738_v39 = vpop.xlane.xlu1 %1737  ;;  %v1736_v53 = vpop.xlane.xlu0 %1735 }
0x1209   :  { %v1740_v10 = vsel %vm1710_vm6, %v1738_v39, %v1671_v48  ;;  %v1739_v57 = vsel %vm1710_vm6, %v1736_v53, %v1670_v34 }
0x120a   :  { %v1798_v29 = vmul.f32 %v1776_v41, %v1740_v10  ;;  %v1800_v12 = vmul.f32 %v1775_v38, %v1740_v10  ;;  %v1797_v60 = vmul.f32 %v1775_v38, %v1739_v57  ;;  %v1801_v52 = vmul.f32 %v1776_v41, %v1739_v57 }
0x120c   :  { %v1802_v59 = vadd.f32 %v1801_v52, %v1800_v12  ;;  %v1799_v22 = vsub.f32 %v1797_v60, %v1798_v29 }
0x120e   :  { %1806 = vadd.xlane.f32.xlu1 %v1802_v59  ;;  %1804 = vadd.xlane.f32.xlu0 %v1799_v22 }
0x1215   :  { %v1753_v4 = vpop.xlane.xlu1 %1752  ;;  %v1751_v37 = vpop.xlane.xlu0 %1750 }
0x1216   :  { %v2792_v25 = vsel %vm1710_vm6, %v1753_v4, %v1686_v19  ;;  %v2796_v48 = vsel %vm1710_vm6, %v1751_v37, %v1685_v49 }
0x1217   :  { %v1813_v34 = vmul.f32 %v1776_v41, %v2792_v25  ;;  %v1815_v42 = vmul.f32 %v1775_v38, %v2792_v25  ;;  %v1812_v46 = vmul.f32 %v1775_v38, %v2796_v48  ;;  %v1816_v0 = vmul.f32 %v1776_v41, %v2796_v48 }
0x1219   :  { %v1723_v27 = vpop.xlane.xlu1 %1722  ;;  %v1721_v14 = vpop.xlane.xlu0 %1720  ;;  %v1817_v24 = vadd.f32 %v1816_v0, %v1815_v42  ;;  %v1814_v20 = vsub.f32 %v1812_v46, %v1813_v34 }
0x121a   :  { %v2804_v19 = vsel %vm1710_vm6, %v1723_v27, %v1656_v63  ;;  %v2808_v49 = vsel %vm1710_vm6, %v1721_v14, %v1655_v15 }
0x121b   :  { %v1783_v18 = vmul.f32 %v1776_v41, %v2804_v19  ;;  %v1785_v33 = vmul.f32 %v1775_v38, %v2804_v19  ;;  %v1782_v62 = vmul.f32 %v1775_v38, %v2808_v49  ;;  %v1786_v23 = vmul.f32 %v1776_v41, %v2808_v49  ;;  %1821 = vadd.xlane.f32.xlu1 %v1817_v24 }
0x121c   :  { %1819 = vadd.xlane.f32.xlu0 %v1814_v20 }
0x121d   :  { %v1768_v56 = vpop.xlane.xlu1 %1767  ;;  %v1766_v51 = vpop.xlane.xlu0 %1765  ;;  %v1787_v44 = vadd.f32 %v1786_v23, %v1785_v33  ;;  %v1784_v3 = vsub.f32 %v1782_v62, %v1783_v18 }
0x121e   :  { %v2816_v63 = vsel %vm1710_vm6, %v1768_v56, %v1701_v54  ;;  %v2820_v15 = vsel %vm1710_vm6, %v1766_v51, %v1700_v55 }
0x121f   :  { %v1828_v30 = vmul.f32 %v1776_v41, %v2816_v63  ;;  %v1830_v39 = vmul.f32 %v1775_v38, %v2816_v63  ;;  %v1827_v53 = vmul.f32 %v1775_v38, %v2820_v15  ;;  %v1831_v29 = vmul.f32 %v1776_v41, %v2820_v15  ;;  %1791 = vadd.xlane.f32.xlu1 %v1787_v44 }
0x1220   :  { %1789 = vadd.xlane.f32.xlu0 %v1784_v3 }
0x1221   :  { %v1832_v12 = vadd.f32 %v1831_v29, %v1830_v39  ;;  %v1829_v60 = vsub.f32 %v1827_v53, %v1828_v30 }
0x1223   :  { %1836 = vadd.xlane.f32.xlu1 %v1832_v12 }
0x1224   :  { %1834 = vadd.xlane.f32.xlu0 %v1829_v60 }
0x129b   :  { %v1807_v54 = vpop.xlane.xlu1 %1806  ;;  %v1805_v52 = vpop.xlane.xlu0 %1804 }
0x129c   :  { %v1809_v55 = vsel %vm1779_vm8, %v1807_v54, %v1740_v10  ;;  %v1808_v59 = vsel %vm1779_vm8, %v1805_v52, %v1739_v57 }
0x129d   :  { %v1903_v38 = vmul.f32 %v1809_v55, %v2297_v43  ;;  %v1920_v22 = vand.u32 2147483648, %v1809_v55  ;;  %v1901_v41 = vmul.f32 %v1808_v59, %v2297_v43  ;;  %v1918_v4 = vand.u32 2147483648, %v1808_v59 }
0x129e   :  { %vm1922_vm2 = vcmp.eq.f32.partialorder %v1808_v59, 0.0  ;;  %vm1924_vm15 = vcmp.eq.f32.partialorder %v1809_v55, 0.0 }
0x129f   :  { %v1902_v37 = vadd.f32 %v1901_v41, %v1809_v55  ;;  %v1904_v34 = vadd.f32 %v1903_v38, %v1808_v59  ;;  %v1910_v42 = vsub.f32 %v1903_v38, %v1808_v59  ;;  %v1921_v46 = vor.u32 inf, %v1920_v22 }
0x12a0   :  { %v1912_v0 = vsub.f32 %v1809_v55, %v1901_v41  ;;  %v1919_v27 = vor.u32 inf, %v1918_v4 }
0x12a1   :  { %v1905_v10 = vsel %vm2281_vm5, %v1902_v37, %v1904_v34  ;;  %v1925_v20 = vsel %vm1924_vm15, nan, %v1921_v46 }
0x12a2   :  { %v1908_v57 = vmul.f32 %v2315_v61, %v1905_v10  ;;  %v1913_v14 = vsel %vm2281_vm5, %v1910_v42, %v1912_v0  ;;  %v1923_v24 = vsel %vm1922_vm2, nan, %v1919_v27  ;;  %vm1979_vm5 = vweird.f32 %v2425_v9 }
0x12a3   :  { %v1914_v43 = vmul.f32 %v2315_v61, %v1913_v14 }
0x12a4   :  { %v1926_v32 = vsel %vm2317_vm13, %v1923_v24, %v1908_v57 }
0x12a5   :  { %v1927_v31 = vsel %vm2317_vm13, %v1925_v20, %v1914_v43  ;;  %v1932_v18 = vsel %vm1931_vm0, %v1808_v59, %v1926_v32  ;;  %vm1980_vm13 = vweird.f32 %v2423_v6 }
0x12a6   :  { %v1933_v33 = vsel %vm1931_vm0, %v1809_v55, %v1927_v31  ;;  %2074 = vst [vmem:[%s2939_s2 + $0x8] sm:$0xff] %v1932_v18 }
0x12a7   :  { %2118 = vst [vmem:[%s2940_s3 + $0x8] sm:$0xff] %v1933_v33 }
0x12a8   :  { %v1822_v36 = vpop.xlane.xlu1 %1821 }
0x12a9   :  { %v1824_v61 = vsel %vm1779_vm8, %v1822_v36, %v2792_v25  ;;  %v1820_v62 = vpop.xlane.xlu0 %1819 }
0x12aa   :  { %v1953_v23 = vmul.f32 %v1824_v61, %v2445_v21  ;;  %v1970_v1 = vand.u32 2147483648, %v1824_v61  ;;  %v1823_v56 = vsel %vm1779_vm8, %v1820_v62, %v2796_v48  ;;  %vm1974_vm6 = vcmp.eq.f32.partialorder %v1824_v61, 0.0 }
0x12ab   :  { %v1951_v51 = vmul.f32 %v1823_v56, %v2445_v21  ;;  %v1968_v44 = vand.u32 2147483648, %v1823_v56  ;;  %vm1972_vm11 = vcmp.eq.f32.partialorder %v1823_v56, 0.0 }
0x12ac   :  { %v1971_v3 = vor.u32 inf, %v1970_v1  ;;  %v1954_v30 = vadd.f32 %v1953_v23, %v1823_v56  ;;  %v1960_v39 = vsub.f32 %v1953_v23, %v1823_v56  ;;  %v1792_v53 = vpop.xlane.xlu1 %1791 }
0x12ad   :  { %v1952_v25 = vadd.f32 %v1951_v51, %v1824_v61  ;;  %v1962_v29 = vsub.f32 %v1824_v61, %v1951_v51  ;;  %v1969_v12 = vor.u32 inf, %v1968_v44  ;;  %v1794_v48 = vsel %vm1779_vm8, %v1792_v53, %v2804_v19  ;;  %v1790_v60 = vpop.xlane.xlu0 %1789 }
0x12ae   :  { %v1855_v21 = vmul.f32 %v1794_v48, %v2217_v17  ;;  %v1872_v54 = vand.u32 2147483648, %v1794_v48  ;;  %v1975_v52 = vsel %vm1974_vm6, nan, %v1971_v3  ;;  %v1793_v38 = vsel %vm1779_vm8, %v1790_v60, %v2808_v49 }
0x12af   :  { %v1955_v55 = vsel %vm2429_vm12, %v1952_v25, %v1954_v30  ;;  %v1963_v59 = vsel %vm2429_vm12, %v1960_v39, %v1962_v29  ;;  %v1973_v41 = vsel %vm1972_vm11, nan, %v1969_v12  ;;  %v1853_v4 = vmul.f32 %v1793_v38, %v2217_v17  ;;  %vm1981_vm12 = vmor %vm1979_vm5, %vm1980_vm13 }
0x12b0   :  { %v1958_v19 = vmul.f32 %v2463_v45, %v1955_v55  ;;  %v1964_v22 = vmul.f32 %v2463_v45, %v1963_v59  ;;  %v1873_v37 = vor.u32 inf, %v1872_v54  ;;  %v1856_v34 = vadd.f32 %v1855_v21, %v1793_v38  ;;  %v1837_v0 = vpop.xlane.xlu1 %1836 }
0x12b1   :  { %v1862_v42 = vsub.f32 %v1855_v21, %v1793_v38  ;;  %v1870_v46 = vand.u32 2147483648, %v1793_v38  ;;  %v1835_v27 = vpop.xlane.xlu0 %1834  ;;  %vm1876_vm2 = vcmp.eq.f32.partialorder %v1794_v48, 0.0  ;;  %v1854_v49 = vadd.f32 %v1853_v4, %v1794_v48 }
0x12b2   :  { %v1976_v13 = vsel %vm2465_vm7, %v1973_v41, %v1958_v19  ;;  %v1977_v45 = vsel %vm2465_vm7, %v1975_v52, %v1964_v22  ;;  %v1864_v57 = vsub.f32 %v1794_v48, %v1853_v4  ;;  %vm1874_vm15 = vcmp.eq.f32.partialorder %v1793_v38, 0.0  ;;  %vm1883_vm7 = vmor %vm1881_vm14, %vm1882_vm3 }
0x12b3   :  { %v1982_v17 = vsel %vm1981_vm12, %v1823_v56, %v1976_v13  ;;  %v1983_v10 = vsel %vm1981_vm12, %v1824_v61, %v1977_v45  ;;  %v1871_v14 = vor.u32 inf, %v1870_v46  ;;  %v1857_v6 = vsel %vm2200_vm1, %v1854_v49, %v1856_v34 }
0x12b4   :  { %2076 = vst [vmem:[%s2939_s2 + $0x10] sm:$0xff] %v1982_v17  ;;  %2120 = vst [vmem:[%s2940_s3 + $0x10] sm:$0xff] %v1983_v10  ;;  %v1839_v9 = vsel %vm1779_vm8, %v1837_v0, %v2816_v63  ;;  %v1838_v50 = vsel %vm1779_vm8, %v1835_v27, %v2820_v15  ;;  %v1877_v43 = vsel %vm1876_vm2, nan, %v1873_v37  ;;  %v1860_v24 = vmul.f32 %v2234_v35, %v1857_v6 }
0x12b5   :  { %v1865_v20 = vsel %vm2200_vm1, %v1862_v42, %v1864_v57  ;;  %v2003_v32 = vmul.f32 %v1839_v9, %v2631_v58  ;;  %v1875_v18 = vsel %vm1874_vm15, nan, %v1871_v14  ;;  %v2020_v33 = vand.u32 2147483648, %v1839_v9 }
0x12b6   :  { %v1866_v31 = vmul.f32 %v2234_v35, %v1865_v20  ;;  %v2001_v36 = vmul.f32 %v1838_v50, %v2631_v58  ;;  %v1878_v2 = vsel %vm2239_vm9, %v1875_v18, %v1860_v24  ;;  %v2018_v11 = vand.u32 2147483648, %v1838_v50 }
0x12b7   :  { %v2004_v63 = vadd.f32 %v2003_v32, %v1838_v50  ;;  %v2010_v15 = vsub.f32 %v2003_v32, %v1838_v50  ;;  %v1884_v62 = vsel %vm1883_vm7, %v1793_v38, %v1878_v2  ;;  %v2021_v8 = vor.u32 inf, %v2020_v33 }
0x12b8   :  { %v1879_v61 = vsel %vm2239_vm9, %v1877_v43, %v1866_v31  ;;  %v2002_v35 = vadd.f32 %v2001_v36, %v1839_v9  ;;  %2072 = vst [vmem:[%s2939_s2] sm:$0xff] %v1884_v62  ;;  %v2012_v58 = vsub.f32 %v1839_v9, %v2001_v36  ;;  %v2019_v7 = vor.u32 inf, %v2018_v11 }
0x12b9   :  { %v1885_v23 = vsel %vm1883_vm7, %v1794_v48, %v1879_v61  ;;  %vm2029_vm1 = vweird.f32 %v2611_v28  ;;  %vm2030_vm8 = vweird.f32 %v2609_v47  ;;  %vm2022_vm9 = vcmp.eq.f32.partialorder %v1838_v50, 0.0 }
0x12ba   :  { %2116 = vst [vmem:[%s2940_s3] sm:$0xff] %v1885_v23  ;;  %v2005_v40 = vsel %vm2615_vm10, %v2002_v35, %v2004_v63  ;;  %v2013_v56 = vsel %vm2615_vm10, %v2010_v15, %v2012_v58  ;;  %vm2024_vm0 = vcmp.eq.f32.partialorder %v1839_v9, 0.0  ;;  %v2023_v44 = vsel %vm2022_vm9, nan, %v2019_v7  ;;  %vm2031_vm5 = vmor %vm2029_vm1, %vm2030_vm8 }
0x12bb   :  { %v2008_v1 = vmul.f32 %v2649_v5, %v2005_v40  ;;  %v2014_v51 = vmul.f32 %v2649_v5, %v2013_v56  ;;  %v2025_v3 = vsel %vm2024_vm0, nan, %v2021_v8 }
0x12bd   :  { %v2026_v28 = vsel %vm2651_vm4, %v2023_v44, %v2008_v1  ;;  %v2027_v47 = vsel %vm2651_vm4, %v2025_v3, %v2014_v51 }
0x12be   :  { %v2032_v30 = vsel %vm2031_vm5, %v1838_v50, %v2026_v28  ;;  %v2033_v39 = vsel %vm2031_vm5, %v1839_v9, %v2027_v47 }
0x12bf   :  { %2078 = vst [vmem:[%s2939_s2 + $0x18] sm:$0xff] %v2032_v30  ;;  %2122 = vst [vmem:[%s2940_s3 + $0x18] sm:$0xff] %v2033_v39 }

// kernel: custom-call.1
= control target key start
LH: loop header
LB: loop body
LE: loop exit
PB: predicated region body
PF: predicated region fallthrough
CT: control target
= control target key end

     0   :  { %s59_s0 = inlined_call_operand.hbm [shape: c64[16,16,32], index: 0, kind: input, shape index: {}]   ;;  %s60_s1 = inlined_call_operand.vmem [shape: f32[16,16,32], index: 1, kind: output, shape index: {}]  }
   0x1   :  { %s2_s8 = scalar_lea.hbm %s59_s0, 4096 }
   0x2   :  { %3 = vsyncpa [#allocation0], 0  ;;  %s4_s11 = sshll.u32 %s60_s1, 4  ;;  %s34_s14 = scalar_lea.hbm %s59_s0, 8192  ;;  %s5_s11 = int_to_ptr.vmem [resolvable:$true] %s4_s11 }
   0x3   :  { %p11_p0 = scmp.ne.s32.totalorder %s2_s8, %s34_s14  ;;  %p13_p1 = scmp.lt.u32.totalorder %s2_s8, %s59_s0 }
   0x4   :  { %p14_p2 = scmp.lt.u32.totalorder %s34_s14, %s34_s14  ;;  %p16_p4 = scmp.lt.u32.totalorder %s34_s14, %s2_s8 }
   0x6   :  { %p15_p3 = por %p14_p2, %p13_p1 }
   0x8   :  { %p17_p5 = por %p16_p4, %p15_p3 }
   0xa   :  { %p18_p6 = pnand %p17_p5, %p11_p0 }
   0xc   :  { %21 = shalt.err (!%p18_p6)  }
   0xd   :  { %s22_s17 = scalar_lea.vmem %s5_s11, 4096  ;;  %p27_p8 = scmp.lt.s32.totalorder %s5_s11, %s5_s11 }
   0xe   :  { %p23_p7 = scmp.ne.s32.totalorder %s5_s11, %s22_s17  ;;  %p28_p9 = scmp.lt.s32.totalorder %s22_s17, %s22_s17 }
  0x10   :  { %p29_p10 = por %p28_p9, %p27_p8 }
  0x12   :  { %p30_p11 = pnand %p29_p10, %p23_p7 }
  0x14   :  { %33 = shalt.err (!%p30_p11)  }
  0x15   :  { %7 = dma.hbm_to_vmem [thread:$0]  %s2_s8, 4096, %s5_s11, [#allocation0] }
  0x16   :  { %35 = dma.done.wait [#allocation0], 4096  }
  0x17   :  { %36 = vsyncadd [#allocation0], 4294963200 }
  0x18   :  { %9 = vsyncpa [#allocation0], 1 }

// kernel: custom-call
= control target key start
LH: loop header
LB: loop body
LE: loop exit
PB: predicated region body
PF: predicated region fallthrough
CT: control target
= control target key end

     0   :  { %2 = vsyncpa [#allocation0], 0  ;;  %s61_s0 = inlined_call_operand.hbm [shape: c64[16,16,32], index: 0, kind: input, shape index: {}]   ;;  %s62_s1 = inlined_call_operand.vmem [shape: f32[16,16,32], index: 1, kind: output, shape index: {}]  }
   0x1   :  { %s3_s8 = sshll.u32 %s62_s1, 4  ;;  %s9_s11 = scalar_lea.hbm %s61_s0, 4096  ;;  %s4_s8 = int_to_ptr.vmem [resolvable:$true] %s3_s8 }
   0x2   :  { %p10_p0 = scmp.ne.s32.totalorder %s61_s0, %s9_s11  ;;  %s11_s16 = scalar_lea.hbm %s61_s0, 8192 }
   0x3   :  { %p12_p1 = scmp.lt.u32.totalorder %s11_s16, %s9_s11  ;;  %p13_p2 = scmp.lt.u32.totalorder %s9_s11, %s61_s0 }
   0x5   :  { %p14_p3 = por %p13_p2, %p12_p1 }
   0x7   :  { %p15_p4 = pnand %p14_p3, %p10_p0 }
   0x9   :  { %18 = shalt.err (!%p15_p4)  }
   0xa   :  { %s19_s1 = scalar_lea.vmem %s4_s8, 4096  ;;  %p24_p6 = scmp.lt.s32.totalorder %s4_s8, %s4_s8 }
   0xb   :  { %p20_p5 = scmp.ne.s32.totalorder %s4_s8, %s19_s1  ;;  %p25_p7 = scmp.lt.s32.totalorder %s19_s1, %s19_s1 }
   0xd   :  { %p26_p8 = por %p25_p7, %p24_p6 }
   0xf   :  { %p27_p9 = pnand %p26_p8, %p20_p5 }
  0x11   :  { %30 = shalt.err (!%p27_p9)  }
  0x12   :  { %6 = dma.hbm_to_vmem [thread:$0]  %s61_s0, 4096, %s4_s8, [#allocation0] }
  0x13   :  { %31 = dma.done.wait [#allocation0], 4096  }
  0x14   :  { %32 = vsyncadd [#allocation0], 4294963200 }
  0x15   :  { %8 = vsyncpa [#allocation0], 1 }

// kernel: custom-call.4
= control target key start
LH: loop header
LB: loop body
LE: loop exit
PB: predicated region body
PF: predicated region fallthrough
CT: control target
= control target key end

     0   :  { %s126_s0 = inlined_call_operand.vmem [shape: f32[16,16,32], index: 0, kind: input, shape index: {}]   ;;  %s127_s1 = inlined_call_operand.vmem [shape: f32[16,16,32], index: 1, kind: input, shape index: {}]   ;;  %s128_s2 = inlined_call_operand.hbm [shape: c64[16,16,32], index: 2, kind: output, shape index: {}]  }
   0x1   :  { %s87_s11 = scalar_lea.hbm %s128_s2, 4096 }
   0x2   :  { %4 = vsyncpa [#allocation0], 0  ;;  %s5_s14 = sshll.u32 %s126_s0, 4  ;;  %s6_s14 = int_to_ptr.vmem [resolvable:$true] %s5_s14 }
   0x3   :  { %s18_s15 = scalar_lea.vmem %s6_s14, 4096  ;;  %p23_p1 = scmp.lt.s32.totalorder %s6_s14, %s6_s14 }
   0x4   :  { %p19_p0 = scmp.ne.s32.totalorder %s6_s14, %s18_s15  ;;  %p24_p2 = scmp.lt.s32.totalorder %s18_s15, %s18_s15 }
   0x6   :  { %p25_p3 = por %p24_p2, %p23_p1 }
   0x8   :  { %p26_p4 = pnand %p25_p3, %p19_p0 }
   0xa   :  { %29 = shalt.err (!%p26_p4)  }
   0xb   :  { %p31_p5 = scmp.ne.s32.totalorder %s128_s2, %s87_s11  ;;  %s32_s0 = scalar_lea.hbm %s128_s2, 8192 }
   0xc   :  { %p33_p6 = scmp.lt.u32.totalorder %s32_s0, %s87_s11  ;;  %p34_p7 = scmp.lt.u32.totalorder %s87_s11, %s128_s2 }
   0xe   :  { %p35_p8 = por %p34_p7, %p33_p6 }
  0x10   :  { %p36_p9 = pnand %p35_p8, %p31_p5 }
  0x12   :  { %39 = shalt.err (!%p36_p9)  }
  0x13   :  { %8 = dma.vmem_to_hbm [thread:$0]  %s6_s14, 4096, %s128_s2, [#allocation0] }
  0x14   :  { %65 = dma.done.wait [#allocation0], 4096  }
  0x15   :  { %66 = vsyncadd [#allocation0], 4294963200 }
  0x16   :  { %10 = vsyncpa [#allocation0], 1 }
  0x17   :  { %11 = vsyncpa [#allocation1], 0  ;;  %s12_s28 = sshll.u32 %s127_s1, 4  ;;  %s13_s28 = int_to_ptr.vmem [resolvable:$true] %s12_s28 }
  0x18   :  { %s40_s29 = scalar_lea.vmem %s13_s28, 4096  ;;  %p45_p11 = scmp.lt.s32.totalorder %s13_s28, %s13_s28 }
  0x19   :  { %p41_p10 = scmp.ne.s32.totalorder %s13_s28, %s40_s29  ;;  %p46_p12 = scmp.lt.s32.totalorder %s40_s29, %s40_s29 }
  0x1b   :  { %p47_p13 = por %p46_p12, %p45_p11 }
  0x1d   :  { %p48_p0 = pnand %p47_p13, %p41_p10 }
  0x1f   :  { %51 = shalt.err (!%p48_p0)  }
  0x20   :  { %p53_p1 = scmp.ne.s32.totalorder %s87_s11, %s32_s0  ;;  %p56_p2 = scmp.lt.u32.totalorder %s32_s0, %s32_s0 }
  0x22   :  { %p57_p3 = por %p56_p2, %p34_p7 }
  0x24   :  { %p59_p4 = por %p57_p3, %p33_p6 }
  0x26   :  { %p60_p5 = pnand %p59_p4, %p53_p1 }
  0x28   :  { %63 = shalt.err (!%p60_p5)  }
  0x29   :  { %15 = dma.vmem_to_hbm [thread:$0]  %s13_s28, 4096, %s87_s11, [#allocation1] }
  0x2a   :  { %67 = dma.done.wait [#allocation1], 4096  }
  0x2b   :  { %68 = vsyncadd [#allocation1], 4294963200 }
  0x2c   :  { %17 = vsyncpa [#allocation1], 1 }

// kernel: koopman_nca_forward.1
= control target key start
LH: loop header
LB: loop body
LE: loop exit
PB: predicated region body
PF: predicated region fallthrough
CT: control target
= control target key end

     0   :  { %s669_s13 = smov 112   ;;  %s670_s18 = smov 16   ;;  %v35_v24 = vlaneseq  ;;  %vm472_vm10 = vcmask 523264   ;;  %s1349_s0 = inlined_call_operand.vmem [shape: f32[64,256], index: 0, kind: input, shape index: {}]   ;;  %s1350_s1 = inlined_call_operand.vmem [shape: f32[64,64], index: 1, kind: input, shape index: {}]   ;;  %s1351_s2 = inlined_call_operand.vmem [shape: f32[64,256], index: 2, kind: output, shape index: {}]  }
   0x1   :  { %v694_v0 = vld [vmem:[%s1349_s0 + $0x8] sm:$0xff]  ;;  %v699_v1 = vld [vmem:[%s1349_s0] sm:$0xff]  ;;  %v708_v2 = vld [vmem:[%s1349_s0 + $0x18] sm:$0xff]  ;;  %s671_s19 = smov 15   ;;  %s672_s20 = smov 127  }
   0x2   :  { %82 = vrot.lane.b32.xlu1 %v694_v0, %s669_s13  ;;  %66 = vrot.lane.b32.xlu0 %v699_v1, %s669_s13  ;;  %v713_v3 = vld [vmem:[%s1349_s0 + $0x10] sm:$0xff]  ;;  %s673_s21 = smov 113   ;;  %s674_s22 = smov 1   ;;  %v767_v5 = vld [vmem:[%s1349_s0 + $0x20] sm:$0xff]  ;;  %v891_v27 = vand.u32 127, %v35_v24 }
   0x3   :  { %v762_v4 = vld [vmem:[%s1349_s0 + $0x30] sm:$0xff]  ;;  %v776_v6 = vld [vmem:[%s1349_s0 + $0x38] sm:$0xff]  ;;  %v781_v7 = vld [vmem:[%s1349_s0 + $0x28] sm:$0xff] }
   0x4   :  { %v830_v8 = vld [vmem:[%s1349_s0 + $0x50] sm:$0xff]  ;;  %v835_v9 = vld [vmem:[%s1349_s0 + $0x40] sm:$0xff]  ;;  %v844_v10 = vld [vmem:[%s1349_s0 + $0x58] sm:$0xff]  ;;  %v37_v28 = vadd.s32 128, %v891_v27  ;;  %v42_v33 = vand.u32 15, %v891_v27  ;;  %vm98_vm0 = vcmp.lt.s32.totalorder %v891_v27, 112 }
   0x5   :  { %v849_v11 = vld [vmem:[%s1349_s0 + $0x48] sm:$0xff]  ;;  %v901_v29 = vld [vmem:[%s1349_s0 + $0x70] sm:$0xff]  ;;  %v906_v32 = vld [vmem:[%s1349_s0 + $0x60] sm:$0xff]  ;;  %vm147_vm1 = vcmp.lt.s32.totalorder %v891_v27, 16  ;;  %vm261_vm2 = vcmp.lt.s32.totalorder %v891_v27, 127  ;;  %vm212_vm3 = vcmp.lt.s32.totalorder %v891_v27, 15 }
   0x6   :  { %84 = vrot.lane.b32.xlu1 %v708_v2, %s669_s13  ;;  %68 = vrot.lane.b32.xlu0 %v713_v3, %s669_s13  ;;  %v49_v34 = vand.u32 15, %v37_v28  ;;  %v916_v35 = vld [vmem:[%s1349_s0 + $0x78] sm:$0xff]  ;;  %v921_v38 = vld [vmem:[%s1349_s0 + $0x68] sm:$0xff]  ;;  %vm929_vm4 = vcmp.eq.s32.totalorder %v42_v33, 15  ;;  %vm342_vm6 = vcmp.lt.s32.totalorder %v891_v27, 113  ;;  %vm986_vm7 = vcmp.eq.s32.totalorder %v42_v33, 0 }
   0x7   :  { %vm391_vm9 = vcmp.lt.s32.totalorder %v891_v27, 1 }
   0x8   :  { %vm933_vm5 = vcmp.eq.s32.totalorder %v49_v34, 15  ;;  %vm990_vm8 = vcmp.eq.s32.totalorder %v49_v34, 0 }
   0xa   :  { %117 = vrot.lane.b32.xlu1 %v713_v3, %s670_s18  ;;  %115 = vrot.lane.b32.xlu0 %v699_v1, %s670_s18 }
   0xe   :  { %133 = vrot.lane.b32.xlu1 %v708_v2, %s670_s18  ;;  %131 = vrot.lane.b32.xlu0 %v694_v0, %s670_s18 }
  0x12   :  { %182 = vrot.lane.b32.xlu1 %v713_v3, %s671_s19  ;;  %180 = vrot.lane.b32.xlu0 %v699_v1, %s671_s19 }
  0x16   :  { %198 = vrot.lane.b32.xlu1 %v708_v2, %s671_s19  ;;  %196 = vrot.lane.b32.xlu0 %v694_v0, %s671_s19 }
  0x1a   :  { %231 = vrot.lane.b32.xlu1 %v713_v3, %s672_s20  ;;  %229 = vrot.lane.b32.xlu0 %v699_v1, %s672_s20 }
  0x1e   :  { %247 = vrot.lane.b32.xlu1 %v708_v2, %s672_s20  ;;  %245 = vrot.lane.b32.xlu0 %v694_v0, %s672_s20 }
  0x22   :  { %312 = vrot.lane.b32.xlu1 %v713_v3, %s673_s21  ;;  %310 = vrot.lane.b32.xlu0 %v699_v1, %s673_s21 }
  0x26   :  { %328 = vrot.lane.b32.xlu1 %v708_v2, %s673_s21  ;;  %326 = vrot.lane.b32.xlu0 %v694_v0, %s673_s21 }
  0x2a   :  { %361 = vrot.lane.b32.xlu1 %v713_v3, %s674_s22  ;;  %359 = vrot.lane.b32.xlu0 %v699_v1, %s674_s22 }
  0x2e   :  { %377 = vrot.lane.b32.xlu1 %v708_v2, %s674_s22  ;;  %375 = vrot.lane.b32.xlu0 %v694_v0, %s674_s22 }
  0x32   :  { %72 = vrot.lane.b32.xlu1 %v762_v4, %s669_s13  ;;  %70 = vrot.lane.b32.xlu0 %v767_v5, %s669_s13 }
  0x36   :  { %88 = vrot.lane.b32.xlu1 %v776_v6, %s669_s13  ;;  %86 = vrot.lane.b32.xlu0 %v781_v7, %s669_s13 }
  0x3a   :  { %121 = vrot.lane.b32.xlu1 %v762_v4, %s670_s18  ;;  %119 = vrot.lane.b32.xlu0 %v767_v5, %s670_s18 }
  0x3e   :  { %137 = vrot.lane.b32.xlu1 %v776_v6, %s670_s18  ;;  %135 = vrot.lane.b32.xlu0 %v781_v7, %s670_s18 }
  0x42   :  { %186 = vrot.lane.b32.xlu1 %v762_v4, %s671_s19  ;;  %184 = vrot.lane.b32.xlu0 %v767_v5, %s671_s19 }
  0x46   :  { %202 = vrot.lane.b32.xlu1 %v776_v6, %s671_s19  ;;  %200 = vrot.lane.b32.xlu0 %v781_v7, %s671_s19 }
  0x4a   :  { %235 = vrot.lane.b32.xlu1 %v762_v4, %s672_s20  ;;  %233 = vrot.lane.b32.xlu0 %v767_v5, %s672_s20 }
  0x4e   :  { %251 = vrot.lane.b32.xlu1 %v776_v6, %s672_s20  ;;  %249 = vrot.lane.b32.xlu0 %v781_v7, %s672_s20 }
  0x52   :  { %316 = vrot.lane.b32.xlu1 %v762_v4, %s673_s21  ;;  %314 = vrot.lane.b32.xlu0 %v767_v5, %s673_s21 }
  0x56   :  { %332 = vrot.lane.b32.xlu1 %v776_v6, %s673_s21  ;;  %330 = vrot.lane.b32.xlu0 %v781_v7, %s673_s21 }
  0x5a   :  { %365 = vrot.lane.b32.xlu1 %v762_v4, %s674_s22  ;;  %363 = vrot.lane.b32.xlu0 %v767_v5, %s674_s22 }
  0x5e   :  { %381 = vrot.lane.b32.xlu1 %v776_v6, %s674_s22  ;;  %379 = vrot.lane.b32.xlu0 %v781_v7, %s674_s22 }
  0x62   :  { %76 = vrot.lane.b32.xlu1 %v830_v8, %s669_s13  ;;  %74 = vrot.lane.b32.xlu0 %v835_v9, %s669_s13 }
  0x66   :  { %92 = vrot.lane.b32.xlu1 %v844_v10, %s669_s13  ;;  %90 = vrot.lane.b32.xlu0 %v849_v11, %s669_s13 }
  0x6a   :  { %125 = vrot.lane.b32.xlu1 %v830_v8, %s670_s18  ;;  %123 = vrot.lane.b32.xlu0 %v835_v9, %s670_s18 }
  0x6e   :  { %141 = vrot.lane.b32.xlu1 %v844_v10, %s670_s18  ;;  %139 = vrot.lane.b32.xlu0 %v849_v11, %s670_s18 }
  0x72   :  { %190 = vrot.lane.b32.xlu1 %v830_v8, %s671_s19  ;;  %188 = vrot.lane.b32.xlu0 %v835_v9, %s671_s19 }
  0x74   :  { %v83_v12 = vpop.permute.xlu1 %82  ;;  %v67_v13 = vpop.permute.xlu0 %66 }
  0x75   :  { %v99_v41 = vsel %vm98_vm0, %v67_v13, %v83_v12  ;;  %v107_v42 = vsel %vm98_vm0, %v83_v12, %v67_v13 }
  0x76   :  { %206 = vrot.lane.b32.xlu1 %v844_v10, %s671_s19  ;;  %204 = vrot.lane.b32.xlu0 %v849_v11, %s671_s19 }
  0x78   :  { %v85_v14 = vpop.permute.xlu1 %84  ;;  %v69_v15 = vpop.permute.xlu0 %68 }
  0x79   :  { %v100_v43 = vsel %vm98_vm0, %v69_v15, %v85_v14  ;;  %v108_v44 = vsel %vm98_vm0, %v85_v14, %v69_v15 }
  0x7a   :  { %239 = vrot.lane.b32.xlu1 %v830_v8, %s672_s20  ;;  %237 = vrot.lane.b32.xlu0 %v835_v9, %s672_s20 }
  0x7c   :  { %v118_v16 = vpop.permute.xlu1 %117  ;;  %v116_v17 = vpop.permute.xlu0 %115 }
  0x7e   :  { %255 = vrot.lane.b32.xlu1 %v844_v10, %s672_s20  ;;  %253 = vrot.lane.b32.xlu0 %v849_v11, %s672_s20 }
  0x80   :  { %v134_v18 = vpop.permute.xlu1 %133  ;;  %v132_v19 = vpop.permute.xlu0 %131 }
  0x81   :  { %v149_v51 = vsel %vm147_vm1, %v118_v16, %v134_v18  ;;  %v157_v52 = vsel %vm147_vm1, %v134_v18, %v118_v16  ;;  %v148_v53 = vsel %vm147_vm1, %v116_v17, %v132_v19  ;;  %v156_v54 = vsel %vm147_vm1, %v132_v19, %v116_v17  ;;  %v11_v18 = vld [vmem:[%s1350_s1] sm:$0xff] }
  0x82   :  { %320 = vrot.lane.b32.xlu1 %v830_v8, %s673_s21  ;;  %318 = vrot.lane.b32.xlu0 %v835_v9, %s673_s21  ;;  %v166_v13 = vadd.f32 %v157_v52, %v100_v43  ;;  %v167_v14 = vadd.f32 %v149_v51, %v108_v44  ;;  %v164_v15 = vadd.f32 %v156_v54, %v99_v41 }
  0x83   :  { %v165_v16 = vadd.f32 %v148_v53, %v107_v42 }
  0x84   :  { %v183_v20 = vpop.permute.xlu1 %182  ;;  %v181_v21 = vpop.permute.xlu0 %180 }
  0x86   :  { %336 = vrot.lane.b32.xlu1 %v844_v10, %s673_s21  ;;  %334 = vrot.lane.b32.xlu0 %v849_v11, %s673_s21 }
  0x88   :  { %v199_v22 = vpop.permute.xlu1 %198  ;;  %v197_v23 = vpop.permute.xlu0 %196 }
  0x89   :  { %v214_v55 = vsel %vm212_vm3, %v183_v20, %v199_v22  ;;  %v222_v56 = vsel %vm212_vm3, %v199_v22, %v183_v20  ;;  %v213_v57 = vsel %vm212_vm3, %v181_v21, %v197_v23  ;;  %v221_v58 = vsel %vm212_vm3, %v197_v23, %v181_v21 }
  0x8a   :  { %369 = vrot.lane.b32.xlu1 %v830_v8, %s674_s22  ;;  %367 = vrot.lane.b32.xlu0 %v835_v9, %s674_s22 }
  0x8c   :  { %v232_v25 = vpop.permute.xlu1 %231  ;;  %v230_v26 = vpop.permute.xlu0 %229 }
  0x8e   :  { %385 = vrot.lane.b32.xlu1 %v844_v10, %s674_s22  ;;  %383 = vrot.lane.b32.xlu0 %v849_v11, %s674_s22 }
  0x90   :  { %v248_v30 = vpop.permute.xlu1 %247  ;;  %v246_v31 = vpop.permute.xlu0 %245 }
  0x91   :  { %v263_v47 = vsel %vm261_vm2, %v232_v25, %v248_v30  ;;  %v271_v48 = vsel %vm261_vm2, %v248_v30, %v232_v25  ;;  %v262_v49 = vsel %vm261_vm2, %v230_v26, %v246_v31  ;;  %v270_v50 = vsel %vm261_vm2, %v246_v31, %v230_v26 }
  0x92   :  { %80 = vrot.lane.b32.xlu1 %v901_v29, %s669_s13  ;;  %78 = vrot.lane.b32.xlu0 %v906_v32, %s669_s13  ;;  %v280_v59 = vsel %vm929_vm4, %v222_v56, %v263_v47  ;;  %v281_v60 = vsel %vm933_vm5, %v214_v55, %v271_v48  ;;  %v278_v61 = vsel %vm929_vm4, %v221_v58, %v262_v49 }
  0x93   :  { %v279_v62 = vsel %vm933_vm5, %v213_v57, %v270_v50  ;;  %v296_v19 = vadd.f32 %v280_v59, %v166_v13  ;;  %v297_v20 = vadd.f32 %v281_v60, %v167_v14  ;;  %v294_v21 = vadd.f32 %v278_v61, %v164_v15 }
  0x94   :  { %v313_v36 = vpop.permute.xlu1 %312  ;;  %v311_v37 = vpop.permute.xlu0 %310  ;;  %v295_v22 = vadd.f32 %v279_v62, %v165_v16  ;;  %v675_v16 = vmov 0.0  }
  0x95   :  { %561 = vmatprep.mubr.f32.mxu0 %v675_v16  ;;  %585 = vmatprep.mubr.f32.mxu1 %v675_v16 }
  0x96   :  { %96 = vrot.lane.b32.xlu1 %v916_v35, %s669_s13  ;;  %94 = vrot.lane.b32.xlu0 %v921_v38, %s669_s13 }
  0x98   :  { %v329_v45 = vpop.permute.xlu1 %328  ;;  %v327_v46 = vpop.permute.xlu0 %326 }
  0x99   :  { %v344_v23 = vsel %vm342_vm6, %v313_v36, %v329_v45  ;;  %v352_v24 = vsel %vm342_vm6, %v329_v45, %v313_v36  ;;  %v343_v25 = vsel %vm342_vm6, %v311_v37, %v327_v46  ;;  %v351_v26 = vsel %vm342_vm6, %v327_v46, %v311_v37 }
  0x9a   :  { %129 = vrot.lane.b32.xlu1 %v901_v29, %s670_s18  ;;  %127 = vrot.lane.b32.xlu0 %v906_v32, %s670_s18 }
  0x9c   :  { %v362_v63 = vpop.permute.xlu1 %361  ;;  %v360_v12 = vpop.permute.xlu0 %359 }
  0x9e   :  { %145 = vrot.lane.b32.xlu1 %v916_v35, %s670_s18  ;;  %143 = vrot.lane.b32.xlu0 %v921_v38, %s670_s18 }
  0xa0   :  { %v378_v28 = vpop.permute.xlu1 %377  ;;  %v376_v30 = vpop.permute.xlu0 %375 }
  0xa1   :  { %v393_v31 = vsel %vm391_vm9, %v362_v63, %v378_v28  ;;  %v401_v33 = vsel %vm391_vm9, %v378_v28, %v362_v63  ;;  %v392_v34 = vsel %vm391_vm9, %v360_v12, %v376_v30  ;;  %v400_v36 = vsel %vm391_vm9, %v376_v30, %v360_v12 }
  0xa2   :  { %v410_v41 = vsel %vm986_vm7, %v344_v23, %v401_v33  ;;  %v411_v37 = vsel %vm990_vm8, %v352_v24, %v393_v31  ;;  %v408_v42 = vsel %vm986_vm7, %v343_v25, %v400_v36  ;;  %v409_v43 = vsel %vm990_vm8, %v351_v26, %v392_v34  ;;  %194 = vrot.lane.b32.xlu1 %v901_v29, %s671_s19 }
  0xa3   :  { %v426_v44 = vadd.f32 %v410_v41, %v296_v19  ;;  %v427_v45 = vadd.f32 %v411_v37, %v297_v20  ;;  %v424_v46 = vadd.f32 %v408_v42, %v294_v21  ;;  %v425_v47 = vadd.f32 %v409_v43, %v295_v22  ;;  %192 = vrot.lane.b32.xlu0 %v906_v32, %s671_s19 }
  0xa4   :  { %v73_v48 = vpop.permute.xlu1 %72  ;;  %v71_v49 = vpop.permute.xlu0 %70 }
  0xa5   :  { %v441_v50 = vmul.f32 0.1, %v425_v47  ;;  %v443_v51 = vmul.f32 0.1, %v427_v45  ;;  %v440_v52 = vmul.f32 0.1, %v424_v46 }
  0xa6   :  { %210 = vrot.lane.b32.xlu1 %v916_v35, %s671_s19  ;;  %v442_v53 = vmul.f32 0.1, %v426_v44 }
  0xa7   :  { %208 = vrot.lane.b32.xlu0 %v921_v38, %s671_s19  ;;  %v457_v54 = vadd.f32 %v441_v50, %v694_v0  ;;  %v459_v55 = vadd.f32 %v443_v51, %v708_v2  ;;  %v456_v56 = vadd.f32 %v440_v52, %v699_v1 }
  0xa8   :  { %v89_v57 = vpop.permute.xlu1 %88  ;;  %v87_v58 = vpop.permute.xlu0 %86  ;;  %v458_v59 = vadd.f32 %v442_v53, %v713_v3 }
  0xa9   :  { %v638_v60 = vpack.c.bf16 %v459_v55, %v457_v54  ;;  %v102_v23 = vsel %vm98_vm0, %v73_v48, %v89_v57  ;;  %v110_v24 = vsel %vm98_vm0, %v89_v57, %v73_v48  ;;  %v101_v25 = vsel %vm98_vm0, %v71_v49, %v87_v58 }
  0xaa   :  { %243 = vrot.lane.b32.xlu1 %v901_v29, %s672_s20  ;;  %v640_v61 = vpack.c.bf16 %v458_v59, %v456_v56  ;;  %v109_v26 = vsel %vm98_vm0, %v87_v58, %v71_v49 }
  0xab   :  { %241 = vrot.lane.b32.xlu0 %v906_v32, %s672_s20  ;;  %639 = vmatprep.subr.bf16.mxu0 %v638_v60 }
  0xac   :  { %654 = vmatprep.subr.bf16.mxu1 %v638_v60  ;;  %v122_v62 = vpop.permute.xlu1 %121  ;;  %v120_v0 = vpop.permute.xlu0 %119  ;;  %641 = vmatpush1.bf16.msra.mxu0 %v640_v61 }
  0xad   :  { %658 = vmatpush1.bf16.msra.mxu1 %v640_v61 }
  0xae   :  { %259 = vrot.lane.b32.xlu1 %v916_v35, %s672_s20 }
  0xaf   :  { %257 = vrot.lane.b32.xlu0 %v921_v38, %s672_s20 }
  0xb0   :  { %v138_v1 = vpop.permute.xlu1 %137  ;;  %v136_v2 = vpop.permute.xlu0 %135 }
  0xb1   :  { %v151_v41 = vsel %vm147_vm1, %v122_v62, %v138_v1  ;;  %v159_v37 = vsel %vm147_vm1, %v138_v1, %v122_v62  ;;  %v150_v42 = vsel %vm147_vm1, %v120_v0, %v136_v2  ;;  %v158_v43 = vsel %vm147_vm1, %v136_v2, %v120_v0 }
  0xb2   :  { %324 = vrot.lane.b32.xlu1 %v901_v29, %s673_s21  ;;  %v170_v54 = vadd.f32 %v159_v37, %v102_v23  ;;  %v171_v55 = vadd.f32 %v151_v41, %v110_v24  ;;  %v168_v56 = vadd.f32 %v158_v43, %v101_v25  ;;  %v169_v57 = vadd.f32 %v150_v42, %v109_v26 }
  0xb3   :  { %322 = vrot.lane.b32.xlu0 %v906_v32, %s673_s21 }
  0xb4   :  { %v187_v3 = vpop.permute.xlu1 %186  ;;  %v185_v63 = vpop.permute.xlu0 %184 }
  0xb6   :  { %340 = vrot.lane.b32.xlu1 %v916_v35, %s673_s21 }
  0xb7   :  { %338 = vrot.lane.b32.xlu0 %v921_v38, %s673_s21 }
  0xb8   :  { %v203_v12 = vpop.permute.xlu1 %202  ;;  %v201_v13 = vpop.permute.xlu0 %200 }
  0xb9   :  { %v216_v44 = vsel %vm212_vm3, %v187_v3, %v203_v12  ;;  %v224_v45 = vsel %vm212_vm3, %v203_v12, %v187_v3  ;;  %v215_v46 = vsel %vm212_vm3, %v185_v63, %v201_v13  ;;  %v223_v47 = vsel %vm212_vm3, %v201_v13, %v185_v63 }
  0xba   :  { %373 = vrot.lane.b32.xlu1 %v901_v29, %s674_s22 }
  0xbb   :  { %371 = vrot.lane.b32.xlu0 %v906_v32, %s674_s22 }
  0xbc   :  { %v236_v14 = vpop.permute.xlu1 %235  ;;  %v234_v15 = vpop.permute.xlu0 %233 }
  0xbe   :  { %389 = vrot.lane.b32.xlu1 %v916_v35, %s674_s22 }
  0xbf   :  { %387 = vrot.lane.b32.xlu0 %v921_v38, %s674_s22 }
  0xc0   :  { %v252_v19 = vpop.permute.xlu1 %251  ;;  %v250_v20 = vpop.permute.xlu0 %249 }
  0xc1   :  { %v265_v31 = vsel %vm261_vm2, %v236_v14, %v252_v19  ;;  %v273_v33 = vsel %vm261_vm2, %v252_v19, %v236_v14  ;;  %v264_v34 = vsel %vm261_vm2, %v234_v15, %v250_v20  ;;  %v272_v36 = vsel %vm261_vm2, %v250_v20, %v234_v15 }
  0xc2   :  { %v284_v48 = vsel %vm929_vm4, %v224_v45, %v265_v31  ;;  %v285_v49 = vsel %vm933_vm5, %v216_v44, %v273_v33  ;;  %v282_v50 = vsel %vm929_vm4, %v223_v47, %v264_v34  ;;  %v283_v51 = vsel %vm933_vm5, %v215_v46, %v272_v36 }
  0xc3   :  { %v300_v58 = vadd.f32 %v284_v48, %v170_v54  ;;  %v301_v59 = vadd.f32 %v285_v49, %v171_v55  ;;  %v298_v60 = vadd.f32 %v282_v50, %v168_v56  ;;  %v299_v61 = vadd.f32 %v283_v51, %v169_v57 }
  0xc4   :  { %v317_v21 = vpop.permute.xlu1 %316  ;;  %v315_v22 = vpop.permute.xlu0 %314 }
  0xc8   :  { %v333_v28 = vpop.permute.xlu1 %332  ;;  %v331_v30 = vpop.permute.xlu0 %330 }
  0xc9   :  { %v346_v62 = vsel %vm342_vm6, %v317_v21, %v333_v28  ;;  %v354_v0 = vsel %vm342_vm6, %v333_v28, %v317_v21  ;;  %v345_v1 = vsel %vm342_vm6, %v315_v22, %v331_v30  ;;  %v353_v2 = vsel %vm342_vm6, %v331_v30, %v315_v22 }
  0xcc   :  { %v366_v52 = vpop.permute.xlu1 %365  ;;  %v364_v53 = vpop.permute.xlu0 %363 }
  0xd0   :  { %v382_v3 = vpop.permute.xlu1 %381  ;;  %v380_v63 = vpop.permute.xlu0 %379 }
  0xd1   :  { %v395_v12 = vsel %vm391_vm9, %v366_v52, %v382_v3  ;;  %v403_v13 = vsel %vm391_vm9, %v382_v3, %v366_v52  ;;  %v394_v14 = vsel %vm391_vm9, %v364_v53, %v380_v63  ;;  %v402_v15 = vsel %vm391_vm9, %v380_v63, %v364_v53 }
  0xd2   :  { %v414_v19 = vsel %vm986_vm7, %v346_v62, %v403_v13  ;;  %v415_v20 = vsel %vm990_vm8, %v354_v0, %v395_v12  ;;  %v412_v21 = vsel %vm986_vm7, %v345_v1, %v402_v15  ;;  %v413_v22 = vsel %vm990_vm8, %v353_v2, %v394_v14 }
  0xd3   :  { %v430_v23 = vadd.f32 %v414_v19, %v300_v58  ;;  %v431_v24 = vadd.f32 %v415_v20, %v301_v59  ;;  %v428_v25 = vadd.f32 %v412_v21, %v298_v60  ;;  %v429_v26 = vadd.f32 %v413_v22, %v299_v61 }
  0xd4   :  { %v77_v28 = vpop.permute.xlu1 %76  ;;  %v75_v30 = vpop.permute.xlu0 %74 }
  0xd5   :  { %v446_v31 = vmul.f32 0.1, %v430_v23  ;;  %v447_v33 = vmul.f32 0.1, %v431_v24  ;;  %v444_v34 = vmul.f32 0.1, %v428_v25 }
  0xd6   :  { %v445_v36 = vmul.f32 0.1, %v429_v26 }
  0xd7   :  { %v463_v41 = vadd.f32 %v447_v33, %v776_v6  ;;  %v460_v37 = vadd.f32 %v444_v34, %v767_v5  ;;  %v462_v42 = vadd.f32 %v446_v31, %v762_v4 }
  0xd8   :  { %v93_v43 = vpop.permute.xlu1 %92  ;;  %v91_v44 = vpop.permute.xlu0 %90  ;;  %v461_v45 = vadd.f32 %v445_v36, %v781_v7 }
  0xd9   :  { %v644_v47 = vpack.c.bf16 %v462_v42, %v460_v37  ;;  %v104_v58 = vsel %vm98_vm0, %v77_v28, %v93_v43  ;;  %v112_v59 = vsel %vm98_vm0, %v93_v43, %v77_v28  ;;  %v103_v61 = vsel %vm98_vm0, %v75_v30, %v91_v44 }
  0xda   :  { %v642_v46 = vpack.c.bf16 %v463_v41, %v461_v45  ;;  %v111_v62 = vsel %vm98_vm0, %v91_v44, %v75_v30 }
  0xdc   :  { %643 = vmatprep.subr.bf16.mxu0 %v642_v46  ;;  %655 = vmatprep.subr.bf16.mxu1 %v642_v46  ;;  %v126_v48 = vpop.permute.xlu1 %125  ;;  %v124_v49 = vpop.permute.xlu0 %123 }
  0xdd   :  { %645 = vmatpush1.bf16.msra.mxu0 %v644_v47  ;;  %659 = vmatpush1.bf16.msra.mxu1 %v644_v47 }
  0xe0   :  { %v142_v50 = vpop.permute.xlu1 %141  ;;  %v140_v51 = vpop.permute.xlu0 %139 }
  0xe1   :  { %v153_v3 = vsel %vm147_vm1, %v126_v48, %v142_v50  ;;  %v161_v63 = vsel %vm147_vm1, %v142_v50, %v126_v48  ;;  %v152_v14 = vsel %vm147_vm1, %v124_v49, %v140_v51  ;;  %v160_v15 = vsel %vm147_vm1, %v140_v51, %v124_v49 }
  0xe2   :  { %v174_v26 = vadd.f32 %v161_v63, %v104_v58  ;;  %v175_v28 = vadd.f32 %v153_v3, %v112_v59  ;;  %v172_v34 = vadd.f32 %v160_v15, %v103_v61  ;;  %v173_v36 = vadd.f32 %v152_v14, %v111_v62 }
  0xe4   :  { %v191_v52 = vpop.permute.xlu1 %190  ;;  %v189_v6 = vpop.permute.xlu0 %188 }
  0xe8   :  { %v207_v53 = vpop.permute.xlu1 %206  ;;  %v205_v5 = vpop.permute.xlu0 %204 }
  0xe9   :  { %v218_v19 = vsel %vm212_vm3, %v191_v52, %v207_v53  ;;  %v226_v20 = vsel %vm212_vm3, %v207_v53, %v191_v52  ;;  %v217_v21 = vsel %vm212_vm3, %v189_v6, %v205_v5  ;;  %v225_v22 = vsel %vm212_vm3, %v205_v5, %v189_v6 }
  0xec   :  { %v240_v54 = vpop.permute.xlu1 %239  ;;  %v238_v4 = vpop.permute.xlu0 %237 }
  0xf0   :  { %v256_v55 = vpop.permute.xlu1 %255  ;;  %v254_v56 = vpop.permute.xlu0 %253 }
  0xf1   :  { %v267_v0 = vsel %vm261_vm2, %v240_v54, %v256_v55  ;;  %v275_v1 = vsel %vm261_vm2, %v256_v55, %v240_v54  ;;  %v266_v12 = vsel %vm261_vm2, %v238_v4, %v254_v56  ;;  %v274_v13 = vsel %vm261_vm2, %v254_v56, %v238_v4 }
  0xf2   :  { %v288_v23 = vsel %vm929_vm4, %v226_v20, %v267_v0  ;;  %v289_v24 = vsel %vm933_vm5, %v218_v19, %v275_v1  ;;  %v286_v30 = vsel %vm929_vm4, %v225_v22, %v266_v12  ;;  %v287_v31 = vsel %vm933_vm5, %v217_v21, %v274_v13 }
  0xf3   :  { %v304_v41 = vadd.f32 %v288_v23, %v174_v26  ;;  %v305_v37 = vadd.f32 %v289_v24, %v175_v28  ;;  %v302_v42 = vadd.f32 %v286_v30, %v172_v34  ;;  %v303_v43 = vadd.f32 %v287_v31, %v173_v36 }
  0xf4   :  { %v321_v57 = vpop.permute.xlu1 %320  ;;  %v319_v7 = vpop.permute.xlu0 %318 }
  0xf8   :  { %v337_v60 = vpop.permute.xlu1 %336  ;;  %v335_v2 = vpop.permute.xlu0 %334 }
  0xf9   :  { %v348_v44 = vsel %vm342_vm6, %v321_v57, %v337_v60  ;;  %v356_v45 = vsel %vm342_vm6, %v337_v60, %v321_v57  ;;  %v347_v47 = vsel %vm342_vm6, %v319_v7, %v335_v2  ;;  %v355_v48 = vsel %vm342_vm6, %v335_v2, %v319_v7 }
  0xfc   :  { %v370_v25 = vpop.permute.xlu1 %369  ;;  %v368_v33 = vpop.permute.xlu0 %367 }
 0x100   :  { %v386_v46 = vpop.permute.xlu1 %385  ;;  %v384_v51 = vpop.permute.xlu0 %383 }
 0x101   :  { %v397_v49 = vsel %vm391_vm9, %v370_v25, %v386_v46  ;;  %v405_v50 = vsel %vm391_vm9, %v386_v46, %v370_v25  ;;  %v396_v53 = vsel %vm391_vm9, %v368_v33, %v384_v51  ;;  %v404_v5 = vsel %vm391_vm9, %v384_v51, %v368_v33 }
 0x102   :  { %v418_v52 = vsel %vm986_vm7, %v348_v44, %v405_v50  ;;  %v419_v6 = vsel %vm990_vm8, %v356_v45, %v397_v49  ;;  %v416_v55 = vsel %vm986_vm7, %v347_v47, %v404_v5  ;;  %v417_v56 = vsel %vm990_vm8, %v355_v48, %v396_v53 }
 0x103   :  { %v434_v54 = vadd.f32 %v418_v52, %v304_v41  ;;  %v435_v4 = vadd.f32 %v419_v6, %v305_v37  ;;  %v432_v57 = vadd.f32 %v416_v55, %v302_v42  ;;  %v433_v7 = vadd.f32 %v417_v56, %v303_v43 }
 0x104   :  { %v81_v58 = vpop.permute.xlu1 %80  ;;  %v79_v61 = vpop.permute.xlu0 %78 }
 0x105   :  { %v450_v59 = vmul.f32 0.1, %v434_v54  ;;  %v451_v60 = vmul.f32 0.1, %v435_v4  ;;  %v448_v62 = vmul.f32 0.1, %v432_v57 }
 0x106   :  { %v449_v0 = vmul.f32 0.1, %v433_v7 }
 0x107   :  { %v467_v1 = vadd.f32 %v451_v60, %v844_v10  ;;  %v466_v2 = vadd.f32 %v450_v59, %v830_v8  ;;  %v464_v12 = vadd.f32 %v448_v62, %v835_v9 }
 0x108   :  { %v97_v3 = vpop.permute.xlu1 %96  ;;  %v465_v63 = vadd.f32 %v449_v0, %v849_v11  ;;  %v95_v13 = vpop.permute.xlu0 %94 }
 0x109   :  { %v648_v15 = vpack.c.bf16 %v466_v2, %v464_v12  ;;  %v106_v31 = vsel %vm98_vm0, %v81_v58, %v97_v3  ;;  %v114_v33 = vsel %vm98_vm0, %v97_v3, %v81_v58  ;;  %v105_v36 = vsel %vm98_vm0, %v79_v61, %v95_v13 }
 0x10a   :  { %v646_v14 = vpack.c.bf16 %v467_v1, %v465_v63  ;;  %v113_v41 = vsel %vm98_vm0, %v95_v13, %v79_v61 }
 0x10c   :  { %647 = vmatprep.subr.bf16.mxu0 %v646_v14  ;;  %656 = vmatprep.subr.bf16.mxu1 %v646_v14  ;;  %v130_v19 = vpop.permute.xlu1 %129  ;;  %v128_v20 = vpop.permute.xlu0 %127 }
 0x10d   :  { %649 = vmatpush1.bf16.msra.mxu0 %v648_v15  ;;  %660 = vmatpush1.bf16.msra.mxu1 %v648_v15 }
 0x110   :  { %v146_v21 = vpop.permute.xlu1 %145  ;;  %v144_v22 = vpop.permute.xlu0 %143 }
 0x111   :  { %v155_v44 = vsel %vm147_vm1, %v130_v19, %v146_v21  ;;  %v163_v45 = vsel %vm147_vm1, %v146_v21, %v130_v19  ;;  %v154_v48 = vsel %vm147_vm1, %v128_v20, %v144_v22  ;;  %v162_v49 = vsel %vm147_vm1, %v144_v22, %v128_v20 }
 0x112   :  { %v178_v4 = vadd.f32 %v163_v45, %v106_v31  ;;  %v179_v55 = vadd.f32 %v155_v44, %v114_v33  ;;  %v176_v58 = vadd.f32 %v162_v49, %v105_v36  ;;  %v177_v59 = vadd.f32 %v154_v48, %v113_v41  ;;  %v14_v36 = vld [vmem:[%s1350_s1 + $0x18] sm:$0xff] }
 0x113   :  { %v18_v41 = vld [vmem:[%s1350_s1 + $0x38] sm:$0xff] }
 0x114   :  { %v195_v23 = vpop.permute.xlu1 %194 }
 0x115   :  { %v193_v10 = vpop.permute.xlu0 %192 }
 0x118   :  { %v211_v24 = vpop.permute.xlu1 %210 }
 0x119   :  { %v209_v8 = vpop.permute.xlu0 %208  ;;  %v220_v50 = vsel %vm212_vm3, %v195_v23, %v211_v24  ;;  %v228_v51 = vsel %vm212_vm3, %v211_v24, %v195_v23 }
 0x11a   :  { %v219_v52 = vsel %vm212_vm3, %v193_v10, %v209_v8  ;;  %v227_v6 = vsel %vm212_vm3, %v209_v8, %v193_v10 }
 0x11c   :  { %v244_v25 = vpop.permute.xlu1 %243 }
 0x11d   :  { %v242_v26 = vpop.permute.xlu0 %241 }
 0x120   :  { %v260_v11 = vpop.permute.xlu1 %259 }
 0x121   :  { %v258_v28 = vpop.permute.xlu0 %257  ;;  %v269_v37 = vsel %vm261_vm2, %v244_v25, %v260_v11  ;;  %v277_v42 = vsel %vm261_vm2, %v260_v11, %v244_v25 }
 0x122   :  { %v268_v46 = vsel %vm261_vm2, %v242_v26, %v258_v28  ;;  %v276_v47 = vsel %vm261_vm2, %v258_v28, %v242_v26  ;;  %v292_v53 = vsel %vm929_vm4, %v228_v51, %v269_v37  ;;  %v293_v5 = vsel %vm933_vm5, %v220_v50, %v277_v42 }
 0x123   :  { %v290_v56 = vsel %vm929_vm4, %v227_v6, %v268_v46  ;;  %v291_v57 = vsel %vm933_vm5, %v219_v52, %v276_v47  ;;  %v308_v60 = vadd.f32 %v292_v53, %v178_v4  ;;  %v309_v61 = vadd.f32 %v293_v5, %v179_v55 }
 0x124   :  { %v325_v9 = vpop.permute.xlu1 %324  ;;  %v306_v62 = vadd.f32 %v290_v56, %v176_v58  ;;  %v307_v0 = vadd.f32 %v291_v57, %v177_v59 }
 0x125   :  { %v323_v30 = vpop.permute.xlu0 %322 }
 0x128   :  { %v341_v34 = vpop.permute.xlu1 %340 }
 0x129   :  { %v339_v43 = vpop.permute.xlu0 %338  ;;  %v350_v1 = vsel %vm342_vm6, %v325_v9, %v341_v34  ;;  %v358_v2 = vsel %vm342_vm6, %v341_v34, %v325_v9  ;;  %v17_v34 = vld [vmem:[%s1350_s1 + $0x30] sm:$0xff] }
 0x12a   :  { %v349_v39 = vsel %vm342_vm6, %v323_v30, %v339_v43  ;;  %v357_v40 = vsel %vm342_vm6, %v339_v43, %v323_v30 }
 0x12c   :  { %v374_v54 = vpop.permute.xlu1 %373 }
 0x12d   :  { %v372_v7 = vpop.permute.xlu0 %371 }
 0x130   :  { %v390_v3 = vpop.permute.xlu1 %389 }
 0x131   :  { %v399_v63 = vsel %vm391_vm9, %v374_v54, %v390_v3  ;;  %v407_v12 = vsel %vm391_vm9, %v390_v3, %v374_v54  ;;  %v388_v13 = vpop.permute.xlu0 %387 }
 0x132   :  { %v422_v14 = vsel %vm986_vm7, %v350_v1, %v407_v12  ;;  %v423_v15 = vsel %vm990_vm8, %v358_v2, %v399_v63  ;;  %v398_v19 = vsel %vm391_vm9, %v372_v7, %v388_v13  ;;  %v406_v20 = vsel %vm391_vm9, %v388_v13, %v372_v7 }
 0x133   :  { %v438_v21 = vadd.f32 %v422_v14, %v308_v60  ;;  %v439_v22 = vadd.f32 %v423_v15, %v309_v61  ;;  %v420_v23 = vsel %vm986_vm7, %v349_v39, %v406_v20  ;;  %v421_v10 = vsel %vm990_vm8, %v357_v40, %v398_v19 }
 0x134   :  { %v436_v24 = vadd.f32 %v420_v23, %v306_v62  ;;  %v437_v8 = vadd.f32 %v421_v10, %v307_v0 }
 0x135   :  { %v454_v25 = vmul.f32 0.1, %v438_v21  ;;  %v455_v26 = vmul.f32 0.1, %v439_v22 }
 0x136   :  { %v452_v11 = vmul.f32 0.1, %v436_v24  ;;  %v453_v28 = vmul.f32 0.1, %v437_v8 }
 0x137   :  { %v471_v9 = vadd.f32 %v455_v26, %v916_v35  ;;  %v470_v30 = vadd.f32 %v454_v25, %v901_v29  ;;  %v15_v35 = vld [vmem:[%s1350_s1 + $0x20] sm:$0xff]  ;;  %v12_v29 = vld [vmem:[%s1350_s1 + $0x8] sm:$0xff] }
 0x138   :  { %v469_v27 = vadd.f32 %v453_v28, %v921_v38  ;;  %v468_v31 = vadd.f32 %v452_v11, %v906_v32  ;;  %v16_v32 = vld [vmem:[%s1350_s1 + $0x28] sm:$0xff]  ;;  %v13_v38 = vld [vmem:[%s1350_s1 + $0x10] sm:$0xff] }
 0x13a   :  { %v650_v33 = vpack.c.bf16 %v471_v9, %v469_v27  ;;  %v652_v17 = vpack.c.bf16 %v470_v30, %v468_v31 }
 0x13c   :  { %651 = vmatprep.subr.bf16.mxu0 %v650_v33  ;;  %657 = vmatprep.subr.bf16.mxu1 %v650_v33 }
 0x13d   :  { %653 = vmatpush1.bf16.msra.mxu0 %v652_v17  ;;  %661 = vmatpush1.bf16.msra.mxu1 %v652_v17 }
 0x140   :  { %630 = vmatmul.mubr.msk.f32.vlgmr.msra.gmra.mrb[0].mxu0 %vm472_vm10, %v11_v18  ;;  %634 = vmatmul.mubr.msk.f32.vlgmr.msra.gmra.mrb[0].mxu1 %vm472_vm10, %v15_v35 }
 0x141   :  { %567 = vmatprep.mubr.f32.mxu0 %v675_v16  ;;  %591 = vmatprep.mubr.f32.mxu1 %v675_v16 }
 0x144   :  { %631 = vmatmul.mubr.msk.f32.gmra.mrb[2].mxu0 %vm472_vm10, %v12_v29  ;;  %635 = vmatmul.mubr.msk.f32.gmra.mrb[2].mxu1 %vm472_vm10, %v16_v32 }
 0x145   :  { %573 = vmatprep.mubr.f32.mxu0 %v675_v16  ;;  %597 = vmatprep.mubr.f32.mxu1 %v675_v16 }
 0x148   :  { %632 = vmatmul.mubr.msk.f32.gmra.mrb[4].mxu0 %vm472_vm10, %v13_v38  ;;  %636 = vmatmul.mubr.msk.f32.gmra.mrb[4].mxu1 %vm472_vm10, %v17_v34 }
 0x149   :  { %579 = vmatprep.mubr.f32.mxu0 %v675_v16  ;;  %603 = vmatprep.mubr.f32.mxu1 %v675_v16 }
 0x14c   :  { %633 = vmatmul.mubr.msk.f32.gmra.mrb[6].mxu0 %vm472_vm10, %v14_v36  ;;  %637 = vmatmul.mubr.msk.f32.gmra.mrb[6].mxu1 %vm472_vm10, %v18_v41 }
 0x213   :  { %v563_v37 = vpop.f32.mrb[0].mxu0  ;;  %v587_v42 = vpop.f32.mrb[0].mxu1 }
 0x214   :  { %610 = vst [vmem:[%s1351_s2] sm:$0xff] %v563_v37  ;;  %618 = vst [vmem:[%s1351_s2 + $0x40] sm:$0xff] %v587_v42  ;;  %v565_v16 = vpop.f32.mrb[1].mxu0  ;;  %v589_v43 = vpop.f32.mrb[1].mxu1 }
 0x215   :  { %611 = vst [vmem:[%s1351_s2 + $0x8] sm:$0xff] %v565_v16  ;;  %619 = vst [vmem:[%s1351_s2 + $0x48] sm:$0xff] %v589_v43 }
 0x217   :  { %v569_v44 = vpop.f32.mrb[2].mxu0  ;;  %v593_v45 = vpop.f32.mrb[2].mxu1 }
 0x218   :  { %612 = vst [vmem:[%s1351_s2 + $0x10] sm:$0xff] %v569_v44  ;;  %620 = vst [vmem:[%s1351_s2 + $0x50] sm:$0xff] %v593_v45  ;;  %v571_v46 = vpop.f32.mrb[3].mxu0  ;;  %v595_v47 = vpop.f32.mrb[3].mxu1 }
 0x219   :  { %613 = vst [vmem:[%s1351_s2 + $0x18] sm:$0xff] %v571_v46  ;;  %621 = vst [vmem:[%s1351_s2 + $0x58] sm:$0xff] %v595_v47 }
 0x21b   :  { %v575_v48 = vpop.f32.mrb[4].mxu0  ;;  %v599_v49 = vpop.f32.mrb[4].mxu1 }
 0x21c   :  { %614 = vst [vmem:[%s1351_s2 + $0x20] sm:$0xff] %v575_v48  ;;  %622 = vst [vmem:[%s1351_s2 + $0x60] sm:$0xff] %v599_v49  ;;  %v577_v50 = vpop.f32.mrb[5].mxu0  ;;  %v601_v51 = vpop.f32.mrb[5].mxu1 }
 0x21d   :  { %615 = vst [vmem:[%s1351_s2 + $0x28] sm:$0xff] %v577_v50  ;;  %623 = vst [vmem:[%s1351_s2 + $0x68] sm:$0xff] %v601_v51 }
 0x21f   :  { %v581_v52 = vpop.f32.mrb[6].mxu0  ;;  %v605_v6 = vpop.f32.mrb[6].mxu1 }
 0x220   :  { %616 = vst [vmem:[%s1351_s2 + $0x30] sm:$0xff] %v581_v52  ;;  %624 = vst [vmem:[%s1351_s2 + $0x70] sm:$0xff] %v605_v6  ;;  %v583_v53 = vpop.f32.mrb[7].mxu0  ;;  %v607_v5 = vpop.f32.mrb[7].mxu1 }
 0x221   :  { %617 = vst [vmem:[%s1351_s2 + $0x38] sm:$0xff] %v583_v53  ;;  %625 = vst [vmem:[%s1351_s2 + $0x78] sm:$0xff] %v607_v5 }

</bundles_post_ra>
